<compile_context>
chip_gen: v7x
topology: tpu7x:2x2x1
jax: 0.10.0
libtpu: 0.0.40
codegen_flags: <defaults>
</compile_context>

<pallas_src>
import jax
import jax.numpy as jnp
from jax.experimental import pallas as pl
from jax.experimental.pallas import tpu as pltpu

EPS = 1e-5     # nn.InstanceNorm2d default (affine=False, track_running_stats=False)
LANE = 128


# ---------------------------- Pallas kernel ----------------------------

def _ins_resblock_kernel(x_ref, w1_ref, b1_ref, w2_ref, b2_ref, o_ref, pad_ref):
    """One image per grid step.

    x_ref   : (H, W, C)      input activation tile (C padded to lane width)
    w*_ref  : (9, C, C)      conv weights, index = ky*3+kx, layout (cin, cout)
    b*_ref  : (1, C)         conv bias
    o_ref   : (H, W, C)      output tile
    pad_ref : (H+2, W+2, C)  VMEM scratch for the reflection-padded activation
    """
    H, W, C = x_ref.shape
    x = x_ref[...]

    def reflect_pad_into_scratch(t):
        # ReflectionPad2d(1): pad row 0 = row 1, pad row H+1 = row H-2 (same for W).
        pad_ref[1:H + 1, 1:W + 1, :] = t
        pad_ref[0:1, 1:W + 1, :] = t[1:2]
        pad_ref[H + 1:H + 2, 1:W + 1, :] = t[H - 2:H - 1]
        pad_ref[:, 0:1, :] = pad_ref[:, 2:3, :]
        pad_ref[:, W + 1:W + 2, :] = pad_ref[:, W - 1:W, :]

    def conv3x3(t, w_ref, b_ref):
        # 3x3 conv as 9 shifted (H*W, C) @ (C, C) MXU matmuls on the padded tile.
        reflect_pad_into_scratch(t)
        acc = jnp.zeros((H * W, C), jnp.float32)
        for k in range(9):
            ky, kx = divmod(k, 3)
            patch = pad_ref[ky:ky + H, kx:kx + W, :].reshape(H * W, C)
            acc = acc + jnp.dot(patch, w_ref[k],
                                preferred_element_type=jnp.float32)
        return acc + b_ref[...]

    def instance_norm(m):
        # per-channel stats over all H*W pixels of this image (biased variance)
        mean = jnp.mean(m, axis=0, keepdims=True)
        centered = m - mean
        var = jnp.mean(jnp.square(centered), axis=0, keepdims=True)
        return centered * jax.lax.rsqrt(var + EPS)

    h = conv3x3(x, w1_ref, b1_ref)
    h = instance_norm(h)
    h = jnp.maximum(h, 0.0)                      # ReLU
    h = h.reshape(H, W, C)

    h2 = conv3x3(h, w2_ref, b2_ref)
    h2 = instance_norm(h2).reshape(H, W, C)

    # TODO(synk): Dropout(p>0) not implemented; default INSResBlock uses p=0.0.
    o_ref[...] = (h2 + x).astype(o_ref.dtype)


# ---------------------------- wrapper ----------------------------

def ins_resblock_forward(x_nchw, w1, b1, w2, b2):
    """x: (N, C, H, W); conv weights in PyTorch OIHW layout (C, C, 3, 3)."""
    N, C, H, W = x_nchw.shape
    Cp = ((C + LANE - 1) // LANE) * LANE
    dc = Cp - C

    x = jnp.transpose(x_nchw, (0, 2, 3, 1)).astype(jnp.float32)      # NHWC
    if dc:
        x = jnp.pad(x, ((0, 0), (0, 0), (0, 0), (0, dc)))

    def pack_w(w):  # (Cout, Cin, 3, 3) -> (9, Cp, Cp), index ky*3+kx, (cin, cout)
        wm = jnp.transpose(w, (2, 3, 1, 0)).reshape(9, C, C)
        if dc:
            wm = jnp.pad(wm, ((0, 0), (0, dc), (0, dc)))
        return wm.astype(jnp.float32)

    def pack_b(b):
        if dc:
            b = jnp.pad(b, (0, dc))
        return b.reshape(1, Cp).astype(jnp.float32)

    kernel = pl.pallas_call(
        _ins_resblock_kernel,
        out_shape=jax.ShapeDtypeStruct((N, H, W, Cp), jnp.float32),
        grid=(N,),
        in_specs=[
            pl.BlockSpec((None, H, W, Cp), lambda n: (n, 0, 0, 0)),   # x (per image)
            pl.BlockSpec((9, Cp, Cp), lambda n: (0, 0, 0)),           # w1 (resident)
            pl.BlockSpec((1, Cp), lambda n: (0, 0)),                  # b1 (resident)
            pl.BlockSpec((9, Cp, Cp), lambda n: (0, 0, 0)),           # w2 (resident)
            pl.BlockSpec((1, Cp), lambda n: (0, 0)),                  # b2 (resident)
        ],
        out_specs=pl.BlockSpec((None, H, W, Cp), lambda n: (n, 0, 0, 0)),
        scratch_shapes=[pltpu.VMEM((H + 2, W + 2, Cp), jnp.float32)],
        compiler_params=pltpu.CompilerParams(
            dimension_semantics=("parallel",)),
    )
    out = kernel(x, pack_w(w1), pack_b(b1), pack_w(w2), pack_b(b2))   # (N,H,W,Cp)
    out = out[..., :C]
    return jnp.transpose(out, (0, 3, 1, 2))                          # NCHW


# ---------------------------- pure-JAX reference ----------------------------

def reference(x, w1, b1, w2, b2):
    def conv3x3_reflect(v, w, b):
        vp = jnp.pad(v, ((0, 0), (0, 0), (1, 1), (1, 1)), mode="reflect")
        o = jax.lax.conv_general_dilated(
            vp, w, (1, 1), "VALID", dimension_numbers=("NCHW", "OIHW", "NCHW"))
        return o + b[None, :, None, None]

    def inorm(v):
        mean = v.mean(axis=(2, 3), keepdims=True)
        var = v.var(axis=(2, 3), keepdims=True)      # biased, matches InstanceNorm2d
        return (v - mean) / jnp.sqrt(var + EPS)

    h = conv3x3_reflect(x, w1, b1)
    h = inorm(h)
    h = jnp.maximum(h, 0.0)
    h = conv3x3_reflect(h, w2, b2)
    h = inorm(h)
    return h + x


if __name__ == "__main__":
    N, C, H, W = 2, 4, 16, 16
    key = jax.random.PRNGKey(0)
    ks = jax.random.split(key, 5)
    x = jax.random.normal(ks[0], (N, C, H, W), jnp.float32)
    # PyTorch conv weight layout OIHW; inplanes == planes == C (residual add requires it)
    w1 = jax.random.normal(ks[1], (C, C, 3, 3), jnp.float32) * 0.2
    b1 = jax.random.normal(ks[2], (C,), jnp.float32) * 0.1
    w2 = jax.random.normal(ks[3], (C, C, 3, 3), jnp.float32) * 0.2
    b2 = jax.random.normal(ks[4], (C,), jnp.float32) * 0.1

    out = ins_resblock_forward(x, w1, b1, w2, b2)
    out = jax.block_until_ready(out)
    assert out.shape == (N, C, H, W), out.shape

    ref = reference(x, w1, b1, w2, b2)
    err = float(jnp.max(jnp.abs(out - ref)))
    assert err < 1e-3, f"max abs error {err}"
    print("KERNEL_OK")
</pallas_src>

<mosaic_0001>
module attributes {stable_mosaic.version = 11 : i64} {
  func.func @_ins_resblock_kernel(%arg0: i32, %arg1: memref<1x16x16x128xf32, #tpu.memory_space<vmem>>, %arg2: memref<9x128x128xf32, #tpu.memory_space<vmem>>, %arg3: memref<1x128xf32, #tpu.memory_space<vmem>>, %arg4: memref<9x128x128xf32, #tpu.memory_space<vmem>>, %arg5: memref<1x128xf32, #tpu.memory_space<vmem>>, %arg6: memref<1x16x16x128xf32, #tpu.memory_space<vmem>>, %arg7: memref<18x18x128xf32, #tpu.memory_space<vmem>>) attributes {dimension_semantics = [#tpu.dimension_semantics<parallel>], iteration_bounds = array<i64: 2>, scalar_prefetch = 0 : i64, scratch_operands = 1 : i64, tpu.core_type = #tpu.core_type<tc>, window_params = [{transform_indices = @transform_0, window_bounds = array<i64: 1, 16, 16, 128>}, {pipeline_mode = #tpu.pipeline_mode<synchronous>, transform_indices = @transform_1, window_bounds = array<i64: 9, 128, 128>}, {pipeline_mode = #tpu.pipeline_mode<synchronous>, transform_indices = @transform_2, window_bounds = array<i64: 1, 128>}, {pipeline_mode = #tpu.pipeline_mode<synchronous>, transform_indices = @transform_3, window_bounds = array<i64: 9, 128, 128>}, {pipeline_mode = #tpu.pipeline_mode<synchronous>, transform_indices = @transform_4, window_bounds = array<i64: 1, 128>}, {transform_indices = @transform_5, window_bounds = array<i64: 1, 16, 16, 128>}]} {
    %c0 = arith.constant 0 : index
    %c0_0 = arith.constant 0 : index
    %c0_1 = arith.constant 0 : index
    %c0_2 = arith.constant 0 : index
    %0 = vector.load %arg1[%c0, %c0_0, %c0_1, %c0_2] : memref<1x16x16x128xf32, #tpu.memory_space<vmem>>, vector<1x16x16x128xf32>
    %1 = vector.shape_cast %0 : vector<1x16x16x128xf32> to vector<16x16x128xf32>
    %c1 = arith.constant 1 : index
    %c1_3 = arith.constant 1 : index
    %c0_4 = arith.constant 0 : index
    %2 = vector.load %arg7[%c1, %c1_3, %c0_4] : memref<18x18x128xf32, #tpu.memory_space<vmem>>, vector<16x16x128xf32>
    tpu.vector_store %arg7[%c1, %c1_3, %c0_4], %1 {strides = array<i32>} : memref<18x18x128xf32, #tpu.memory_space<vmem>>, vector<16x16x128xf32>,
    %3 = vector.extract_strided_slice %1 {offsets = [1, 0, 0], sizes = [1, 16, 128], strides = [1, 1, 1]} : vector<16x16x128xf32> to vector<1x16x128xf32>
    %c0_5 = arith.constant 0 : index
    %c1_6 = arith.constant 1 : index
    %c0_7 = arith.constant 0 : index
    %4 = vector.load %arg7[%c0_5, %c1_6, %c0_7] : memref<18x18x128xf32, #tpu.memory_space<vmem>>, vector<1x16x128xf32>
    tpu.vector_store %arg7[%c0_5, %c1_6, %c0_7], %3 {strides = array<i32>} : memref<18x18x128xf32, #tpu.memory_space<vmem>>, vector<1x16x128xf32>,
    %5 = vector.extract_strided_slice %1 {offsets = [14, 0, 0], sizes = [1, 16, 128], strides = [1, 1, 1]} : vector<16x16x128xf32> to vector<1x16x128xf32>
    %c17 = arith.constant 17 : index
    %c1_8 = arith.constant 1 : index
    %c0_9 = arith.constant 0 : index
    %6 = vector.load %arg7[%c17, %c1_8, %c0_9] : memref<18x18x128xf32, #tpu.memory_space<vmem>>, vector<1x16x128xf32>
    tpu.vector_store %arg7[%c17, %c1_8, %c0_9], %5 {strides = array<i32>} : memref<18x18x128xf32, #tpu.memory_space<vmem>>, vector<1x16x128xf32>,
    %c0_10 = arith.constant 0 : index
    %c2 = arith.constant 2 : index
    %c0_11 = arith.constant 0 : index
    %7 = vector.load %arg7[%c0_10, %c2, %c0_11] : memref<18x18x128xf32, #tpu.memory_space<vmem>>, vector<18x1x128xf32>
    %c0_12 = arith.constant 0 : index
    %c0_13 = arith.constant 0 : index
    %c0_14 = arith.constant 0 : index
    %8 = vector.load %arg7[%c0_12, %c0_13, %c0_14] : memref<18x18x128xf32, #tpu.memory_space<vmem>>, vector<18x1x128xf32>
    tpu.vector_store %arg7[%c0_12, %c0_13, %c0_14], %7 {strides = array<i32>} : memref<18x18x128xf32, #tpu.memory_space<vmem>>, vector<18x1x128xf32>,
    %c0_15 = arith.constant 0 : index
    %c15 = arith.constant 15 : index
    %c0_16 = arith.constant 0 : index
    %9 = vector.load %arg7[%c0_15, %c15, %c0_16] : memref<18x18x128xf32, #tpu.memory_space<vmem>>, vector<18x1x128xf32>
    %c0_17 = arith.constant 0 : index
    %c17_18 = arith.constant 17 : index
    %c0_19 = arith.constant 0 : index
    %10 = vector.load %arg7[%c0_17, %c17_18, %c0_19] : memref<18x18x128xf32, #tpu.memory_space<vmem>>, vector<18x1x128xf32>
    tpu.vector_store %arg7[%c0_17, %c17_18, %c0_19], %9 {strides = array<i32>} : memref<18x18x128xf32, #tpu.memory_space<vmem>>, vector<18x1x128xf32>,
    %cst = arith.constant 0.000000e+00 : f32
    %11 = vector.broadcast %cst : f32 to vector<256x128xf32>
    %c0_20 = arith.constant 0 : index
    %c0_21 = arith.constant 0 : index
    %c0_22 = arith.constant 0 : index
    %12 = vector.load %arg7[%c0_20, %c0_21, %c0_22] : memref<18x18x128xf32, #tpu.memory_space<vmem>>, vector<16x16x128xf32>
    %13 = vector.shape_cast %12 : vector<16x16x128xf32> to vector<256x128xf32>
    %c0_23 = arith.constant 0 : index
    %c0_24 = arith.constant 0 : index
    %c0_25 = arith.constant 0 : index
    %14 = vector.load %arg2[%c0_23, %c0_24, %c0_25] : memref<9x128x128xf32, #tpu.memory_space<vmem>>, vector<1x128x128xf32>
    %15 = vector.shape_cast %14 : vector<1x128x128xf32> to vector<128x128xf32>
    %cst_26 = arith.constant dense<0.000000e+00> : vector<256x128xf32>
    %16 = tpu.matmul %13, %15, %cst_26 {dimension_numbers = #tpu.dot_dimension_numbers<[1], [0], [0], [1], [0, 0, 1, 1], [], []>} : vector<256x128xf32>, vector<128x128xf32>, vector<256x128xf32> -> vector<256x128xf32>
    %17 = arith.addf %11, %16 : vector<256x128xf32>
    %c0_27 = arith.constant 0 : index
    %c1_28 = arith.constant 1 : index
    %c0_29 = arith.constant 0 : index
    %18 = vector.load %arg7[%c0_27, %c1_28, %c0_29] : memref<18x18x128xf32, #tpu.memory_space<vmem>>, vector<16x16x128xf32>
    %19 = vector.shape_cast %18 : vector<16x16x128xf32> to vector<256x128xf32>
    %c1_30 = arith.constant 1 : index
    %c0_31 = arith.constant 0 : index
    %c0_32 = arith.constant 0 : index
    %20 = vector.load %arg2[%c1_30, %c0_31, %c0_32] : memref<9x128x128xf32, #tpu.memory_space<vmem>>, vector<1x128x128xf32>
    %21 = vector.shape_cast %20 : vector<1x128x128xf32> to vector<128x128xf32>
    %cst_33 = arith.constant dense<0.000000e+00> : vector<256x128xf32>
    %22 = tpu.matmul %19, %21, %cst_33 {dimension_numbers = #tpu.dot_dimension_numbers<[1], [0], [0], [1], [0, 0, 1, 1], [], []>} : vector<256x128xf32>, vector<128x128xf32>, vector<256x128xf32> -> vector<256x128xf32>
    %23 = arith.addf %17, %22 : vector<256x128xf32>
    %c0_34 = arith.constant 0 : index
    %c2_35 = arith.constant 2 : index
    %c0_36 = arith.constant 0 : index
    %24 = vector.load %arg7[%c0_34, %c2_35, %c0_36] : memref<18x18x128xf32, #tpu.memory_space<vmem>>, vector<16x16x128xf32>
    %25 = vector.shape_cast %24 : vector<16x16x128xf32> to vector<256x128xf32>
    %c2_37 = arith.constant 2 : index
    %c0_38 = arith.constant 0 : index
    %c0_39 = arith.constant 0 : index
    %26 = vector.load %arg2[%c2_37, %c0_38, %c0_39] : memref<9x128x128xf32, #tpu.memory_space<vmem>>, vector<1x128x128xf32>
    %27 = vector.shape_cast %26 : vector<1x128x128xf32> to vector<128x128xf32>
    %cst_40 = arith.constant dense<0.000000e+00> : vector<256x128xf32>
    %28 = tpu.matmul %25, %27, %cst_40 {dimension_numbers = #tpu.dot_dimension_numbers<[1], [0], [0], [1], [0, 0, 1, 1], [], []>} : vector<256x128xf32>, vector<128x128xf32>, vector<256x128xf32> -> vector<256x128xf32>
    %29 = arith.addf %23, %28 : vector<256x128xf32>
    %c1_41 = arith.constant 1 : index
    %c0_42 = arith.constant 0 : index
    %c0_43 = arith.constant 0 : index
    %30 = vector.load %arg7[%c1_41, %c0_42, %c0_43] : memref<18x18x128xf32, #tpu.memory_space<vmem>>, vector<16x16x128xf32>
    %31 = vector.shape_cast %30 : vector<16x16x128xf32> to vector<256x128xf32>
    %c3 = arith.constant 3 : index
    %c0_44 = arith.constant 0 : index
    %c0_45 = arith.constant 0 : index
    %32 = vector.load %arg2[%c3, %c0_44, %c0_45] : memref<9x128x128xf32, #tpu.memory_space<vmem>>, vector<1x128x128xf32>
    %33 = vector.shape_cast %32 : vector<1x128x128xf32> to vector<128x128xf32>
    %cst_46 = arith.constant dense<0.000000e+00> : vector<256x128xf32>
    %34 = tpu.matmul %31, %33, %cst_46 {dimension_numbers = #tpu.dot_dimension_numbers<[1], [0], [0], [1], [0, 0, 1, 1], [], []>} : vector<256x128xf32>, vector<128x128xf32>, vector<256x128xf32> -> vector<256x128xf32>
    %35 = arith.addf %29, %34 : vector<256x128xf32>
    %c1_47 = arith.constant 1 : index
    %c1_48 = arith.constant 1 : index
    %c0_49 = arith.constant 0 : index
    %36 = vector.load %arg7[%c1_47, %c1_48, %c0_49] : memref<18x18x128xf32, #tpu.memory_space<vmem>>, vector<16x16x128xf32>
    %37 = vector.shape_cast %36 : vector<16x16x128xf32> to vector<256x128xf32>
    %c4 = arith.constant 4 : index
    %c0_50 = arith.constant 0 : index
    %c0_51 = arith.constant 0 : index
    %38 = vector.load %arg2[%c4, %c0_50, %c0_51] : memref<9x128x128xf32, #tpu.memory_space<vmem>>, vector<1x128x128xf32>
    %39 = vector.shape_cast %38 : vector<1x128x128xf32> to vector<128x128xf32>
    %cst_52 = arith.constant dense<0.000000e+00> : vector<256x128xf32>
    %40 = tpu.matmul %37, %39, %cst_52 {dimension_numbers = #tpu.dot_dimension_numbers<[1], [0], [0], [1], [0, 0, 1, 1], [], []>} : vector<256x128xf32>, vector<128x128xf32>, vector<256x128xf32> -> vector<256x128xf32>
    %41 = arith.addf %35, %40 : vector<256x128xf32>
    %c1_53 = arith.constant 1 : index
    %c2_54 = arith.constant 2 : index
    %c0_55 = arith.constant 0 : index
    %42 = vector.load %arg7[%c1_53, %c2_54, %c0_55] : memref<18x18x128xf32, #tpu.memory_space<vmem>>, vector<16x16x128xf32>
    %43 = vector.shape_cast %42 : vector<16x16x128xf32> to vector<256x128xf32>
    %c5 = arith.constant 5 : index
    %c0_56 = arith.constant 0 : index
    %c0_57 = arith.constant 0 : index
    %44 = vector.load %arg2[%c5, %c0_56, %c0_57] : memref<9x128x128xf32, #tpu.memory_space<vmem>>, vector<1x128x128xf32>
    %45 = vector.shape_cast %44 : vector<1x128x128xf32> to vector<128x128xf32>
    %cst_58 = arith.constant dense<0.000000e+00> : vector<256x128xf32>
    %46 = tpu.matmul %43, %45, %cst_58 {dimension_numbers = #tpu.dot_dimension_numbers<[1], [0], [0], [1], [0, 0, 1, 1], [], []>} : vector<256x128xf32>, vector<128x128xf32>, vector<256x128xf32> -> vector<256x128xf32>
    %47 = arith.addf %41, %46 : vector<256x128xf32>
    %c2_59 = arith.constant 2 : index
    %c0_60 = arith.constant 0 : index
    %c0_61 = arith.constant 0 : index
    %48 = vector.load %arg7[%c2_59, %c0_60, %c0_61] : memref<18x18x128xf32, #tpu.memory_space<vmem>>, vector<16x16x128xf32>
    %49 = vector.shape_cast %48 : vector<16x16x128xf32> to vector<256x128xf32>
    %c6 = arith.constant 6 : index
    %c0_62 = arith.constant 0 : index
    %c0_63 = arith.constant 0 : index
    %50 = vector.load %arg2[%c6, %c0_62, %c0_63] : memref<9x128x128xf32, #tpu.memory_space<vmem>>, vector<1x128x128xf32>
    %51 = vector.shape_cast %50 : vector<1x128x128xf32> to vector<128x128xf32>
    %cst_64 = arith.constant dense<0.000000e+00> : vector<256x128xf32>
    %52 = tpu.matmul %49, %51, %cst_64 {dimension_numbers = #tpu.dot_dimension_numbers<[1], [0], [0], [1], [0, 0, 1, 1], [], []>} : vector<256x128xf32>, vector<128x128xf32>, vector<256x128xf32> -> vector<256x128xf32>
    %53 = arith.addf %47, %52 : vector<256x128xf32>
    %c2_65 = arith.constant 2 : index
    %c1_66 = arith.constant 1 : index
    %c0_67 = arith.constant 0 : index
    %54 = vector.load %arg7[%c2_65, %c1_66, %c0_67] : memref<18x18x128xf32, #tpu.memory_space<vmem>>, vector<16x16x128xf32>
    %55 = vector.shape_cast %54 : vector<16x16x128xf32> to vector<256x128xf32>
    %c7 = arith.constant 7 : index
    %c0_68 = arith.constant 0 : index
    %c0_69 = arith.constant 0 : index
    %56 = vector.load %arg2[%c7, %c0_68, %c0_69] : memref<9x128x128xf32, #tpu.memory_space<vmem>>, vector<1x128x128xf32>
    %57 = vector.shape_cast %56 : vector<1x128x128xf32> to vector<128x128xf32>
    %cst_70 = arith.constant dense<0.000000e+00> : vector<256x128xf32>
    %58 = tpu.matmul %55, %57, %cst_70 {dimension_numbers = #tpu.dot_dimension_numbers<[1], [0], [0], [1], [0, 0, 1, 1], [], []>} : vector<256x128xf32>, vector<128x128xf32>, vector<256x128xf32> -> vector<256x128xf32>
    %59 = arith.addf %53, %58 : vector<256x128xf32>
    %c2_71 = arith.constant 2 : index
    %c2_72 = arith.constant 2 : index
    %c0_73 = arith.constant 0 : index
    %60 = vector.load %arg7[%c2_71, %c2_72, %c0_73] : memref<18x18x128xf32, #tpu.memory_space<vmem>>, vector<16x16x128xf32>
    %61 = vector.shape_cast %60 : vector<16x16x128xf32> to vector<256x128xf32>
    %c8 = arith.constant 8 : index
    %c0_74 = arith.constant 0 : index
    %c0_75 = arith.constant 0 : index
    %62 = vector.load %arg2[%c8, %c0_74, %c0_75] : memref<9x128x128xf32, #tpu.memory_space<vmem>>, vector<1x128x128xf32>
    %63 = vector.shape_cast %62 : vector<1x128x128xf32> to vector<128x128xf32>
    %cst_76 = arith.constant dense<0.000000e+00> : vector<256x128xf32>
    %64 = tpu.matmul %61, %63, %cst_76 {dimension_numbers = #tpu.dot_dimension_numbers<[1], [0], [0], [1], [0, 0, 1, 1], [], []>} : vector<256x128xf32>, vector<128x128xf32>, vector<256x128xf32> -> vector<256x128xf32>
    %65 = arith.addf %59, %64 : vector<256x128xf32>
    %c0_77 = arith.constant 0 : index
    %c0_78 = arith.constant 0 : index
    %66 = vector.load %arg3[%c0_77, %c0_78] : memref<1x128xf32, #tpu.memory_space<vmem>>, vector<1x128xf32>
    %67 = vector.broadcast %66 : vector<1x128xf32> to vector<256x128xf32>
    %68 = arith.addf %65, %67 : vector<256x128xf32>
    %cst_79 = arith.constant dense<0.000000e+00> : vector<128xf32>
    %69 = vector.multi_reduction <add>, %68, %cst_79 [0] : vector<256x128xf32> to vector<128xf32>
    %70 = vector.shape_cast %69 : vector<128xf32> to vector<1x128xf32>
    %cst_80 = arith.constant 2.560000e+02 : f32
    %71 = vector.broadcast %cst_80 : f32 to vector<1x128xf32>
    %72 = arith.divf %70, %71 : vector<1x128xf32>
    %73 = vector.broadcast %72 : vector<1x128xf32> to vector<256x128xf32>
    %74 = arith.subf %68, %73 : vector<256x128xf32>
    %75 = arith.mulf %74, %74 : vector<256x128xf32>
    %cst_81 = arith.constant dense<0.000000e+00> : vector<128xf32>
    %76 = vector.multi_reduction <add>, %75, %cst_81 [0] : vector<256x128xf32> to vector<128xf32>
    %77 = vector.shape_cast %76 : vector<128xf32> to vector<1x128xf32>
    %cst_82 = arith.constant 2.560000e+02 : f32
    %78 = vector.broadcast %cst_82 : f32 to vector<1x128xf32>
    %79 = arith.divf %77, %78 : vector<1x128xf32>
    %cst_83 = arith.constant 9.99999974E-6 : f32
    %80 = vector.broadcast %cst_83 : f32 to vector<1x128xf32>
    %81 = arith.addf %79, %80 : vector<1x128xf32>
    %82 = math.rsqrt %81 : vector<1x128xf32>
    %83 = vector.broadcast %82 : vector<1x128xf32> to vector<256x128xf32>
    %84 = arith.mulf %74, %83 : vector<256x128xf32>
    %cst_84 = arith.constant 0.000000e+00 : f32
    %85 = vector.broadcast %cst_84 : f32 to vector<256x128xf32>
    %86 = arith.maximumf %84, %85 : vector<256x128xf32>
    %87 = vector.shape_cast %86 : vector<256x128xf32> to vector<16x16x128xf32>
    %c1_85 = arith.constant 1 : index
    %c1_86 = arith.constant 1 : index
    %c0_87 = arith.constant 0 : index
    %88 = vector.load %arg7[%c1_85, %c1_86, %c0_87] : memref<18x18x128xf32, #tpu.memory_space<vmem>>, vector<16x16x128xf32>
    tpu.vector_store %arg7[%c1_85, %c1_86, %c0_87], %87 {strides = array<i32>} : memref<18x18x128xf32, #tpu.memory_space<vmem>>, vector<16x16x128xf32>,
    %89 = vector.extract_strided_slice %87 {offsets = [1, 0, 0], sizes = [1, 16, 128], strides = [1, 1, 1]} : vector<16x16x128xf32> to vector<1x16x128xf32>
    %c0_88 = arith.constant 0 : index
    %c1_89 = arith.constant 1 : index
    %c0_90 = arith.constant 0 : index
    %90 = vector.load %arg7[%c0_88, %c1_89, %c0_90] : memref<18x18x128xf32, #tpu.memory_space<vmem>>, vector<1x16x128xf32>
    tpu.vector_store %arg7[%c0_88, %c1_89, %c0_90], %89 {strides = array<i32>} : memref<18x18x128xf32, #tpu.memory_space<vmem>>, vector<1x16x128xf32>,
    %91 = vector.extract_strided_slice %87 {offsets = [14, 0, 0], sizes = [1, 16, 128], strides = [1, 1, 1]} : vector<16x16x128xf32> to vector<1x16x128xf32>
    %c17_91 = arith.constant 17 : index
    %c1_92 = arith.constant 1 : index
    %c0_93 = arith.constant 0 : index
    %92 = vector.load %arg7[%c17_91, %c1_92, %c0_93] : memref<18x18x128xf32, #tpu.memory_space<vmem>>, vector<1x16x128xf32>
    tpu.vector_store %arg7[%c17_91, %c1_92, %c0_93], %91 {strides = array<i32>} : memref<18x18x128xf32, #tpu.memory_space<vmem>>, vector<1x16x128xf32>,
    %c0_94 = arith.constant 0 : index
    %c2_95 = arith.constant 2 : index
    %c0_96 = arith.constant 0 : index
    %93 = vector.load %arg7[%c0_94, %c2_95, %c0_96] : memref<18x18x128xf32, #tpu.memory_space<vmem>>, vector<18x1x128xf32>
    %c0_97 = arith.constant 0 : index
    %c0_98 = arith.constant 0 : index
    %c0_99 = arith.constant 0 : index
    %94 = vector.load %arg7[%c0_97, %c0_98, %c0_99] : memref<18x18x128xf32, #tpu.memory_space<vmem>>, vector<18x1x128xf32>
    tpu.vector_store %arg7[%c0_97, %c0_98, %c0_99], %93 {strides = array<i32>} : memref<18x18x128xf32, #tpu.memory_space<vmem>>, vector<18x1x128xf32>,
    %c0_100 = arith.constant 0 : index
    %c15_101 = arith.constant 15 : index
    %c0_102 = arith.constant 0 : index
    %95 = vector.load %arg7[%c0_100, %c15_101, %c0_102] : memref<18x18x128xf32, #tpu.memory_space<vmem>>, vector<18x1x128xf32>
    %c0_103 = arith.constant 0 : index
    %c17_104 = arith.constant 17 : index
    %c0_105 = arith.constant 0 : index
    %96 = vector.load %arg7[%c0_103, %c17_104, %c0_105] : memref<18x18x128xf32, #tpu.memory_space<vmem>>, vector<18x1x128xf32>
    tpu.vector_store %arg7[%c0_103, %c17_104, %c0_105], %95 {strides = array<i32>} : memref<18x18x128xf32, #tpu.memory_space<vmem>>, vector<18x1x128xf32>,
    %cst_106 = arith.constant 0.000000e+00 : f32
    %97 = vector.broadcast %cst_106 : f32 to vector<256x128xf32>
    %c0_107 = arith.constant 0 : index
    %c0_108 = arith.constant 0 : index
    %c0_109 = arith.constant 0 : index
    %98 = vector.load %arg7[%c0_107, %c0_108, %c0_109] : memref<18x18x128xf32, #tpu.memory_space<vmem>>, vector<16x16x128xf32>
    %99 = vector.shape_cast %98 : vector<16x16x128xf32> to vector<256x128xf32>
    %c0_110 = arith.constant 0 : index
    %c0_111 = arith.constant 0 : index
    %c0_112 = arith.constant 0 : index
    %100 = vector.load %arg4[%c0_110, %c0_111, %c0_112] : memref<9x128x128xf32, #tpu.memory_space<vmem>>, vector<1x128x128xf32>
    %101 = vector.shape_cast %100 : vector<1x128x128xf32> to vector<128x128xf32>
    %cst_113 = arith.constant dense<0.000000e+00> : vector<256x128xf32>
    %102 = tpu.matmul %99, %101, %cst_113 {dimension_numbers = #tpu.dot_dimension_numbers<[1], [0], [0], [1], [0, 0, 1, 1], [], []>} : vector<256x128xf32>, vector<128x128xf32>, vector<256x128xf32> -> vector<256x128xf32>
    %103 = arith.addf %97, %102 : vector<256x128xf32>
    %c0_114 = arith.constant 0 : index
    %c1_115 = arith.constant 1 : index
    %c0_116 = arith.constant 0 : index
    %104 = vector.load %arg7[%c0_114, %c1_115, %c0_116] : memref<18x18x128xf32, #tpu.memory_space<vmem>>, vector<16x16x128xf32>
    %105 = vector.shape_cast %104 : vector<16x16x128xf32> to vector<256x128xf32>
    %c1_117 = arith.constant 1 : index
    %c0_118 = arith.constant 0 : index
    %c0_119 = arith.constant 0 : index
    %106 = vector.load %arg4[%c1_117, %c0_118, %c0_119] : memref<9x128x128xf32, #tpu.memory_space<vmem>>, vector<1x128x128xf32>
    %107 = vector.shape_cast %106 : vector<1x128x128xf32> to vector<128x128xf32>
    %cst_120 = arith.constant dense<0.000000e+00> : vector<256x128xf32>
    %108 = tpu.matmul %105, %107, %cst_120 {dimension_numbers = #tpu.dot_dimension_numbers<[1], [0], [0], [1], [0, 0, 1, 1], [], []>} : vector<256x128xf32>, vector<128x128xf32>, vector<256x128xf32> -> vector<256x128xf32>
    %109 = arith.addf %103, %108 : vector<256x128xf32>
    %c0_121 = arith.constant 0 : index
    %c2_122 = arith.constant 2 : index
    %c0_123 = arith.constant 0 : index
    %110 = vector.load %arg7[%c0_121, %c2_122, %c0_123] : memref<18x18x128xf32, #tpu.memory_space<vmem>>, vector<16x16x128xf32>
    %111 = vector.shape_cast %110 : vector<16x16x128xf32> to vector<256x128xf32>
    %c2_124 = arith.constant 2 : index
    %c0_125 = arith.constant 0 : index
    %c0_126 = arith.constant 0 : index
    %112 = vector.load %arg4[%c2_124, %c0_125, %c0_126] : memref<9x128x128xf32, #tpu.memory_space<vmem>>, vector<1x128x128xf32>
    %113 = vector.shape_cast %112 : vector<1x128x128xf32> to vector<128x128xf32>
    %cst_127 = arith.constant dense<0.000000e+00> : vector<256x128xf32>
    %114 = tpu.matmul %111, %113, %cst_127 {dimension_numbers = #tpu.dot_dimension_numbers<[1], [0], [0], [1], [0, 0, 1, 1], [], []>} : vector<256x128xf32>, vector<128x128xf32>, vector<256x128xf32> -> vector<256x128xf32>
    %115 = arith.addf %109, %114 : vector<256x128xf32>
    %c1_128 = arith.constant 1 : index
    %c0_129 = arith.constant 0 : index
    %c0_130 = arith.constant 0 : index
    %116 = vector.load %arg7[%c1_128, %c0_129, %c0_130] : memref<18x18x128xf32, #tpu.memory_space<vmem>>, vector<16x16x128xf32>
    %117 = vector.shape_cast %116 : vector<16x16x128xf32> to vector<256x128xf32>
    %c3_131 = arith.constant 3 : index
    %c0_132 = arith.constant 0 : index
    %c0_133 = arith.constant 0 : index
    %118 = vector.load %arg4[%c3_131, %c0_132, %c0_133] : memref<9x128x128xf32, #tpu.memory_space<vmem>>, vector<1x128x128xf32>
    %119 = vector.shape_cast %118 : vector<1x128x128xf32> to vector<128x128xf32>
    %cst_134 = arith.constant dense<0.000000e+00> : vector<256x128xf32>
    %120 = tpu.matmul %117, %119, %cst_134 {dimension_numbers = #tpu.dot_dimension_numbers<[1], [0], [0], [1], [0, 0, 1, 1], [], []>} : vector<256x128xf32>, vector<128x128xf32>, vector<256x128xf32> -> vector<256x128xf32>
    %121 = arith.addf %115, %120 : vector<256x128xf32>
    %c1_135 = arith.constant 1 : index
    %c1_136 = arith.constant 1 : index
    %c0_137 = arith.constant 0 : index
    %122 = vector.load %arg7[%c1_135, %c1_136, %c0_137] : memref<18x18x128xf32, #tpu.memory_space<vmem>>, vector<16x16x128xf32>
    %123 = vector.shape_cast %122 : vector<16x16x128xf32> to vector<256x128xf32>
    %c4_138 = arith.constant 4 : index
    %c0_139 = arith.constant 0 : index
    %c0_140 = arith.constant 0 : index
    %124 = vector.load %arg4[%c4_138, %c0_139, %c0_140] : memref<9x128x128xf32, #tpu.memory_space<vmem>>, vector<1x128x128xf32>
    %125 = vector.shape_cast %124 : vector<1x128x128xf32> to vector<128x128xf32>
    %cst_141 = arith.constant dense<0.000000e+00> : vector<256x128xf32>
    %126 = tpu.matmul %123, %125, %cst_141 {dimension_numbers = #tpu.dot_dimension_numbers<[1], [0], [0], [1], [0, 0, 1, 1], [], []>} : vector<256x128xf32>, vector<128x128xf32>, vector<256x128xf32> -> vector<256x128xf32>
    %127 = arith.addf %121, %126 : vector<256x128xf32>
    %c1_142 = arith.constant 1 : index
    %c2_143 = arith.constant 2 : index
    %c0_144 = arith.constant 0 : index
    %128 = vector.load %arg7[%c1_142, %c2_143, %c0_144] : memref<18x18x128xf32, #tpu.memory_space<vmem>>, vector<16x16x128xf32>
    %129 = vector.shape_cast %128 : vector<16x16x128xf32> to vector<256x128xf32>
    %c5_145 = arith.constant 5 : index
    %c0_146 = arith.constant 0 : index
    %c0_147 = arith.constant 0 : index
    %130 = vector.load %arg4[%c5_145, %c0_146, %c0_147] : memref<9x128x128xf32, #tpu.memory_space<vmem>>, vector<1x128x128xf32>
    %131 = vector.shape_cast %130 : vector<1x128x128xf32> to vector<128x128xf32>
    %cst_148 = arith.constant dense<0.000000e+00> : vector<256x128xf32>
    %132 = tpu.matmul %129, %131, %cst_148 {dimension_numbers = #tpu.dot_dimension_numbers<[1], [0], [0], [1], [0, 0, 1, 1], [], []>} : vector<256x128xf32>, vector<128x128xf32>, vector<256x128xf32> -> vector<256x128xf32>
    %133 = arith.addf %127, %132 : vector<256x128xf32>
    %c2_149 = arith.constant 2 : index
    %c0_150 = arith.constant 0 : index
    %c0_151 = arith.constant 0 : index
    %134 = vector.load %arg7[%c2_149, %c0_150, %c0_151] : memref<18x18x128xf32, #tpu.memory_space<vmem>>, vector<16x16x128xf32>
    %135 = vector.shape_cast %134 : vector<16x16x128xf32> to vector<256x128xf32>
    %c6_152 = arith.constant 6 : index
    %c0_153 = arith.constant 0 : index
    %c0_154 = arith.constant 0 : index
    %136 = vector.load %arg4[%c6_152, %c0_153, %c0_154] : memref<9x128x128xf32, #tpu.memory_space<vmem>>, vector<1x128x128xf32>
    %137 = vector.shape_cast %136 : vector<1x128x128xf32> to vector<128x128xf32>
    %cst_155 = arith.constant dense<0.000000e+00> : vector<256x128xf32>
    %138 = tpu.matmul %135, %137, %cst_155 {dimension_numbers = #tpu.dot_dimension_numbers<[1], [0], [0], [1], [0, 0, 1, 1], [], []>} : vector<256x128xf32>, vector<128x128xf32>, vector<256x128xf32> -> vector<256x128xf32>
    %139 = arith.addf %133, %138 : vector<256x128xf32>
    %c2_156 = arith.constant 2 : index
    %c1_157 = arith.constant 1 : index
    %c0_158 = arith.constant 0 : index
    %140 = vector.load %arg7[%c2_156, %c1_157, %c0_158] : memref<18x18x128xf32, #tpu.memory_space<vmem>>, vector<16x16x128xf32>
    %141 = vector.shape_cast %140 : vector<16x16x128xf32> to vector<256x128xf32>
    %c7_159 = arith.constant 7 : index
    %c0_160 = arith.constant 0 : index
    %c0_161 = arith.constant 0 : index
    %142 = vector.load %arg4[%c7_159, %c0_160, %c0_161] : memref<9x128x128xf32, #tpu.memory_space<vmem>>, vector<1x128x128xf32>
    %143 = vector.shape_cast %142 : vector<1x128x128xf32> to vector<128x128xf32>
    %cst_162 = arith.constant dense<0.000000e+00> : vector<256x128xf32>
    %144 = tpu.matmul %141, %143, %cst_162 {dimension_numbers = #tpu.dot_dimension_numbers<[1], [0], [0], [1], [0, 0, 1, 1], [], []>} : vector<256x128xf32>, vector<128x128xf32>, vector<256x128xf32> -> vector<256x128xf32>
    %145 = arith.addf %139, %144 : vector<256x128xf32>
    %c2_163 = arith.constant 2 : index
    %c2_164 = arith.constant 2 : index
    %c0_165 = arith.constant 0 : index
    %146 = vector.load %arg7[%c2_163, %c2_164, %c0_165] : memref<18x18x128xf32, #tpu.memory_space<vmem>>, vector<16x16x128xf32>
    %147 = vector.shape_cast %146 : vector<16x16x128xf32> to vector<256x128xf32>
    %c8_166 = arith.constant 8 : index
    %c0_167 = arith.constant 0 : index
    %c0_168 = arith.constant 0 : index
    %148 = vector.load %arg4[%c8_166, %c0_167, %c0_168] : memref<9x128x128xf32, #tpu.memory_space<vmem>>, vector<1x128x128xf32>
    %149 = vector.shape_cast %148 : vector<1x128x128xf32> to vector<128x128xf32>
    %cst_169 = arith.constant dense<0.000000e+00> : vector<256x128xf32>
    %150 = tpu.matmul %147, %149, %cst_169 {dimension_numbers = #tpu.dot_dimension_numbers<[1], [0], [0], [1], [0, 0, 1, 1], [], []>} : vector<256x128xf32>, vector<128x128xf32>, vector<256x128xf32> -> vector<256x128xf32>
    %151 = arith.addf %145, %150 : vector<256x128xf32>
    %c0_170 = arith.constant 0 : index
    %c0_171 = arith.constant 0 : index
    %152 = vector.load %arg5[%c0_170, %c0_171] : memref<1x128xf32, #tpu.memory_space<vmem>>, vector<1x128xf32>
    %153 = vector.broadcast %152 : vector<1x128xf32> to vector<256x128xf32>
    %154 = arith.addf %151, %153 : vector<256x128xf32>
    %cst_172 = arith.constant dense<0.000000e+00> : vector<128xf32>
    %155 = vector.multi_reduction <add>, %154, %cst_172 [0] : vector<256x128xf32> to vector<128xf32>
    %156 = vector.shape_cast %155 : vector<128xf32> to vector<1x128xf32>
    %cst_173 = arith.constant 2.560000e+02 : f32
    %157 = vector.broadcast %cst_173 : f32 to vector<1x128xf32>
    %158 = arith.divf %156, %157 : vector<1x128xf32>
    %159 = vector.broadcast %158 : vector<1x128xf32> to vector<256x128xf32>
    %160 = arith.subf %154, %159 : vector<256x128xf32>
    %161 = arith.mulf %160, %160 : vector<256x128xf32>
    %cst_174 = arith.constant dense<0.000000e+00> : vector<128xf32>
    %162 = vector.multi_reduction <add>, %161, %cst_174 [0] : vector<256x128xf32> to vector<128xf32>
    %163 = vector.shape_cast %162 : vector<128xf32> to vector<1x128xf32>
    %cst_175 = arith.constant 2.560000e+02 : f32
    %164 = vector.broadcast %cst_175 : f32 to vector<1x128xf32>
    %165 = arith.divf %163, %164 : vector<1x128xf32>
    %cst_176 = arith.constant 9.99999974E-6 : f32
    %166 = vector.broadcast %cst_176 : f32 to vector<1x128xf32>
    %167 = arith.addf %165, %166 : vector<1x128xf32>
    %168 = math.rsqrt %167 : vector<1x128xf32>
    %169 = vector.broadcast %168 : vector<1x128xf32> to vector<256x128xf32>
    %170 = arith.mulf %160, %169 : vector<256x128xf32>
    %171 = vector.shape_cast %170 : vector<256x128xf32> to vector<16x16x128xf32>
    %172 = arith.addf %171, %1 : vector<16x16x128xf32>
    %c0_177 = arith.constant 0 : index
    %c0_178 = arith.constant 0 : index
    %c0_179 = arith.constant 0 : index
    %c0_180 = arith.constant 0 : index
    %173 = vector.load %arg6[%c0_177, %c0_178, %c0_179, %c0_180] : memref<1x16x16x128xf32, #tpu.memory_space<vmem>>, vector<1x16x16x128xf32>
    %174 = vector.shape_cast %173 : vector<1x16x16x128xf32> to vector<16x16x128xf32>
    %175 = vector.shape_cast %172 : vector<16x16x128xf32> to vector<1x16x16x128xf32>
    tpu.vector_store %arg6[%c0_177, %c0_178, %c0_179, %c0_180], %175 {strides = array<i32>} : memref<1x16x16x128xf32, #tpu.memory_space<vmem>>, vector<1x16x16x128xf32>,
    return
  }
  func.func @transform_0(%arg0: i32) -> (i32, i32, i32, i32) {
    %c0_i32 = arith.constant 0 : i32
    %c0_i32_0 = arith.constant 0 : i32
    %c0_i32_1 = arith.constant 0 : i32
    %c0_i32_2 = arith.constant 0 : i32
    return %arg0, %c0_i32, %c0_i32_0, %c0_i32_1 : i32, i32, i32, i32
  }
  func.func @transform_1(%arg0: i32) -> (i32, i32, i32) {
    %c0_i32 = arith.constant 0 : i32
    %c0_i32_0 = arith.constant 0 : i32
    %c0_i32_1 = arith.constant 0 : i32
    %c0_i32_2 = arith.constant 0 : i32
    return %c0_i32, %c0_i32_0, %c0_i32_1 : i32, i32, i32
  }
  func.func @transform_2(%arg0: i32) -> (i32, i32) {
    %c0_i32 = arith.constant 0 : i32
    %c0_i32_0 = arith.constant 0 : i32
    %c0_i32_1 = arith.constant 0 : i32
    return %c0_i32, %c0_i32_0 : i32, i32
  }
  func.func @transform_3(%arg0: i32) -> (i32, i32, i32) {
    %c0_i32 = arith.constant 0 : i32
    %c0_i32_0 = arith.constant 0 : i32
    %c0_i32_1 = arith.constant 0 : i32
    %c0_i32_2 = arith.constant 0 : i32
    return %c0_i32, %c0_i32_0, %c0_i32_1 : i32, i32, i32
  }
  func.func @transform_4(%arg0: i32) -> (i32, i32) {
    %c0_i32 = arith.constant 0 : i32
    %c0_i32_0 = arith.constant 0 : i32
    %c0_i32_1 = arith.constant 0 : i32
    return %c0_i32, %c0_i32_0 : i32, i32
  }
  func.func @transform_5(%arg0: i32) -> (i32, i32, i32, i32) {
    %c0_i32 = arith.constant 0 : i32
    %c0_i32_0 = arith.constant 0 : i32
    %c0_i32_1 = arith.constant 0 : i32
    %c0_i32_2 = arith.constant 0 : i32
    return %arg0, %c0_i32, %c0_i32_0, %c0_i32_1 : i32, i32, i32, i32
  }
}

</mosaic_0001>

<bundles_post_ra>
// kernel: tpu_custom_call.1
= control target key start
LH: loop header
LB: loop body
LE: loop exit
PB: predicated region body
PF: predicated region fallthrough
CT: control target
= control target key end

     0   :  { %10 = vsyncpa [#allocation4], 0  ;;  %s12238_s0 = inlined_call_operand.hbm [shape: f32[2,16,16,128], index: 0, kind: input, shape index: {}]   ;;  %s12239_s1 = inlined_call_operand.hbm [shape: f32[9,128,128], index: 1, kind: input, shape index: {}]   ;;  %s12240_s2 = inlined_call_operand.vmem [shape: f32[1,128], index: 2, kind: input, shape index: {}]   ;;  %s12241_s3 = inlined_call_operand.hbm [shape: f32[9,128,128], index: 3, kind: input, shape index: {}]   ;;  %s12242_s4 = inlined_call_operand.vmem [shape: f32[1,128], index: 4, kind: input, shape index: {}]   ;;  %s12243_s5 = inlined_call_operand.hbm [shape: f32[2,16,16,128], index: 5, kind: output, shape index: {}]  }
   0x1   :  { %12 = vsyncpa [#allocation4 + $0x1], 0 }
   0x2   :  { %13 = vsyncpa [#allocation7], 0 }
   0x3   :  { %14 = vsyncpa [#allocation5], 0 }
   0x4   :  { %16 = vsyncpa [#allocation5 + $0x1], 0  ;;  %s10232_s18 = smov 0   ;;  %s10234_s19 = smov 0  }
   0x5   :  { %s10236_s20 = smov 0   ;;  %s10238_s21 = smov 0  }
   0x6 LB: > { %s10253_s22 = sadd.s32 4294967295, %s10192_s21   ;;  %s6530_s23 = sadd.s32 4294967294, %s10192_s21   ;;  %s10192_s21 = sphi %s10238_s21, %s12429_s21   ;;  %s10188_s20 = sphi %s10236_s20, %s12428_s20   ;;  %s10184_s19 = sphi %s10234_s19, %s12427_s19   ;;  %s10180_s18 = sphi %s10232_s18, %s12426_s18  }
   0x7   : > { %p42_p0 = scmp.ne.s32.totalorder %s10184_s19, %s10180_s18  ;;  %p12244_p1 = scmp.eq.s32.totalorder %s10253_s22, 0 }
   0x8   : > { %p156_p3 = scmp.eq.s32.totalorder %s6530_s23, 1  ;;  %p6531_p5 = scmp.ge.s32.totalorder %s10192_s21, 1 }
   0x9   : > { %p10262_p4 = por %p12244_p1, %p42_p0  ;;  %p163_p7 = scmp.lt.s32.totalorder %s10192_s21, 3 }
   0xa   : > { %p10267_p6 = por %p156_p3, %p42_p0  ;;  %s10194_s27 = smov [#allocation6]  }
   0xb   : > { %s12306_s24 = scalar_select %p10262_p4, 1, 0 }
   0xc   : > { %s12307_s25 = scalar_select %p10267_p6, 1, 0 }
   0xd   : > { %p10272_p8 = pnand %p6531_p5, %p163_p7  ;;  %s175_s28 = sshll.u32 %s10194_s27, 4  ;;  %s10276_s28 = int_to_ptr.vmem [resolvable:$true] %s175_s28 }
   0xe   : > { %s10195_s30 = smov [#allocation8]   ;;  %s10036_s9 = scalar_lea.hbm %s12239_s1, 18432 }
   0xf   : > { %p9956_p9 = pneg %p10272_p8  ;;  %s191_s6 = sshll.u32 %s10195_s30, 4  ;;  %s10287_s6 = int_to_ptr.vmem [resolvable:$true] %s191_s6 }
  0x10   : > { %p10037_p12 = scmp.ne.s32.totalorder %s12239_s1, %s10036_s9  ;;  %p10043_p5 = scmp.lt.u32.totalorder %s10036_s9, %s12239_s1 }
  0x11   : > { %p10283_p11 = pnand %p9956_p9, %p12244_p1 }
  0x13   : > { %p10038_p13 = pneg %p10283_p11 }
  0x15   : > { %p10039_p0 = pnand %p10038_p13, %p10037_p12 }
  0x17   : > { %p10040_p3 = pneg %p10039_p0 }
  0x19   : > { %p10045_p7 = pnand %p10043_p5, %p10040_p3 }
  0x1b   : > { %10048 = shalt.err (!%p10045_p7)
}
  0x1c   : > { %s10049_s14 = scalar_lea.vmem %s10276_s28, 18432  ;;  %p10057_p2 = scmp.lt.s32.totalorder %s10276_s28, %s10276_s28 }
  0x1d   : > { %p10050_p9 = scmp.ne.s32.totalorder %s10276_s28, %s10049_s14  ;;  %p10058_p12 = scmp.lt.s32.totalorder %s10049_s14, %s10049_s14 }
  0x1f   : > { %p10052_p10 = pnand %p10050_p9, %p10038_p13  ;;  %p10059_p0 = por %p10058_p12, %p10057_p2 }
  0x21   : > { %p10053_p1 = pneg %p10052_p10 }
  0x23   : > { %p10060_p6 = pnand %p10059_p0, %p10053_p1 }
  0x25   : > { %10063 = shalt.err (!%p10060_p6)
}
  0x26   : > { %s10196_s15 = smov 128   ;;  %s10197_s16 = smov 8  }
  0x27   : > { %9959 = dma.hbm_to_vmem [thread:$0]  (!%p10283_p11), %s12239_s1, 18432, %s10276_s28, [#allocation7], %s10196_s15, %s10196_s15, %s10197_s16  }
  0x28   : > { %s10064_s7 = scalar_lea.hbm %s12241_s3, 18432 }
  0x29   : > { %p10065_p1 = scmp.ne.s32.totalorder %s12241_s3, %s10064_s7  ;;  %p10071_p10 = scmp.lt.u32.totalorder %s10064_s7, %s12241_s3 }
  0x2b   : > { %p10067_p2 = pnand %p10065_p1, %p10038_p13 }
  0x2d   : > { %p10068_p6 = pneg %p10067_p2 }
  0x2f   : > { %p10073_p3 = pnand %p10071_p10, %p10068_p6 }
  0x31   : > { %10076 = shalt.err (!%p10073_p3)
}
  0x32   : > { %s10077_s28 = scalar_lea.vmem %s10287_s6, 18432  ;;  %p10085_p12 = scmp.lt.s32.totalorder %s10287_s6, %s10287_s6 }
  0x33   : > { %p10078_p5 = scmp.ne.s32.totalorder %s10287_s6, %s10077_s28  ;;  %p10086_p0 = scmp.lt.s32.totalorder %s10077_s28, %s10077_s28 }
  0x35   : > { %p10080_p7 = pnand %p10078_p5, %p10038_p13  ;;  %p10087_p1 = por %p10086_p0, %p10085_p12 }
  0x37   : > { %p10081_p9 = pneg %p10080_p7 }
  0x39   : > { %p10088_p2 = pnand %p10087_p1, %p10081_p9 }
  0x3b   : > { %10091 = shalt.err (!%p10088_p2)
}
  0x3c   : > { %9962 = dma.hbm_to_vmem [thread:$0]  (!%p10283_p11), %s12241_s3, 18432, %s10287_s6, [#allocation7], %s10196_s15, %s10196_s15, %s10197_s16  }
  0x3d   : > { %s10348_s29 = sadd.s32 1, %s10192_s21   ;;  %s29_s14 = sadd.s32 1, %s10188_s20 }
  0x3e   : > { %s26_s17 = ssub.s32 %s10192_s21, %s10348_s29  ;;  %p36_p13 = scmp.ne.s32.totalorder %s10188_s20, %s10184_s19 }
  0x3f   : > { %p27_p6 = scmp.eq.s32.totalorder %s26_s17, 0  ;;  %p37_p10 = scmp.eq.s32.totalorder %s10192_s21, 0 }
  0x40   : > { %p12310_p3 = scmp.eq.s32.totalorder %s10253_s22, 1  ;;  %p9973_p7 = scmp.lt.s32.totalorder %s10192_s21, 2 }
  0x41   : > { %s10364_s27 = scalar_select %p27_p6, %s10188_s20, %s29_s14  }
  0x42   : > { %p10358_p5 = por %p12310_p3, %p36_p13  ;;  %p38_p9 = por %p37_p10, %p36_p13 }
  0x43   : > { %s208_s30 = sand.u32 1, %s10188_s20   ;;  %s6550_s6 = sshll.u32 %s10192_s21, 12 }
  0x44   : > { %s12311_s23 = scalar_select %p10358_p5, 1, 0 }
  0x45   : > { %s6535_s7 = sshll.u32 %s208_s30, 8  ;;  %s10371_s10 = scalar_lea.hbm %s12238_s0, %s6550_s6 }
  0x46   : > { %s212_s11 = scalar_lea.vmem [#allocation3], %s6535_s7  ;;  %p10375_p11 = pnand %p9973_p7, %p38_p9 }
  0x47   : > { %s219_s28 = sshll.u32 %s212_s11, 4  ;;  %s10379_s13 = scalar_lea.sflag [#allocation4], %s208_s30  ;;  %s10373_s28 = int_to_ptr.vmem [resolvable:$true] %s219_s28 }
  0x48   : > { %s10092_s14 = scalar_lea.hbm %s10371_s10, 4096  ;;  %p10094_p0 = pneg %p10375_p11 }
  0x49   : > { %p10093_p12 = scmp.ne.s32.totalorder %s10371_s10, %s10092_s14  ;;  %s10097_s6 = scalar_lea.hbm %s12238_s0, 8192 }
  0x4a   : > { %p10098_p13 = scmp.lt.u32.totalorder %s10371_s10, %s12238_s0  ;;  %p10099_p6 = scmp.lt.u32.totalorder %s10097_s6, %s10092_s14 }
  0x4b   : > { %p10095_p1 = pnand %p10094_p0, %p10093_p12  ;;  %p10101_p3 = scmp.lt.u32.totalorder %s10092_s14, %s10371_s10 }
  0x4c   : > { %p10100_p10 = por %p10099_p6, %p10098_p13 }
  0x4d   : > { %p10096_p2 = pneg %p10095_p1 }
  0x4e   : > { %p10102_p7 = por %p10101_p3, %p10100_p10 }
  0x50   : > { %p10103_p9 = pnand %p10102_p7, %p10096_p2 }
  0x52   : > { %10106 = shalt.err (!%p10103_p9)
}
  0x53   : > { %s10107_s30 = scalar_lea.vmem %s10373_s28, 4096  ;;  %s10198_s11 = smov [#allocation3]  }
  0x54   : > { %p10108_p12 = scmp.ne.s32.totalorder %s10373_s28, %s10107_s30  ;;  %s10112_s17 = sshll.u32 %s10198_s11, 4  ;;  %s10113_s17 = int_to_ptr.vmem [resolvable:$false] %s10112_s17 }
  0x55   : > { %s10114_s7 = scalar_lea.vmem %s10113_s17, 8192  ;;  %p10115_p4 = scmp.lt.s32.totalorder %s10373_s28, %s10113_s17 }
  0x56   : > { %p10110_p1 = pnand %p10108_p12, %p10094_p0  ;;  %p10116_p13 = scmp.lt.s32.totalorder %s10114_s7, %s10107_s30 }
  0x58   : > { %p10111_p5 = pneg %p10110_p1  ;;  %p10117_p6 = por %p10116_p13, %p10115_p4 }
  0x5a   : > { %p10118_p10 = pnand %p10117_p6, %p10111_p5 }
  0x5c   : > { %10121 = shalt.err (!%p10118_p10)
}
  0x5d   : > { %9966 = dma.hbm_to_vmem [thread:$0]  (!%p10375_p11), %s10371_s10, 4096, %s10373_s28, %s10379_s13, %s10196_s15, %s10196_s15, %s10197_s16  }
  0x5e   : > { %231 = sbr.rel (%p10272_p8) target bundleno = 2008 (0x7d8), region = 40 }
  0x65   : > { %s10413_s14 = sand.u32 1, %s10184_s19   ;;  %p12313_p4 = scmp.ne.s32.totalorder %s12306_s24, 0 }
  0x66   : > { %s6539_s6 = sshll.u32 %s10413_s14, 8  ;;  %s234_s8 = scalar_lea.sflag [#allocation4], %s10413_s14 }
  0x67   : > { %s10419_s12 = scalar_lea.vmem [#allocation3], %s6539_s6 }
  0x68   : > { %10167 = dma.done.wait (%p12313_p4), %s234_s8, 4096  }
  0x69   : > { %10169 = vsyncadd (%p12313_p4), %s234_s8, 4294963200  ;;  %p12314_p5 = scmp.eq.s32.totalorder %s10253_s22, 0 }
  0x6b   : > { %10171 = dma.done.wait (%p12314_p5), [#allocation7], 36864   ;;  %p12315_p8 = pmov %p12314_p5 }
  0x6c   : > { %v495_v0 = vld [vmem:[#allocation6 + $0x80] sm:$0xff]  ;;  %v496_v1 = vld [vmem:[#allocation6 + $0x88] sm:$0xff]  ;;  %v497_v2 = vld [vmem:[#allocation6 + $0x90] sm:$0xff]  ;;  %s12105_s10 = scalar_lea.vmem [#allocation9], %s6539_s6  ;;  %s6551_s28 = sshll.u32 %s10253_s22, 12 }
  0x6d   : > { %10173 = vsyncadd (%p12315_p8), [#allocation7], 4294930432  ;;  %v8856_v3 = vpack.c.bf16 %v496_v1, %v495_v0  ;;  %v498_v4 = vld [vmem:[#allocation6 + $0x98] sm:$0xff]  ;;  %v499_v6 = vld [vmem:[#allocation6 + $0xa0] sm:$0xff]  ;;  %s6438_s13 = sshll.u32 %s12105_s10, 4  ;;  %s12176_s30 = scalar_lea.hbm %s12243_s5, %s6551_s28  ;;  %s12178_s13 = int_to_ptr.vmem [resolvable:$true] %s6438_s13 }
  0x6e   : > { %v8860_v5 = vpack.c.bf16 %v498_v4, %v497_v2  ;;  %v500_v7 = vld [vmem:[#allocation6 + $0xa8] sm:$0xff]  ;;  %v10430_v9 = vld [vmem:[%s10419_s12 + $0x10] sm:$0xff]  ;;  %v10433_v10 = vld [vmem:[%s10419_s12 + $0x18] sm:$0xff]  ;;  %s6425_s11 = scalar_lea.sflag [#allocation5], %s10413_s14  ;;  %s10122_s17 = scalar_lea.vmem %s12178_s13, 4096 }
  0x6f   : > { %8857 = vmatprep.subr.bf16.mxu0 %v8856_v3  ;;  %v8864_v8 = vpack.c.bf16 %v500_v7, %v499_v6  ;;  %12316 = vst [vmem:[#allocation13_spill] sm:$0xff] %v10430_v9  ;;  %12317 = vst [vmem:[#allocation14_spill] sm:$0xff] %v10433_v10  ;;  %v501_v11 = vld [vmem:[#allocation6 + $0xb0] sm:$0xff]  ;;  %v502_v12 = vld [vmem:[#allocation6 + $0xb8] sm:$0xff]  ;;  %7448 = vmatprep.mubr.f32.mxu0 %v10430_v9  ;;  %p10123_p11 = scmp.ne.s32.totalorder %s12178_s13, %s10122_s17  ;;  %p12423_p0 = scmp.ne.s32.totalorder %s12311_s23, 0 }
  0x70   : > { %8859 = vmatpush3.bf16.msra.mxu0 %v8856_v3  ;;  %337 = vst [vmem:[#allocation2 + $0x1] sm:$0xff] %v10430_v9  ;;  %307 = vst [vmem:[#allocation2 + $0x31] sm:$0xff] %v10430_v9  ;;  %v10441_v13 = vld [vmem:[%s10419_s12] sm:$0xff]  ;;  %v10445_v14 = vld [vmem:[%s10419_s12 + $0x8] sm:$0xff]  ;;  %v8868_v18 = vpack.c.bf16 %v502_v12, %v501_v11  ;;  %s10199_s7 = smov [#allocation9]  }
  0x71   : > { %8861 = vmatprep.subr.bf16.mxu0 %v8860_v5  ;;  %338 = vst [vmem:[#allocation2 + $0x9] sm:$0xff] %v10433_v10  ;;  %308 = vst [vmem:[#allocation2 + $0x39] sm:$0xff] %v10433_v10  ;;  %v10449_v15 = vld [vmem:[%s10419_s12 + $0x20] sm:$0xff]  ;;  %v10452_v16 = vld [vmem:[%s10419_s12 + $0x28] sm:$0xff]  ;;  %p10124_p2 = pnand %p10123_p11, %p12423_p0  ;;  %s10126_s6 = sshll.u32 %s10199_s7, 4  ;;  %s10127_s6 = int_to_ptr.vmem [resolvable:$false] %s10126_s6 }
  0x72   : > { %12318 = vst [vmem:[#allocation15_spill] sm:$0xff] %v10441_v13  ;;  %305 = vst [vmem:[#allocation2 + $0x19] sm:$0xff] %v10441_v13  ;;  %v10455_v17 = vld [vmem:[%s10419_s12 + $0x30] sm:$0xff]  ;;  %v503_v19 = vld [vmem:[#allocation6 + $0xc0] sm:$0xff]  ;;  %s10128_s8 = scalar_lea.vmem %s10127_s6, 8192  ;;  %p10129_p7 = scmp.lt.s32.totalorder %s12178_s13, %s10127_s6 }
  0x73   : > { %12319 = vst [vmem:[#allocation16_spill] sm:$0xff] %v10445_v14  ;;  %306 = vst [vmem:[#allocation2 + $0x21] sm:$0xff] %v10445_v14  ;;  %v504_v20 = vld [vmem:[#allocation6 + $0xc8] sm:$0xff]  ;;  %v10461_v21 = vld [vmem:[%s10419_s12 + $0x38] sm:$0xff]  ;;  %p10125_p3 = pneg %p10124_p2  ;;  %p10130_p9 = scmp.lt.s32.totalorder %s10128_s8, %s10122_s17 }
  0x74   : > { %8863 = vmatpush3.bf16.msra.mxu0 %v8860_v5  ;;  %12320 = vst [vmem:[#allocation17_spill] sm:$0xff] %v10449_v15  ;;  %12321 = vst [vmem:[#allocation18_spill] sm:$0xff] %v10452_v16  ;;  %v10465_v22 = vld [vmem:[%s10419_s12 + $0x40] sm:$0xff]  ;;  %v10468_v23 = vld [vmem:[%s10419_s12 + $0x48] sm:$0xff]  ;;  %v8872_v29 = vpack.c.bf16 %v504_v20, %v503_v19 }
  0x75   : > { %12322 = vst [vmem:[#allocation19_spill] sm:$0xff] %v10455_v17  ;;  %8865 = vmatprep.subr.bf16.mxu0 %v8864_v8  ;;  %309 = vst [vmem:[#allocation2 + $0x49] sm:$0xff] %v10449_v15  ;;  %v10471_v24 = vld [vmem:[%s10419_s12 + $0x50] sm:$0xff]  ;;  %v10477_v25 = vld [vmem:[%s10419_s12 + $0x58] sm:$0xff]  ;;  %p10131_p12 = por %p10130_p9, %p10129_p7 }
  0x76   : > { %310 = vst [vmem:[#allocation2 + $0x51] sm:$0xff] %v10452_v16  ;;  %311 = vst [vmem:[#allocation2 + $0x61] sm:$0xff] %v10455_v17  ;;  %v10481_v26 = vld [vmem:[%s10419_s12 + $0x60] sm:$0xff]  ;;  %v10484_v27 = vld [vmem:[%s10419_s12 + $0x68] sm:$0xff] }
  0x77   : > { %12323 = vst [vmem:[#allocation20_spill] sm:$0xff] %v10461_v21  ;;  %312 = vst [vmem:[#allocation2 + $0x69] sm:$0xff] %v10461_v21  ;;  %v10487_v28 = vld [vmem:[%s10419_s12 + $0x70] sm:$0xff]  ;;  %v506_v31 = vld [vmem:[#allocation6 + $0xd8] sm:$0xff]  ;;  %p10132_p1 = pnand %p10131_p12, %p10125_p3 }
  0x78   : > { %12324 = vst [vmem:[#allocation21_spill] sm:$0xff] %v10465_v22  ;;  %12325 = vst [vmem:[#allocation22_spill] sm:$0xff] %v10468_v23  ;;  %8867 = vmatpush3.bf16.msra.mxu0 %v8864_v8  ;;  %v505_v30 = vld [vmem:[#allocation6 + $0xd0] sm:$0xff]  ;;  %v10493_v32 = vld [vmem:[%s10419_s12 + $0x78] sm:$0xff] }
  0x79   : > { %12326 = vst [vmem:[#allocation23_spill] sm:$0xff] %v10471_v24  ;;  %313 = vst [vmem:[#allocation2 + $0x79] sm:$0xff] %v10465_v22  ;;  %8869 = vmatprep.subr.bf16.mxu0 %v8868_v18  ;;  %v10497_v33 = vld [vmem:[%s10419_s12 + $0x80] sm:$0xff]  ;;  %v10500_v34 = vld [vmem:[%s10419_s12 + $0x88] sm:$0xff]  ;;  %v8876_v40 = vpack.c.bf16 %v506_v31, %v505_v30 }
  0x7a   : > { %314 = vst [vmem:[#allocation2 + $0x81] sm:$0xff] %v10468_v23  ;;  %315 = vst [vmem:[#allocation2 + $0x91] sm:$0xff] %v10471_v24  ;;  %v10503_v35 = vld [vmem:[%s10419_s12 + $0x90] sm:$0xff]  ;;  %v10509_v36 = vld [vmem:[%s10419_s12 + $0x98] sm:$0xff] }
  0x7b   : > { %12327 = vst [vmem:[#allocation24_spill] sm:$0xff] %v10477_v25  ;;  %316 = vst [vmem:[#allocation2 + $0x99] sm:$0xff] %v10477_v25  ;;  %v10513_v37 = vld [vmem:[%s10419_s12 + $0xa0] sm:$0xff]  ;;  %v10516_v38 = vld [vmem:[%s10419_s12 + $0xa8] sm:$0xff] }
  0x7c   : > { %12328 = vst [vmem:[#allocation25_spill] sm:$0xff] %v10481_v26  ;;  %12329 = vst [vmem:[#allocation26_spill] sm:$0xff] %v10487_v28  ;;  %8871 = vmatpush3.bf16.msra.mxu0 %v8868_v18  ;;  %v10519_v39 = vld [vmem:[%s10419_s12 + $0xb0] sm:$0xff]  ;;  %v507_v41 = vld [vmem:[#allocation6 + $0xe0] sm:$0xff] }
  0x7d   : > { %317 = vst [vmem:[#allocation2 + $0xa9] sm:$0xff] %v10481_v26  ;;  %318 = vst [vmem:[#allocation2 + $0xb1] sm:$0xff] %v10484_v27  ;;  %8873 = vmatprep.subr.bf16.mxu0 %v8872_v29  ;;  %v508_v42 = vld [vmem:[#allocation6 + $0xe8] sm:$0xff]  ;;  %v10525_v43 = vld [vmem:[%s10419_s12 + $0xb8] sm:$0xff] }
  0x7e   : > { %319 = vst [vmem:[#allocation2 + $0xc1] sm:$0xff] %v10487_v28  ;;  %12330 = vst [vmem:[#allocation27_spill] sm:$0xff] %v10493_v32  ;;  %v10529_v44 = vld [vmem:[%s10419_s12 + $0xc0] sm:$0xff]  ;;  %v10532_v45 = vld [vmem:[%s10419_s12 + $0xc8] sm:$0xff]  ;;  %v8880_v51 = vpack.c.bf16 %v508_v42, %v507_v41 }
  0x7f   : > { %320 = vst [vmem:[#allocation2 + $0xc9] sm:$0xff] %v10493_v32  ;;  %321 = vst [vmem:[#allocation2 + $0xd9] sm:$0xff] %v10497_v33  ;;  %v10535_v46 = vld [vmem:[%s10419_s12 + $0xd0] sm:$0xff]  ;;  %v10541_v47 = vld [vmem:[%s10419_s12 + $0xd8] sm:$0xff] }
  0x80   : > { %322 = vst [vmem:[#allocation2 + $0xe1] sm:$0xff] %v10500_v34  ;;  %323 = vst [vmem:[#allocation2 + $0xf1] sm:$0xff] %v10503_v35  ;;  %8875 = vmatpush3.bf16.msra.mxu0 %v8872_v29  ;;  %v10545_v48 = vld [vmem:[%s10419_s12 + $0xe0] sm:$0xff]  ;;  %v10548_v49 = vld [vmem:[%s10419_s12 + $0xe8] sm:$0xff] }
  0x81   : > { %324 = vst [vmem:[#allocation2 + $0xf9] sm:$0xff] %v10509_v36  ;;  %325 = vst [vmem:[#allocation2 + $0x109] sm:$0xff] %v10513_v37  ;;  %v342_v50 = vld [vmem:[#allocation2 + $0x2] sm:$0x1]  ;;  %8877 = vmatprep.subr.bf16.mxu0 %v8876_v40  ;;  %v510_v53 = vld [vmem:[#allocation6 + $0xf8] sm:$0xff] }
  0x82   : > { %326 = vst [vmem:[#allocation2 + $0x111] sm:$0xff] %v10516_v38  ;;  %327 = vst [vmem:[#allocation2 + $0x121] sm:$0xff] %v10519_v39  ;;  %v509_v52 = vld [vmem:[#allocation6 + $0xf0] sm:$0xff]  ;;  %v343_v54 = vld [vmem:[#allocation2 + $0x1a] sm:$0x1] }
  0x83   : > { %328 = vst [vmem:[#allocation2 + $0x129] sm:$0xff] %v10525_v43  ;;  %329 = vst [vmem:[#allocation2 + $0x139] sm:$0xff] %v10529_v44  ;;  %v344_v55 = vld [vmem:[#allocation2 + $0x32] sm:$0x1]  ;;  %v345_v56 = vld [vmem:[#allocation2 + $0x4a] sm:$0x1]  ;;  %v8884_v58 = vpack.c.bf16 %v510_v53, %v509_v52 }
  0x84   : > { %330 = vst [vmem:[#allocation2 + $0x141] sm:$0xff] %v10532_v45  ;;  %331 = vst [vmem:[#allocation2 + $0x151] sm:$0xff] %v10535_v46  ;;  %8879 = vmatpush3.bf16.msra.mxu0 %v8876_v40  ;;  %v346_v57 = vld [vmem:[#allocation2 + $0x62] sm:$0x1]  ;;  %v446_v59 = vld [vmem:[#allocation6] sm:$0xff] }
  0x85   : > { %332 = vst [vmem:[#allocation2 + $0x159] sm:$0xff] %v10541_v47  ;;  %333 = vst [vmem:[#allocation2 + $0x169] sm:$0xff] %v10545_v48  ;;  %8881 = vmatprep.subr.bf16.mxu0 %v8880_v51  ;;  %v447_v60 = vld [vmem:[#allocation6 + $0x8] sm:$0xff]  ;;  %v348_v62 = vld [vmem:[#allocation2 + $0x92] sm:$0x1] }
  0x86   : > { %340 = vst [vmem:[#allocation2 + $0x199] sm:$0xff] %v10545_v48  ;;  %334 = vst [vmem:[#allocation2 + $0x171] sm:$0xff] %v10548_v49  ;;  %v347_v61 = vld [vmem:[#allocation2 + $0x7a] sm:$0x1]  ;;  %v349_v63 = vld [vmem:[#allocation2 + $0xaa] sm:$0x1]  ;;  %v8888_v0 = vpack.c.bf16 %v447_v60, %v446_v59 }
  0x87   : > { %341 = vst [vmem:[#allocation2 + $0x1a1] sm:$0xff] %v10548_v49  ;;  %360 = vst [vmem:[#allocation2] sm:$0x1] %v342_v50  ;;  %v350_v1 = vld [vmem:[#allocation2 + $0xc2] sm:$0x1]  ;;  %v449_v3 = vld [vmem:[#allocation6 + $0x18] sm:$0xff] }
  0x88   : > { %361 = vst [vmem:[#allocation2 + $0x18] sm:$0x1] %v343_v54  ;;  %362 = vst [vmem:[#allocation2 + $0x30] sm:$0x1] %v344_v55  ;;  %8883 = vmatpush3.bf16.msra.mxu0 %v8880_v51  ;;  %v448_v2 = vld [vmem:[#allocation6 + $0x10] sm:$0xff]  ;;  %v450_v8 = vld [vmem:[#allocation6 + $0x20] sm:$0xff] }
  0x89   : > { %363 = vst [vmem:[#allocation2 + $0x48] sm:$0x1] %v345_v56  ;;  %364 = vst [vmem:[#allocation2 + $0x60] sm:$0x1] %v346_v57  ;;  %8885 = vmatprep.subr.bf16.mxu0 %v8884_v58  ;;  %v351_v4 = vld [vmem:[#allocation2 + $0xda] sm:$0x1]  ;;  %v8892_v6 = vpack.c.bf16 %v449_v3, %v448_v2 }
  0x8a   : > { %365 = vst [vmem:[#allocation2 + $0x78] sm:$0x1] %v347_v61  ;;  %366 = vst [vmem:[#allocation2 + $0x90] sm:$0x1] %v348_v62  ;;  %v352_v5 = vld [vmem:[#allocation2 + $0xf2] sm:$0x1] }
  0x8b   : > { %367 = vst [vmem:[#allocation2 + $0xa8] sm:$0x1] %v349_v63  ;;  %368 = vst [vmem:[#allocation2 + $0xc0] sm:$0x1] %v350_v1  ;;  %v353_v7 = vld [vmem:[#allocation2 + $0x10a] sm:$0x1] }
  0x8c   : > { %8887 = vmatpush3.bf16.msra.mxu0 %v8884_v58  ;;  %369 = vst [vmem:[#allocation2 + $0xd8] sm:$0x1] %v351_v4  ;;  %370 = vst [vmem:[#allocation2 + $0xf0] sm:$0x1] %v352_v5  ;;  %v451_v11 = vld [vmem:[#allocation6 + $0x28] sm:$0xff]  ;;  %v452_v29 = vld [vmem:[#allocation6 + $0x30] sm:$0xff] }
  0x8d   : > { %8889 = vmatprep.subr.bf16.mxu0 %v8888_v0  ;;  %371 = vst [vmem:[#allocation2 + $0x108] sm:$0x1] %v353_v7  ;;  %v354_v12 = vld [vmem:[#allocation2 + $0x122] sm:$0x1]  ;;  %v355_v18 = vld [vmem:[#allocation2 + $0x13a] sm:$0x1]  ;;  %v8896_v19 = vpack.c.bf16 %v451_v11, %v450_v8 }
  0x8e   : > { %372 = vst [vmem:[#allocation2 + $0x120] sm:$0x1] %v354_v12  ;;  %373 = vst [vmem:[#allocation2 + $0x138] sm:$0x1] %v355_v18  ;;  %v356_v20 = vld [vmem:[#allocation2 + $0x152] sm:$0x1] }
  0x8f   : > { %7449 = vmatmul.mubr.f32.vlgmr.msra.gmra.mrb[0].mxu0 %v10433_v10  ;;  %v453_v30 = vld [vmem:[#allocation6 + $0x38] sm:$0xff]  ;;  %374 = vst [vmem:[#allocation2 + $0x150] sm:$0x1] %v356_v20  ;;  %v454_v42 = vld [vmem:[#allocation6 + $0x40] sm:$0xff]  ;;  %v455_v50 = vld [vmem:[#allocation6 + $0x48] sm:$0xff] }
  0x90   : > { %8891 = vmatpush3.bf16.msra.mxu0 %v8888_v0  ;;  %7451 = vmatprep.mubr.f32.mxu0 %v10441_v13  ;;  %v357_v31 = vld [vmem:[#allocation2 + $0x16a] sm:$0x1]  ;;  %v378_v40 = vld [vmem:[#allocation2 + $0xf] sm:$0x1]  ;;  %v8900_v41 = vpack.c.bf16 %v453_v30, %v452_v29  ;;  %v379_v51 = vld [vmem:[#allocation2 + $0x27] sm:$0x1]  ;;  %v8904_v53 = vpack.c.bf16 %v455_v50, %v454_v42 }
  0x91   : > { %8893 = vmatprep.subr.bf16.mxu0 %v8892_v6  ;;  %375 = vst [vmem:[#allocation2 + $0x168] sm:$0x1] %v357_v31  ;;  %396 = vst [vmem:[#allocation2 + $0x11] sm:$0x1] %v378_v40  ;;  %v380_v52 = vld [vmem:[#allocation2 + $0x3f] sm:$0x1] }
  0x92   : > { %397 = vst [vmem:[#allocation2 + $0x29] sm:$0x1] %v379_v51  ;;  %398 = vst [vmem:[#allocation2 + $0x41] sm:$0x1] %v380_v52  ;;  %v381_v54 = vld [vmem:[#allocation2 + $0x57] sm:$0x1] }
  0x93   : > { %7452 = vmatmul.mubr.f32.gmra.mrb[2].mxu0 %v10445_v14  ;;  %v382_v55 = vld [vmem:[#allocation2 + $0x6f] sm:$0x1]  ;;  %v456_v56 = vld [vmem:[#allocation6 + $0x50] sm:$0xff]  ;;  %399 = vst [vmem:[#allocation2 + $0x59] sm:$0x1] %v381_v54  ;;  %v458_v60 = vld [vmem:[#allocation6 + $0x60] sm:$0xff] }
  0x94   : > { %7454 = vmatprep.mubr.f32.mxu0 %v10430_v9  ;;  %8895 = vmatpush3.bf16.msra.mxu0 %v8892_v6  ;;  %v457_v57 = vld [vmem:[#allocation6 + $0x58] sm:$0xff]  ;;  %400 = vst [vmem:[#allocation2 + $0x71] sm:$0x1] %v382_v55  ;;  %v383_v58 = vld [vmem:[#allocation2 + $0x87] sm:$0x1]  ;;  %v459_v61 = vld [vmem:[#allocation6 + $0x68] sm:$0xff] }
  0x95   : > { %8897 = vmatprep.subr.bf16.mxu0 %v8896_v19  ;;  %401 = vst [vmem:[#allocation2 + $0x89] sm:$0x1] %v383_v58  ;;  %v8908_v59 = vpack.c.bf16 %v457_v57, %v456_v56  ;;  %v384_v62 = vld [vmem:[#allocation2 + $0x9f] sm:$0x1]  ;;  %v8912_v63 = vpack.c.bf16 %v459_v61, %v458_v60  ;;  %v460_v0 = vld [vmem:[#allocation6 + $0x70] sm:$0xff]  ;;  %v461_v1 = vld [vmem:[#allocation6 + $0x78] sm:$0xff] }
  0x96   : > { %402 = vst [vmem:[#allocation2 + $0xa1] sm:$0x1] %v384_v62  ;;  %v385_v2 = vld [vmem:[#allocation2 + $0xb7] sm:$0x1]  ;;  %v8916_v3 = vpack.c.bf16 %v461_v1, %v460_v0  ;;  %v995_v5 = vld [vmem:[#allocation6 + $0x108] sm:$0xff]  ;;  %v1001_v20 = vld [vmem:[#allocation6 + $0x138] sm:$0xff] }
  0x97   : > { %7455 = vmatmul.mubr.f32.gmra.mrb[4].mxu0 %v10433_v10  ;;  %403 = vst [vmem:[#allocation2 + $0xb9] sm:$0x1] %v385_v2  ;;  %v994_v4 = vld [vmem:[#allocation6 + $0x100] sm:$0xff]  ;;  %v386_v6 = vld [vmem:[#allocation2 + $0xcf] sm:$0x1]  ;;  %v1003_v40 = vld [vmem:[#allocation6 + $0x148] sm:$0xff] }
  0x98   : > { %7457 = vmatprep.mubr.f32.mxu0 %v10449_v15  ;;  %8899 = vmatpush3.bf16.msra.mxu0 %v8896_v19  ;;  %404 = vst [vmem:[#allocation2 + $0xd1] sm:$0x1] %v386_v6  ;;  %v8920_v7 = vpack.c.bf16 %v995_v5, %v994_v4  ;;  %v387_v8 = vld [vmem:[#allocation2 + $0xe7] sm:$0x1]  ;;  %v388_v11 = vld [vmem:[#allocation2 + $0xff] sm:$0x1] }
  0x99   : > { %8901 = vmatprep.subr.bf16.mxu0 %v8900_v41  ;;  %405 = vst [vmem:[#allocation2 + $0xe9] sm:$0x1] %v387_v8  ;;  %406 = vst [vmem:[#allocation2 + $0x101] sm:$0x1] %v388_v11  ;;  %v389_v12 = vld [vmem:[#allocation2 + $0x117] sm:$0x1] }
  0x9a   : > { %407 = vst [vmem:[#allocation2 + $0x119] sm:$0x1] %v389_v12  ;;  %v390_v18 = vld [vmem:[#allocation2 + $0x12f] sm:$0x1]  ;;  %v392_v19 = vld [vmem:[#allocation2 + $0x15f] sm:$0x1] }
  0x9b   : > { %7458 = vmatmul.mubr.f32.gmra.mrb[6].mxu0 %v10452_v16  ;;  %408 = vst [vmem:[#allocation2 + $0x131] sm:$0x1] %v390_v18  ;;  %410 = vst [vmem:[#allocation2 + $0x161] sm:$0x1] %v392_v19  ;;  %v10596_v29 = vld [vmem:[#allocation2 + $0x48] sm:$0xff]  ;;  %v1002_v31 = vld [vmem:[#allocation6 + $0x140] sm:$0xff] }
  0x9c   : > { %7460 = vmatprep.mubr.f32.mxu0 %v10455_v17  ;;  %8903 = vmatpush3.bf16.msra.mxu0 %v8900_v41  ;;  %v10600_v41 = vld [vmem:[#allocation2 + $0x50] sm:$0xff]  ;;  %v10602_v42 = vld [vmem:[#allocation2 + $0x60] sm:$0xff]  ;;  %v8936_v50 = vpack.c.bf16 %v1003_v40, %v1002_v31  ;;  %v1005_v52 = vld [vmem:[#allocation6 + $0x158] sm:$0xff] }
  0x9d   : > { %8905 = vmatprep.subr.bf16.mxu0 %v8904_v53  ;;  %v1004_v51 = vld [vmem:[#allocation6 + $0x150] sm:$0xff]  ;;  %v10608_v54 = vld [vmem:[#allocation2 + $0x78] sm:$0xff]  ;;  %v1006_v56 = vld [vmem:[#allocation6 + $0x160] sm:$0xff] }
  0x9e   : > { %v8940_v55 = vpack.c.bf16 %v1005_v52, %v1004_v51  ;;  %v1007_v57 = vld [vmem:[#allocation6 + $0x168] sm:$0xff]  ;;  %v10612_v58 = vld [vmem:[#allocation2 + $0x80] sm:$0xff]  ;;  %v1009_v62 = vld [vmem:[#allocation6 + $0x178] sm:$0xff] }
  0x9f   : > { %7461 = vmatmul.mubr.f32.gmra.mrb[8].mxu0 %v10461_v21  ;;  %v8944_v60 = vpack.c.bf16 %v1007_v57, %v1006_v56  ;;  %v1008_v61 = vld [vmem:[#allocation6 + $0x170] sm:$0xff]  ;;  %v10620_v0 = vld [vmem:[#allocation2 + $0xa8] sm:$0xff]  ;;  %v1300_v2 = vld [vmem:[#allocation6 + $0x180] sm:$0xff] }
  0xa0   : > { %7463 = vmatprep.mubr.f32.mxu0 %v10465_v22  ;;  %8907 = vmatpush3.bf16.msra.mxu0 %v8904_v53  ;;  %v10606_v53 = vld [vmem:[#allocation2 + $0x68] sm:$0xff]  ;;  %v8948_v1 = vpack.c.bf16 %v1009_v62, %v1008_v61  ;;  %v10624_v4 = vld [vmem:[#allocation2 + $0xb0] sm:$0xff]  ;;  %v10626_v5 = vld [vmem:[#allocation2 + $0xc0] sm:$0xff] }
  0xa1   : > { %8909 = vmatprep.subr.bf16.mxu0 %v8908_v59  ;;  %v10632_v8 = vld [vmem:[#allocation2 + $0xd8] sm:$0xff]  ;;  %v10636_v11 = vld [vmem:[#allocation2 + $0xe0] sm:$0xff]  ;;  %v10638_v12 = vld [vmem:[#allocation2 + $0xf0] sm:$0xff] }
  0xa2   : > { %v10642_v18 = vld [vmem:[#allocation2 + $0xf8] sm:$0xff]  ;;  %v10648_v19 = vld [vmem:[#allocation2 + $0x110] sm:$0xff]  ;;  %v1302_v31 = vld [vmem:[#allocation6 + $0x190] sm:$0xff] }
  0xa3   : > { %7464 = vmatmul.mubr.f32.gmra.mrb[10].mxu0 %v10468_v23  ;;  %v1303_v40 = vld [vmem:[#allocation6 + $0x198] sm:$0xff]  ;;  %v10683_v51 = vld [vmem:[#allocation2 + $0x1a] sm:$0xff]  ;;  %v10760_v15 = vld [vmem:[#allocation2 + $0x152] sm:$0xff] }
  0xa4   : > { %7466 = vmatprep.mubr.f32.mxu0 %v10471_v24  ;;  %8911 = vmatpush3.bf16.msra.mxu0 %v8908_v59  ;;  %v10614_v59 = vld [vmem:[#allocation2 + $0x90] sm:$0xff]  ;;  %v8956_v52 = vpack.c.bf16 %v1303_v40, %v1302_v31  ;;  %v1305_v56 = vld [vmem:[#allocation6 + $0x1a8] sm:$0xff]  ;;  %v10686_v57 = vld [vmem:[#allocation2 + $0x22] sm:$0xff]  ;;  %12335 = vst [vmem:[#allocation32_spill] sm:$0xff] %v10760_v15 }
  0xa5   : > { %8913 = vmatprep.subr.bf16.mxu0 %v8912_v63  ;;  %v1306_v62 = vld [vmem:[#allocation6 + $0x1b0] sm:$0xff]  ;;  %v10698_v31 = vld [vmem:[#allocation2 + $0x52] sm:$0xff]  ;;  %v10752_v21 = vld [vmem:[#allocation2 + $0x12a] sm:$0xff] }
  0xa6   : > { %v10700_v40 = vld [vmem:[#allocation2 + $0x62] sm:$0xff]  ;;  %v1606_v24 = vld [vmem:[#allocation6 + $0x200] sm:$0xff]  ;;  %v1607_v23 = vld [vmem:[#allocation6 + $0x208] sm:$0xff]  ;;  %12332 = vst [vmem:[#allocation29_spill] sm:$0xff] %v10752_v21 }
  0xa7   : > { %7467 = vmatmul.mubr.f32.gmra.mrb[12].mxu0 %v10477_v25  ;;  %v1315_v25 = vld [vmem:[#allocation6 + $0x1f8] sm:$0xff]  ;;  %v10754_v17 = vld [vmem:[#allocation2 + $0x13a] sm:$0xff] }
  0xa8   : > { %7469 = vmatprep.mubr.f32.mxu0 %v10481_v26  ;;  %8915 = vmatpush3.bf16.msra.mxu0 %v8912_v63  ;;  %v10618_v63 = vld [vmem:[#allocation2 + $0x98] sm:$0xff]  ;;  %v1314_v26 = vld [vmem:[#allocation6 + $0x1f0] sm:$0xff]  ;;  %12333 = vst [vmem:[#allocation30_spill] sm:$0xff] %v10754_v17  ;;  %v10766_v9 = vld [vmem:[#allocation2 + $0x16a] sm:$0xff] }
  0xa9   : > { %8917 = vmatprep.subr.bf16.mxu0 %v8916_v3  ;;  %v10748_v22 = vld [vmem:[#allocation2 + $0x122] sm:$0xff]  ;;  %v10764_v10 = vld [vmem:[#allocation2 + $0x15a] sm:$0xff]  ;;  %12337 = vst [vmem:[#allocation34_spill] sm:$0xff] %v10766_v9 }
  0xaa   : > { %12331 = vst [vmem:[#allocation28_spill] sm:$0xff] %v10748_v22  ;;  %12336 = vst [vmem:[#allocation33_spill] sm:$0xff] %v10764_v10  ;;  %v1608_v13 = vld [vmem:[#allocation6 + $0x210] sm:$0xff] }
  0xab   : > { %7470 = vmatmul.mubr.f32.gmra.mrb[14].mxu0 %v10484_v27  ;;  %v391_v27 = vld [vmem:[#allocation2 + $0x147] sm:$0x1] }
  0xac   : > { %7472 = vmatprep.mubr.f32.mxu0 %v10487_v28  ;;  %8919 = vmatpush3.bf16.msra.mxu0 %v8916_v3  ;;  %409 = vst [vmem:[#allocation2 + $0x149] sm:$0x1] %v391_v27  ;;  %v1301_v3 = vld [vmem:[#allocation6 + $0x188] sm:$0xff]  ;;  %v10644_v27 = vld [vmem:[#allocation2 + $0x108] sm:$0xff] }
  0xad   : > { %8921 = vmatprep.subr.bf16.mxu0 %v8920_v7  ;;  %v8952_v6 = vpack.c.bf16 %v1301_v3, %v1300_v2  ;;  %v10692_v2 = vld [vmem:[#allocation2 + $0x3a] sm:$0xff]  ;;  %v10694_v3 = vld [vmem:[#allocation2 + $0x4a] sm:$0xff] }
  0xae   : > { %v1313_v28 = vld [vmem:[#allocation6 + $0x1e8] sm:$0xff] }
  0xaf   : > { %7473 = vmatmul.mubr.f32.gmra.mrb[16].mxu0 %v10493_v32  ;;  %v1312_v32 = vld [vmem:[#allocation6 + $0x1e0] sm:$0xff] }
  0xb0   : > { %7475 = vmatprep.mubr.f32.mxu0 %v10497_v33  ;;  %v393_v33 = vld [vmem:[#allocation2 + $0x177] sm:$0x1] }
  0xb1   : > { %411 = vst [vmem:[#allocation2 + $0x179] sm:$0x1] %v393_v33  ;;  %v10650_v33 = vld [vmem:[#allocation2 + $0x120] sm:$0xff] }
  0xb3   : > { %7476 = vmatmul.mubr.f32.gmra.mrb[18].mxu0 %v10500_v34  ;;  %v414_v34 = vld [vmem:[#allocation2] sm:$0xff] }
  0xb4   : > { %7478 = vmatprep.mubr.f32.mxu0 %v10503_v35  ;;  %v996_v35 = vld [vmem:[#allocation6 + $0x110] sm:$0xff] }
  0xb5   : > { %v10758_v16 = vld [vmem:[#allocation2 + $0x142] sm:$0xff] }
  0xb6   : > { %12334 = vst [vmem:[#allocation31_spill] sm:$0xff] %v10758_v16 }
  0xb7   : > { %7479 = vmatmul.mubr.f32.gmra.mrb[20].mxu0 %v10509_v36  ;;  %v997_v36 = vld [vmem:[#allocation6 + $0x118] sm:$0xff] }
  0xb8   : > { %7481 = vmatprep.mubr.f32.mxu0 %v10513_v37  ;;  %v415_v37 = vld [vmem:[#allocation2 + $0x8] sm:$0xff]  ;;  %v10770_v14 = vld [vmem:[#allocation2 + $0x172] sm:$0xff] }
  0xb9   : > { %12338 = vst [vmem:[#allocation35_spill] sm:$0xff] %v10770_v14 }
  0xbb   : > { %7482 = vmatmul.mubr.f32.gmra.mrb[22].mxu0 %v10516_v38  ;;  %v10585_v38 = vld [vmem:[#allocation2 + $0x18] sm:$0xff] }
  0xbc   : > { %7484 = vmatprep.mubr.f32.mxu0 %v10519_v39  ;;  %v8924_v39 = vpack.c.bf16 %v997_v36, %v996_v35  ;;  %v10658_v35 = vld [vmem:[#allocation2 + $0x128] sm:$0xff]  ;;  %v10660_v36 = vld [vmem:[#allocation2 + $0x138] sm:$0xff] }
  0xbf   : > { %7485 = vmatmul.mubr.f32.gmra.mrb[24].mxu0 %v10525_v43  ;;  %v998_v43 = vld [vmem:[#allocation6 + $0x120] sm:$0xff] }
  0xc0   : > { %7487 = vmatprep.mubr.f32.mxu0 %v10529_v44  ;;  %v999_v44 = vld [vmem:[#allocation6 + $0x128] sm:$0xff] }
  0xc3   : > { %7488 = vmatmul.mubr.f32.gmra.mrb[26].mxu0 %v10532_v45  ;;  %v10588_v45 = vld [vmem:[#allocation2 + $0x20] sm:$0xff] }
  0xc4   : > { %7490 = vmatprep.mubr.f32.mxu0 %v10535_v46  ;;  %v10590_v46 = vld [vmem:[#allocation2 + $0x30] sm:$0xff] }
  0xc7   : > { %7491 = vmatmul.mubr.f32.gmra.mrb[28].mxu0 %v10541_v47  ;;  %v8928_v47 = vpack.c.bf16 %v999_v44, %v998_v43  ;;  %v10669_v44 = vld [vmem:[%s10419_s12 + $0xf8] sm:$0xff] }
  0xc8   : > { %7493 = vmatprep.mubr.f32.mxu0 %v10545_v48  ;;  %v1000_v48 = vld [vmem:[#allocation6 + $0x130] sm:$0xff]  ;;  %336 = vst [vmem:[#allocation2 + $0x189] sm:$0xff] %v10669_v44 }
  0xc9   : > { %v8932_v30 = vpack.c.bf16 %v1001_v20, %v1000_v48  ;;  %v10676_v48 = vld [vmem:[#allocation2 + $0x168] sm:$0xff]  ;;  %v10680_v20 = vld [vmem:[#allocation2 + $0x170] sm:$0xff] }
  0xcb   : > { %7494 = vmatmul.mubr.f32.gmra.mrb[30].mxu0 %v10548_v49  ;;  %v10594_v49 = vld [vmem:[#allocation2 + $0x38] sm:$0xff] }
  0xcc   : > { %7528 = vmatprep.mubr.f32.mxu0 %v414_v34  ;;  %v10653_v34 = vld [vmem:[%s10419_s12 + $0xf0] sm:$0xff] }
  0xcd   : > { %335 = vst [vmem:[#allocation2 + $0x181] sm:$0xff] %v10653_v34 }
  0xcf   : > { %7529 = vmatmul.mubr.f32.vlgmr.msra.gmra.mrb[0].mxu0 %v415_v37  ;;  %v10664_v37 = vld [vmem:[#allocation2 + $0x140] sm:$0xff] }
  0xd0   : > { %8923 = vmatpush3.bf16.msra.mxu0 %v8920_v7  ;;  %7531 = vmatprep.mubr.f32.mxu0 %v10585_v38  ;;  %v10630_v7 = vld [vmem:[#allocation2 + $0xc8] sm:$0xff] }
  0xd1   : > { %8925 = vmatprep.subr.bf16.mxu0 %v8924_v39 }
  0xd3   : > { %7532 = vmatmul.mubr.f32.gmra.mrb[2].mxu0 %v10588_v45 }
  0xd4   : > { %7534 = vmatprep.mubr.f32.mxu0 %v10590_v46  ;;  %8927 = vmatpush3.bf16.msra.mxu0 %v8924_v39  ;;  %v10666_v39 = vld [vmem:[#allocation2 + $0x150] sm:$0xff]  ;;  %v358_v43 = vld [vmem:[#allocation2 + $0x182] sm:$0x1] }
  0xd5   : > { %8929 = vmatprep.subr.bf16.mxu0 %v8928_v47  ;;  %376 = vst [vmem:[#allocation2 + $0x180] sm:$0x1] %v358_v43  ;;  %v1308_v43 = vld [vmem:[#allocation6 + $0x1c0] sm:$0xff] }
  0xd7   : > { %7535 = vmatmul.mubr.f32.gmra.mrb[4].mxu0 %v10594_v49 }
  0xd8   : > { %7537 = vmatprep.mubr.f32.mxu0 %v10596_v29  ;;  %8931 = vmatpush3.bf16.msra.mxu0 %v8928_v47  ;;  %v10674_v47 = vld [vmem:[#allocation2 + $0x158] sm:$0xff] }
  0xd9   : > { %8933 = vmatprep.subr.bf16.mxu0 %v8932_v30 }
  0xdb   : > { %7538 = vmatmul.mubr.f32.gmra.mrb[6].mxu0 %v10600_v41 }
  0xdc   : > { %7540 = vmatprep.mubr.f32.mxu0 %v10602_v42  ;;  %8935 = vmatpush3.bf16.msra.mxu0 %v8932_v30  ;;  %v961_v30 = vld [vmem:[#allocation2 + $0x2] sm:$0xff] }
  0xdd   : > { %8937 = vmatprep.subr.bf16.mxu0 %v8936_v50 }
  0xdf   : > { %7541 = vmatmul.mubr.f32.gmra.mrb[8].mxu0 %v10606_v53 }
  0xe0   : > { %7543 = vmatprep.mubr.f32.mxu0 %v10608_v54  ;;  %8939 = vmatpush3.bf16.msra.mxu0 %v8936_v50  ;;  %v962_v50 = vld [vmem:[#allocation2 + $0xa] sm:$0xff] }
  0xe1   : > { %8941 = vmatprep.subr.bf16.mxu0 %v8940_v55 }
  0xe3   : > { %7544 = vmatmul.mubr.f32.gmra.mrb[10].mxu0 %v10612_v58 }
  0xe4   : > { %7546 = vmatprep.mubr.f32.mxu0 %v10614_v59  ;;  %8943 = vmatpush3.bf16.msra.mxu0 %v8940_v55  ;;  %v1304_v55 = vld [vmem:[#allocation6 + $0x1a0] sm:$0xff] }
  0xe5   : > { %8945 = vmatprep.subr.bf16.mxu0 %v8944_v60  ;;  %v8960_v61 = vpack.c.bf16 %v1305_v56, %v1304_v55  ;;  %v1310_v55 = vld [vmem:[#allocation6 + $0x1d0] sm:$0xff]  ;;  %v1311_v56 = vld [vmem:[#allocation6 + $0x1d8] sm:$0xff] }
  0xe7   : > { %7547 = vmatmul.mubr.f32.gmra.mrb[12].mxu0 %v10618_v63 }
  0xe8   : > { %7549 = vmatprep.mubr.f32.mxu0 %v10620_v0  ;;  %8947 = vmatpush3.bf16.msra.mxu0 %v8944_v60  ;;  %v10688_v60 = vld [vmem:[#allocation2 + $0x32] sm:$0xff] }
  0xe9   : > { %8949 = vmatprep.subr.bf16.mxu0 %v8948_v1 }
  0xeb   : > { %7550 = vmatmul.mubr.f32.gmra.mrb[14].mxu0 %v10624_v4 }
  0xec   : > { %7552 = vmatprep.mubr.f32.mxu0 %v10626_v5  ;;  %8951 = vmatpush3.bf16.msra.mxu0 %v8948_v1  ;;  %v1307_v1 = vld [vmem:[#allocation6 + $0x1b8] sm:$0xff] }
  0xed   : > { %8953 = vmatprep.subr.bf16.mxu0 %v8952_v6 }
  0xef   : > { %7553 = vmatmul.mubr.f32.gmra.mrb[16].mxu0 %v10630_v7 }
  0xf0   : > { %7555 = vmatprep.mubr.f32.mxu0 %v10632_v8 }
  0xf3   : > { %7556 = vmatmul.mubr.f32.gmra.mrb[18].mxu0 %v10636_v11 }
  0xf4   : > { %7558 = vmatprep.mubr.f32.mxu0 %v10638_v12 }
  0xf7   : > { %7559 = vmatmul.mubr.f32.gmra.mrb[20].mxu0 %v10642_v18 }
  0xf8   : > { %7561 = vmatprep.mubr.f32.mxu0 %v10644_v27 }
  0xfb   : > { %7562 = vmatmul.mubr.f32.gmra.mrb[22].mxu0 %v10648_v19 }
  0xfc   : > { %7564 = vmatprep.mubr.f32.mxu0 %v10650_v33 }
  0xff   : > { %7565 = vmatmul.mubr.f32.gmra.mrb[24].mxu0 %v10658_v35 }
 0x100   : > { %7567 = vmatprep.mubr.f32.mxu0 %v10660_v36 }
 0x103   : > { %7568 = vmatmul.mubr.f32.gmra.mrb[26].mxu0 %v10664_v37 }
 0x104   : > { %7570 = vmatprep.mubr.f32.mxu0 %v10666_v39 }
 0x107   : > { %7571 = vmatmul.mubr.f32.gmra.mrb[28].mxu0 %v10674_v47 }
 0x108   : > { %7573 = vmatprep.mubr.f32.mxu0 %v10676_v48 }
 0x10b   : > { %7574 = vmatmul.mubr.f32.gmra.mrb[30].mxu0 %v10680_v20 }
 0x10c   : > { %7608 = vmatprep.mubr.f32.mxu0 %v961_v30  ;;  %v1309_v30 = vld [vmem:[#allocation6 + $0x1c8] sm:$0xff] }
 0x10f   : > { %7609 = vmatmul.mubr.f32.vlgmr.msra.gmra.mrb[0].mxu0 %v962_v50  ;;  %v8968_v50 = vpack.c.bf16 %v1309_v30, %v1308_v43  ;;  %v10712_v43 = vld [vmem:[#allocation2 + $0x92] sm:$0xff]  ;;  %v8976_v30 = vpack.c.bf16 %v1313_v28, %v1312_v32  ;;  %v10724_v32 = vld [vmem:[#allocation2 + $0xc2] sm:$0xff] }
 0x110   : > { %8955 = vmatpush3.bf16.msra.mxu0 %v8952_v6  ;;  %7611 = vmatprep.mubr.f32.mxu0 %v10683_v51  ;;  %v8964_v6 = vpack.c.bf16 %v1307_v1, %v1306_v62  ;;  %v10706_v62 = vld [vmem:[#allocation2 + $0x7a] sm:$0xff]  ;;  %v8972_v1 = vpack.c.bf16 %v1311_v56, %v1310_v55  ;;  %v10718_v55 = vld [vmem:[#allocation2 + $0xaa] sm:$0xff]  ;;  %v8980_v56 = vpack.c.bf16 %v1315_v25, %v1314_v26  ;;  %v10722_v28 = vld [vmem:[#allocation2 + $0xb2] sm:$0xff] }
 0x111   : > { %8957 = vmatprep.subr.bf16.mxu0 %v8956_v52  ;;  %v10730_v25 = vld [vmem:[#allocation2 + $0xda] sm:$0xff]  ;;  %v10734_v26 = vld [vmem:[#allocation2 + $0xe2] sm:$0xff] }
 0x113   : > { %7612 = vmatmul.mubr.f32.gmra.mrb[2].mxu0 %v10686_v57 }
 0x114   : > { %7614 = vmatprep.mubr.f32.mxu0 %v10688_v60  ;;  %8959 = vmatpush3.bf16.msra.mxu0 %v8956_v52  ;;  %v10704_v52 = vld [vmem:[#allocation2 + $0x6a] sm:$0xff] }
 0x115   : > { %8961 = vmatprep.subr.bf16.mxu0 %v8960_v61 }
 0x117   : > { %7615 = vmatmul.mubr.f32.gmra.mrb[4].mxu0 %v10692_v2 }
 0x118   : > { %7617 = vmatprep.mubr.f32.mxu0 %v10694_v3  ;;  %8963 = vmatpush3.bf16.msra.mxu0 %v8960_v61  ;;  %v10710_v61 = vld [vmem:[#allocation2 + $0x82] sm:$0xff] }
 0x119   : > { %8965 = vmatprep.subr.bf16.mxu0 %v8964_v6 }
 0x11b   : > { %7618 = vmatmul.mubr.f32.gmra.mrb[6].mxu0 %v10698_v31 }
 0x11c   : > { %7620 = vmatprep.mubr.f32.mxu0 %v10700_v40  ;;  %8967 = vmatpush3.bf16.msra.mxu0 %v8964_v6  ;;  %v10716_v6 = vld [vmem:[#allocation2 + $0x9a] sm:$0xff] }
 0x11d   : > { %8969 = vmatprep.subr.bf16.mxu0 %v8968_v50 }
 0x11f   : > { %7621 = vmatmul.mubr.f32.gmra.mrb[8].mxu0 %v10704_v52 }
 0x120   : > { %7623 = vmatprep.mubr.f32.mxu0 %v10706_v62  ;;  %8971 = vmatpush3.bf16.msra.mxu0 %v8968_v50  ;;  %v8984_v50 = vpack.c.bf16 %v1607_v23, %v1606_v24  ;;  %v10740_v23 = vld [vmem:[#allocation2 + $0xfa] sm:$0xff]  ;;  %v10742_v24 = vld [vmem:[#allocation2 + $0x10a] sm:$0xff] }
 0x121   : > { %8973 = vmatprep.subr.bf16.mxu0 %v8972_v1 }
 0x123   : > { %7624 = vmatmul.mubr.f32.gmra.mrb[10].mxu0 %v10710_v61 }
 0x124   : > { %7626 = vmatprep.mubr.f32.mxu0 %v10712_v43  ;;  %8975 = vmatpush3.bf16.msra.mxu0 %v8972_v1  ;;  %v10728_v1 = vld [vmem:[#allocation2 + $0xca] sm:$0xff] }
 0x125   : > { %8977 = vmatprep.subr.bf16.mxu0 %v8976_v30 }
 0x127   : > { %7627 = vmatmul.mubr.f32.gmra.mrb[12].mxu0 %v10716_v6 }
 0x128   : > { %7629 = vmatprep.mubr.f32.mxu0 %v10718_v55  ;;  %8979 = vmatpush3.bf16.msra.mxu0 %v8976_v30  ;;  %v10736_v30 = vld [vmem:[#allocation2 + $0xf2] sm:$0xff] }
 0x129   : > { %8981 = vmatprep.subr.bf16.mxu0 %v8980_v56 }
 0x12b   : > { %7630 = vmatmul.mubr.f32.gmra.mrb[14].mxu0 %v10722_v28 }
 0x12c   : > { %7632 = vmatprep.mubr.f32.mxu0 %v10724_v32  ;;  %8983 = vmatpush3.bf16.msra.mxu0 %v8980_v56  ;;  %v10746_v56 = vld [vmem:[#allocation2 + $0x112] sm:$0xff] }
 0x12d   : > { %8985 = vmatprep.subr.bf16.mxu0 %v8984_v50 }
 0x12f   : > { %7633 = vmatmul.mubr.f32.gmra.mrb[16].mxu0 %v10728_v1 }
 0x130   : > { %7635 = vmatprep.mubr.f32.mxu0 %v10730_v25 }
 0x133   : > { %7636 = vmatmul.mubr.f32.gmra.mrb[18].mxu0 %v10734_v26 }
 0x134   : > { %7638 = vmatprep.mubr.f32.mxu0 %v10736_v30 }
 0x137   : > { %7639 = vmatmul.mubr.f32.gmra.mrb[20].mxu0 %v10740_v23 }
 0x138   : > { %7641 = vmatprep.mubr.f32.mxu0 %v10742_v24 }
 0x13b   : > { %7642 = vmatmul.mubr.f32.gmra.mrb[22].mxu0 %v10746_v56 }
 0x13c   : > { %7644 = vmatprep.mubr.f32.mxu0 %v10748_v22  ;;  %v1611_v22 = vld [vmem:[#allocation6 + $0x228] sm:$0xff] }
 0x13f   : > { %7645 = vmatmul.mubr.f32.gmra.mrb[24].mxu0 %v10752_v21 }
 0x140   : > { %7647 = vmatprep.mubr.f32.mxu0 %v10754_v17  ;;  %v1609_v17 = vld [vmem:[#allocation6 + $0x218] sm:$0xff] }
 0x141   : > { %v8988_v21 = vpack.c.bf16 %v1609_v17, %v1608_v13  ;;  %v1615_v13 = vld [vmem:[#allocation6 + $0x248] sm:$0xff] }
 0x143   : > { %7648 = vmatmul.mubr.f32.gmra.mrb[26].mxu0 %v10758_v16  ;;  %v1610_v16 = vld [vmem:[#allocation6 + $0x220] sm:$0xff] }
 0x144   : > { %7650 = vmatprep.mubr.f32.mxu0 %v10760_v15  ;;  %v1612_v15 = vld [vmem:[#allocation6 + $0x230] sm:$0xff] }
 0x147   : > { %7651 = vmatmul.mubr.f32.gmra.mrb[28].mxu0 %v10764_v10  ;;  %v8992_v10 = vpack.c.bf16 %v1611_v22, %v1610_v16  ;;  %v1617_v16 = vld [vmem:[#allocation6 + $0x258] sm:$0xff]  ;;  %v1618_v22 = vld [vmem:[#allocation6 + $0x260] sm:$0xff] }
 0x148   : > { %7653 = vmatprep.mubr.f32.mxu0 %v10766_v9  ;;  %v1613_v9 = vld [vmem:[#allocation6 + $0x238] sm:$0xff] }
 0x14b   : > { %7654 = vmatmul.mubr.f32.gmra.mrb[30].mxu0 %v10770_v14  ;;  %v8996_v14 = vpack.c.bf16 %v1613_v9, %v1612_v15  ;;  %v1619_v9 = vld [vmem:[#allocation6 + $0x268] sm:$0xff]  ;;  %v1620_v15 = vld [vmem:[#allocation6 + $0x270] sm:$0xff] }
 0x14c   : > { %7688 = vmatprep.mubr.f32.mxu0 %v10585_v38  ;;  %v1614_v38 = vld [vmem:[#allocation6 + $0x240] sm:$0xff] }
 0x14d   : > { %v9000_v17 = vpack.c.bf16 %v1615_v13, %v1614_v38  ;;  %v1923_v38 = vld [vmem:[#allocation6 + $0x2d8] sm:$0xff] }
 0x14e   : > { %v10830_v13 = vld [vmem:[#allocation2 + $0x81] sm:$0xff] }
 0x14f   : > { %7689 = vmatmul.mubr.f32.vlgmr.msra.gmra.mrb[0].mxu0 %v10588_v45  ;;  %v1616_v45 = vld [vmem:[#allocation6 + $0x250] sm:$0xff] }
 0x150   : > { %8987 = vmatpush3.bf16.msra.mxu0 %v8984_v50  ;;  %7691 = vmatprep.mubr.f32.mxu0 %v10590_v46  ;;  %v1621_v46 = vld [vmem:[#allocation6 + $0x278] sm:$0xff]  ;;  %v1922_v50 = vld [vmem:[#allocation6 + $0x2d0] sm:$0xff] }
 0x151   : > { %8989 = vmatprep.subr.bf16.mxu0 %v8988_v21 }
 0x153   : > { %7692 = vmatmul.mubr.f32.gmra.mrb[2].mxu0 %v10594_v49  ;;  %v1912_v49 = vld [vmem:[#allocation6 + $0x280] sm:$0xff] }
 0x154   : > { %7694 = vmatprep.mubr.f32.mxu0 %v10596_v29  ;;  %8991 = vmatpush3.bf16.msra.mxu0 %v8988_v21  ;;  %v9004_v21 = vpack.c.bf16 %v1617_v16, %v1616_v45  ;;  %v1913_v29 = vld [vmem:[#allocation6 + $0x288] sm:$0xff]  ;;  %v9036_v45 = vpack.c.bf16 %v1923_v38, %v1922_v50  ;;  %v1924_v16 = vld [vmem:[#allocation6 + $0x2e0] sm:$0xff] }
 0x155   : > { %8993 = vmatprep.subr.bf16.mxu0 %v8992_v10  ;;  %v10884_v50 = vld [vmem:[#allocation2 + $0x159] sm:$0xff]  ;;  %v10887_v38 = vld [vmem:[#allocation2 + $0x169] sm:$0xff] }
 0x156   : > { %12351 = vst [vmem:[#allocation48_spill] sm:$0xff] %v10884_v50  ;;  %12352 = vst [vmem:[#allocation49_spill] sm:$0xff] %v10887_v38 }
 0x157   : > { %7695 = vmatmul.mubr.f32.gmra.mrb[4].mxu0 %v10600_v41  ;;  %v9016_v41 = vpack.c.bf16 %v1913_v29, %v1912_v49  ;;  %v2219_v29 = vld [vmem:[#allocation6 + $0x300] sm:$0xff] }
 0x158   : > { %7697 = vmatprep.mubr.f32.mxu0 %v10602_v42  ;;  %8995 = vmatpush3.bf16.msra.mxu0 %v8992_v10  ;;  %v9008_v10 = vpack.c.bf16 %v1619_v9, %v1618_v22  ;;  %v394_v42 = vld [vmem:[#allocation2 + $0x18f] sm:$0x1]  ;;  %v10836_v22 = vld [vmem:[#allocation2 + $0x99] sm:$0xff] }
 0x159   : > { %8997 = vmatprep.subr.bf16.mxu0 %v8996_v14  ;;  %412 = vst [vmem:[#allocation2 + $0x191] sm:$0x1] %v394_v42  ;;  %v10838_v9 = vld [vmem:[#allocation2 + $0xa9] sm:$0xff]  ;;  %v10844_v42 = vld [vmem:[#allocation2 + $0xb1] sm:$0xff] }
 0x15a   : > { %12339 = vst [vmem:[#allocation36_spill] sm:$0xff] %v10844_v42 }
 0x15b   : > { %7698 = vmatmul.mubr.f32.gmra.mrb[6].mxu0 %v10606_v53  ;;  %v10802_v53 = vld [vmem:[#allocation2 + $0x180] sm:$0xff] }
 0x15c   : > { %7700 = vmatprep.mubr.f32.mxu0 %v10608_v54  ;;  %8999 = vmatpush3.bf16.msra.mxu0 %v8996_v14  ;;  %v9012_v14 = vpack.c.bf16 %v1621_v46, %v1620_v15  ;;  %v10806_v54 = vld [vmem:[#allocation2 + $0x188] sm:$0xff]  ;;  %v1926_v15 = vld [vmem:[#allocation6 + $0x2f0] sm:$0xff] }
 0x15d   : > { %9001 = vmatprep.subr.bf16.mxu0 %v9000_v17  ;;  %v1927_v46 = vld [vmem:[#allocation6 + $0x2f8] sm:$0xff] }
 0x15e   : > { %v9044_v49 = vpack.c.bf16 %v1927_v46, %v1926_v15  ;;  %v2223_v15 = vld [vmem:[#allocation6 + $0x320] sm:$0xff]  ;;  %v2224_v46 = vld [vmem:[#allocation6 + $0x328] sm:$0xff] }
 0x15f   : > { %7701 = vmatmul.mubr.f32.gmra.mrb[8].mxu0 %v10612_v58  ;;  %v1573_v58 = vld [vmem:[#allocation2 + $0x19] sm:$0xff] }
 0x160   : > { %7703 = vmatprep.mubr.f32.mxu0 %v10614_v59  ;;  %9003 = vmatpush3.bf16.msra.mxu0 %v9000_v17  ;;  %v1914_v59 = vld [vmem:[#allocation6 + $0x290] sm:$0xff]  ;;  %v10832_v17 = vld [vmem:[#allocation2 + $0x91] sm:$0xff] }
 0x161   : > { %9005 = vmatprep.subr.bf16.mxu0 %v9004_v21 }
 0x163   : > { %7704 = vmatmul.mubr.f32.gmra.mrb[10].mxu0 %v10618_v63  ;;  %v1915_v63 = vld [vmem:[#allocation6 + $0x298] sm:$0xff] }
 0x164   : > { %7706 = vmatprep.mubr.f32.mxu0 %v10620_v0  ;;  %9007 = vmatpush3.bf16.msra.mxu0 %v9004_v21  ;;  %v1574_v0 = vld [vmem:[#allocation2 + $0x21] sm:$0xff]  ;;  %v1925_v21 = vld [vmem:[#allocation6 + $0x2e8] sm:$0xff] }
 0x165   : > { %9009 = vmatprep.subr.bf16.mxu0 %v9008_v10 }
 0x167   : > { %7707 = vmatmul.mubr.f32.gmra.mrb[12].mxu0 %v10624_v4  ;;  %v10809_v4 = vld [vmem:[#allocation2 + $0x31] sm:$0xff] }
 0x168   : > { %7709 = vmatprep.mubr.f32.mxu0 %v10626_v5  ;;  %9011 = vmatpush3.bf16.msra.mxu0 %v9008_v10  ;;  %v9020_v5 = vpack.c.bf16 %v1915_v63, %v1914_v59  ;;  %v9040_v10 = vpack.c.bf16 %v1925_v21, %v1924_v16  ;;  %v10851_v63 = vld [vmem:[#allocation2 + $0xd9] sm:$0xff]  ;;  %v2222_v21 = vld [vmem:[#allocation6 + $0x318] sm:$0xff] }
 0x169   : > { %9013 = vmatprep.subr.bf16.mxu0 %v9012_v14  ;;  %12340 = vst [vmem:[#allocation37_spill] sm:$0xff] %v10851_v63  ;;  %v2221_v16 = vld [vmem:[#allocation6 + $0x310] sm:$0xff] }
 0x16b   : > { %7710 = vmatmul.mubr.f32.gmra.mrb[14].mxu0 %v10630_v7  ;;  %v1916_v7 = vld [vmem:[#allocation6 + $0x2a0] sm:$0xff] }
 0x16c   : > { %7712 = vmatprep.mubr.f32.mxu0 %v10632_v8  ;;  %9015 = vmatpush3.bf16.msra.mxu0 %v9012_v14  ;;  %v1917_v8 = vld [vmem:[#allocation6 + $0x2a8] sm:$0xff]  ;;  %v10842_v14 = vld [vmem:[#allocation2 + $0xc1] sm:$0xff] }
 0x16d   : > { %9017 = vmatprep.subr.bf16.mxu0 %v9016_v41 }
 0x16f   : > { %7713 = vmatmul.mubr.f32.gmra.mrb[16].mxu0 %v10636_v11  ;;  %v10812_v11 = vld [vmem:[#allocation2 + $0x39] sm:$0xff] }
 0x170   : > { %7715 = vmatprep.mubr.f32.mxu0 %v10638_v12  ;;  %v10814_v12 = vld [vmem:[#allocation2 + $0x49] sm:$0xff] }
 0x173   : > { %7716 = vmatmul.mubr.f32.gmra.mrb[18].mxu0 %v10642_v18  ;;  %v9024_v18 = vpack.c.bf16 %v1917_v8, %v1916_v7  ;;  %v10860_v7 = vld [vmem:[#allocation2 + $0xf9] sm:$0xff]  ;;  %v10863_v8 = vld [vmem:[#allocation2 + $0x109] sm:$0xff] }
 0x174   : > { %7718 = vmatprep.mubr.f32.mxu0 %v10644_v27  ;;  %v1918_v27 = vld [vmem:[#allocation6 + $0x2b0] sm:$0xff]  ;;  %12343 = vst [vmem:[#allocation40_spill] sm:$0xff] %v10860_v7  ;;  %12344 = vst [vmem:[#allocation41_spill] sm:$0xff] %v10863_v8 }
 0x177   : > { %7719 = vmatmul.mubr.f32.gmra.mrb[20].mxu0 %v10648_v19  ;;  %v1919_v19 = vld [vmem:[#allocation6 + $0x2b8] sm:$0xff] }
 0x178   : > { %7721 = vmatprep.mubr.f32.mxu0 %v10650_v33  ;;  %v10818_v33 = vld [vmem:[#allocation2 + $0x51] sm:$0xff] }
 0x17b   : > { %7722 = vmatmul.mubr.f32.gmra.mrb[22].mxu0 %v10658_v35  ;;  %v10820_v35 = vld [vmem:[#allocation2 + $0x61] sm:$0xff] }
 0x17c   : > { %7724 = vmatprep.mubr.f32.mxu0 %v10660_v36  ;;  %v9028_v36 = vpack.c.bf16 %v1919_v19, %v1918_v27  ;;  %v10869_v27 = vld [vmem:[#allocation2 + $0x121] sm:$0xff]  ;;  %v10872_v19 = vld [vmem:[#allocation2 + $0x129] sm:$0xff] }
 0x17d   : > { %12346 = vst [vmem:[#allocation43_spill] sm:$0xff] %v10869_v27  ;;  %12347 = vst [vmem:[#allocation44_spill] sm:$0xff] %v10872_v19 }
 0x17f   : > { %7725 = vmatmul.mubr.f32.gmra.mrb[24].mxu0 %v10664_v37  ;;  %v1920_v37 = vld [vmem:[#allocation6 + $0x2c0] sm:$0xff] }
 0x180   : > { %7727 = vmatprep.mubr.f32.mxu0 %v10666_v39  ;;  %v1921_v39 = vld [vmem:[#allocation6 + $0x2c8] sm:$0xff] }
 0x183   : > { %7728 = vmatmul.mubr.f32.gmra.mrb[26].mxu0 %v10674_v47  ;;  %v10824_v47 = vld [vmem:[#allocation2 + $0x69] sm:$0xff] }
 0x184   : > { %7730 = vmatprep.mubr.f32.mxu0 %v10676_v48  ;;  %v10826_v48 = vld [vmem:[#allocation2 + $0x79] sm:$0xff] }
 0x187   : > { %7731 = vmatmul.mubr.f32.gmra.mrb[28].mxu0 %v10680_v20  ;;  %v9032_v20 = vpack.c.bf16 %v1921_v39, %v1920_v37  ;;  %v10878_v37 = vld [vmem:[#allocation2 + $0x141] sm:$0xff]  ;;  %v10881_v39 = vld [vmem:[#allocation2 + $0x151] sm:$0xff] }
 0x188   : > { %7733 = vmatprep.mubr.f32.mxu0 %v10802_v53  ;;  %12349 = vst [vmem:[#allocation46_spill] sm:$0xff] %v10878_v37  ;;  %12350 = vst [vmem:[#allocation47_spill] sm:$0xff] %v10881_v39 }
 0x18b   : > { %7734 = vmatmul.mubr.f32.gmra.mrb[30].mxu0 %v10806_v54 }
 0x18c   : > { %7768 = vmatprep.mubr.f32.mxu0 %v1573_v58  ;;  %v10848_v58 = vld [vmem:[#allocation2 + $0xc9] sm:$0xff] }
 0x18f   : > { %7769 = vmatmul.mubr.f32.vlgmr.msra.gmra.mrb[0].mxu0 %v1574_v0  ;;  %v10854_v0 = vld [vmem:[#allocation2 + $0xe1] sm:$0xff] }
 0x190   : > { %9019 = vmatpush3.bf16.msra.mxu0 %v9016_v41  ;;  %7771 = vmatprep.mubr.f32.mxu0 %v10809_v4  ;;  %v2220_v41 = vld [vmem:[#allocation6 + $0x308] sm:$0xff]  ;;  %12341 = vst [vmem:[#allocation38_spill] sm:$0xff] %v10854_v0 }
 0x191   : > { %9021 = vmatprep.subr.bf16.mxu0 %v9020_v5  ;;  %v9048_v59 = vpack.c.bf16 %v2220_v41, %v2219_v29  ;;  %v2225_v29 = vld [vmem:[#allocation6 + $0x330] sm:$0xff]  ;;  %v2226_v41 = vld [vmem:[#allocation6 + $0x338] sm:$0xff] }
 0x193   : > { %7772 = vmatmul.mubr.f32.gmra.mrb[2].mxu0 %v10812_v11 }
 0x194   : > { %7774 = vmatprep.mubr.f32.mxu0 %v10814_v12  ;;  %9023 = vmatpush3.bf16.msra.mxu0 %v9020_v5  ;;  %v10857_v5 = vld [vmem:[#allocation2 + $0xf1] sm:$0xff] }
 0x195   : > { %9025 = vmatprep.subr.bf16.mxu0 %v9024_v18  ;;  %12342 = vst [vmem:[#allocation39_spill] sm:$0xff] %v10857_v5 }
 0x197   : > { %7775 = vmatmul.mubr.f32.gmra.mrb[4].mxu0 %v10818_v33 }
 0x198   : > { %7777 = vmatprep.mubr.f32.mxu0 %v10820_v35  ;;  %9027 = vmatpush3.bf16.msra.mxu0 %v9024_v18  ;;  %v10866_v18 = vld [vmem:[#allocation2 + $0x111] sm:$0xff] }
 0x199   : > { %9029 = vmatprep.subr.bf16.mxu0 %v9028_v36  ;;  %12345 = vst [vmem:[#allocation42_spill] sm:$0xff] %v10866_v18 }
 0x19b   : > { %7778 = vmatmul.mubr.f32.gmra.mrb[6].mxu0 %v10824_v47 }
 0x19c   : > { %7780 = vmatprep.mubr.f32.mxu0 %v10826_v48  ;;  %9031 = vmatpush3.bf16.msra.mxu0 %v9028_v36  ;;  %v10875_v36 = vld [vmem:[#allocation2 + $0x139] sm:$0xff] }
 0x19d   : > { %9033 = vmatprep.subr.bf16.mxu0 %v9032_v20  ;;  %12348 = vst [vmem:[#allocation45_spill] sm:$0xff] %v10875_v36 }
 0x19f   : > { %7781 = vmatmul.mubr.f32.gmra.mrb[8].mxu0 %v10830_v13 }
 0x1a0   : > { %7783 = vmatprep.mubr.f32.mxu0 %v10832_v17  ;;  %9035 = vmatpush3.bf16.msra.mxu0 %v9032_v20  ;;  %v359_v20 = vld [vmem:[#allocation2 + $0x19a] sm:$0x1] }
 0x1a1   : > { %9037 = vmatprep.subr.bf16.mxu0 %v9036_v45  ;;  %377 = vst [vmem:[#allocation2 + $0x198] sm:$0x1] %v359_v20  ;;  %v2232_v20 = vld [vmem:[#allocation6 + $0x368] sm:$0xff] }
 0x1a3   : > { %7784 = vmatmul.mubr.f32.gmra.mrb[10].mxu0 %v10836_v22 }
 0x1a4   : > { %7786 = vmatprep.mubr.f32.mxu0 %v10838_v9  ;;  %9039 = vmatpush3.bf16.msra.mxu0 %v9036_v45  ;;  %v10890_v45 = vld [vmem:[#allocation2 + $0x171] sm:$0xff] }
 0x1a5   : > { %9041 = vmatprep.subr.bf16.mxu0 %v9040_v10  ;;  %12353 = vst [vmem:[#allocation50_spill] sm:$0xff] %v10890_v45 }
 0x1a7   : > { %7787 = vmatmul.mubr.f32.gmra.mrb[12].mxu0 %v10844_v42  ;;  %v4653_v42 = vld [vmem:[#allocation8 + $0x218] sm:$0xff] }
 0x1a8   : > { %7789 = vmatprep.mubr.f32.mxu0 %v10842_v14  ;;  %9043 = vmatpush3.bf16.msra.mxu0 %v9040_v10  ;;  %v9052_v10 = vpack.c.bf16 %v2222_v21, %v2221_v16  ;;  %v2234_v16 = vld [vmem:[#allocation6 + $0x378] sm:$0xff]  ;;  %v2526_v21 = vld [vmem:[#allocation6 + $0x388] sm:$0xff] }
 0x1a9   : > { %9045 = vmatprep.subr.bf16.mxu0 %v9044_v49 }
 0x1ab   : > { %7790 = vmatmul.mubr.f32.gmra.mrb[14].mxu0 %v10848_v58 }
 0x1ac   : > { %7792 = vmatprep.mubr.f32.mxu0 %v10851_v63  ;;  %9047 = vmatpush3.bf16.msra.mxu0 %v9044_v49  ;;  %v9056_v49 = vpack.c.bf16 %v2224_v46, %v2223_v15  ;;  %v2187_v15 = vld [vmem:[#allocation2 + $0x38] sm:$0xff]  ;;  %v2188_v46 = vld [vmem:[#allocation2 + $0x48] sm:$0xff]  ;;  %v4652_v63 = vld [vmem:[#allocation8 + $0x210] sm:$0xff] }
 0x1ad   : > { %9049 = vmatprep.subr.bf16.mxu0 %v9048_v59 }
 0x1af   : > { %7793 = vmatmul.mubr.f32.gmra.mrb[16].mxu0 %v10854_v0 }
 0x1b0   : > { %7795 = vmatprep.mubr.f32.mxu0 %v10857_v5 }
 0x1b3   : > { %7796 = vmatmul.mubr.f32.gmra.mrb[18].mxu0 %v10860_v7 }
 0x1b4   : > { %7798 = vmatprep.mubr.f32.mxu0 %v10863_v8 }
 0x1b7   : > { %7799 = vmatmul.mubr.f32.gmra.mrb[20].mxu0 %v10866_v18 }
 0x1b8   : > { %7801 = vmatprep.mubr.f32.mxu0 %v10869_v27 }
 0x1bb   : > { %7802 = vmatmul.mubr.f32.gmra.mrb[22].mxu0 %v10872_v19 }
 0x1bc   : > { %7804 = vmatprep.mubr.f32.mxu0 %v10875_v36 }
 0x1bf   : > { %7805 = vmatmul.mubr.f32.gmra.mrb[24].mxu0 %v10878_v37 }
 0x1c0   : > { %7807 = vmatprep.mubr.f32.mxu0 %v10881_v39  ;;  %v3495_v39 = vld [vmem:[#allocation8 + $0x28] sm:$0xff] }
 0x1c3   : > { %7808 = vmatmul.mubr.f32.gmra.mrb[26].mxu0 %v10884_v50  ;;  %v3492_v50 = vld [vmem:[#allocation8 + $0x10] sm:$0xff] }
 0x1c4   : > { %7810 = vmatprep.mubr.f32.mxu0 %v10887_v38 }
 0x1c7   : > { %7811 = vmatmul.mubr.f32.gmra.mrb[28].mxu0 %v10890_v45  ;;  %v3553_v45 = vld [vmem:[#allocation8 + $0xf0] sm:$0xff] }
 0x1c8   : > { %7813 = vmatprep.mubr.f32.mxu0 %v10653_v34  ;;  %v9060_v34 = vpack.c.bf16 %v2226_v41, %v2225_v29  ;;  %v2529_v29 = vld [vmem:[#allocation6 + $0x3a0] sm:$0xff]  ;;  %v2530_v41 = vld [vmem:[#allocation6 + $0x3a8] sm:$0xff] }
 0x1cb   : > { %7814 = vmatmul.mubr.f32.gmra.mrb[30].mxu0 %v10669_v44  ;;  %v2227_v44 = vld [vmem:[#allocation6 + $0x340] sm:$0xff] }
 0x1cc   : > { %7848 = vmatprep.mubr.f32.mxu0 %v10683_v51  ;;  %v2228_v51 = vld [vmem:[#allocation6 + $0x348] sm:$0xff] }
 0x1cf   : > { %7849 = vmatmul.mubr.f32.vlgmr.msra.gmra.mrb[0].mxu0 %v10686_v57  ;;  %v9064_v57 = vpack.c.bf16 %v2228_v51, %v2227_v44  ;;  %v2190_v44 = vld [vmem:[#allocation2 + $0x60] sm:$0xff]  ;;  %v9088_v51 = vpack.c.bf16 %v2530_v41, %v2529_v29  ;;  %v2202_v41 = vld [vmem:[#allocation2 + $0xf0] sm:$0xff] }
 0x1d0   : > { %9051 = vmatpush3.bf16.msra.mxu0 %v9048_v59  ;;  %7851 = vmatprep.mubr.f32.mxu0 %v10688_v60  ;;  %v2229_v60 = vld [vmem:[#allocation6 + $0x350] sm:$0xff]  ;;  %v2230_v59 = vld [vmem:[#allocation6 + $0x358] sm:$0xff] }
 0x1d1   : > { %9053 = vmatprep.subr.bf16.mxu0 %v9052_v10  ;;  %v2201_v29 = vld [vmem:[#allocation2 + $0xe0] sm:$0xff] }
 0x1d3   : > { %7852 = vmatmul.mubr.f32.gmra.mrb[2].mxu0 %v10692_v2  ;;  %v9068_v2 = vpack.c.bf16 %v2230_v59, %v2229_v60  ;;  %v2532_v60 = vld [vmem:[#allocation6 + $0x3b8] sm:$0xff] }
 0x1d4   : > { %7854 = vmatprep.mubr.f32.mxu0 %v10694_v3  ;;  %9055 = vmatpush3.bf16.msra.mxu0 %v9052_v10  ;;  %v2231_v3 = vld [vmem:[#allocation6 + $0x360] sm:$0xff]  ;;  %v2528_v10 = vld [vmem:[#allocation6 + $0x398] sm:$0xff] }
 0x1d5   : > { %9057 = vmatprep.subr.bf16.mxu0 %v9056_v49  ;;  %v2191_v59 = vld [vmem:[#allocation2 + $0x68] sm:$0xff] }
 0x1d7   : > { %7855 = vmatmul.mubr.f32.gmra.mrb[4].mxu0 %v10698_v31  ;;  %v9072_v31 = vpack.c.bf16 %v2232_v20, %v2231_v3  ;;  %v2533_v20 = vld [vmem:[#allocation6 + $0x3c0] sm:$0xff] }
 0x1d8   : > { %7857 = vmatprep.mubr.f32.mxu0 %v10700_v40  ;;  %9059 = vmatpush3.bf16.msra.mxu0 %v9056_v49  ;;  %v2233_v40 = vld [vmem:[#allocation6 + $0x370] sm:$0xff] }
 0x1d9   : > { %9061 = vmatprep.subr.bf16.mxu0 %v9060_v34 }
 0x1db   : > { %7858 = vmatmul.mubr.f32.gmra.mrb[6].mxu0 %v10704_v52  ;;  %v9076_v52 = vpack.c.bf16 %v2234_v16, %v2233_v40  ;;  %v2193_v40 = vld [vmem:[#allocation2 + $0x80] sm:$0xff]  ;;  %v2194_v16 = vld [vmem:[#allocation2 + $0x90] sm:$0xff] }
 0x1dc   : > { %7860 = vmatprep.mubr.f32.mxu0 %v10706_v62  ;;  %9063 = vmatpush3.bf16.msra.mxu0 %v9060_v34  ;;  %v2525_v62 = vld [vmem:[#allocation6 + $0x380] sm:$0xff] }
 0x1dd   : > { %9065 = vmatprep.subr.bf16.mxu0 %v9064_v57  ;;  %v2189_v34 = vld [vmem:[#allocation2 + $0x50] sm:$0xff] }
 0x1df   : > { %7861 = vmatmul.mubr.f32.gmra.mrb[8].mxu0 %v10710_v61  ;;  %v9080_v61 = vpack.c.bf16 %v2526_v21, %v2525_v62  ;;  %v2535_v62 = vld [vmem:[#allocation6 + $0x3d0] sm:$0xff]  ;;  %v2536_v21 = vld [vmem:[#allocation6 + $0x3d8] sm:$0xff] }
 0x1e0   : > { %7863 = vmatprep.mubr.f32.mxu0 %v10712_v43  ;;  %9067 = vmatpush3.bf16.msra.mxu0 %v9064_v57  ;;  %v12354_v43 = vld [vmem:[#allocation28_spill] sm:$0xff]  ;;  %v2531_v57 = vld [vmem:[#allocation6 + $0x3b0] sm:$0xff] }
 0x1e1   : > { %9069 = vmatprep.subr.bf16.mxu0 %v9068_v2  ;;  %v9092_v3 = vpack.c.bf16 %v2532_v60, %v2531_v57  ;;  %v2205_v57 = vld [vmem:[#allocation2 + $0x110] sm:$0xff]  ;;  %v2206_v60 = vld [vmem:[#allocation2 + $0x120] sm:$0xff] }
 0x1e3   : > { %7864 = vmatmul.mubr.f32.gmra.mrb[10].mxu0 %v10716_v6  ;;  %v12355_v6 = vld [vmem:[#allocation29_spill] sm:$0xff] }
 0x1e4   : > { %7866 = vmatprep.mubr.f32.mxu0 %v10718_v55  ;;  %9071 = vmatpush3.bf16.msra.mxu0 %v9068_v2  ;;  %v12356_v55 = vld [vmem:[#allocation30_spill] sm:$0xff] }
 0x1e5   : > { %9073 = vmatprep.subr.bf16.mxu0 %v9072_v31  ;;  %v2192_v2 = vld [vmem:[#allocation2 + $0x78] sm:$0xff] }
 0x1e7   : > { %7867 = vmatmul.mubr.f32.gmra.mrb[12].mxu0 %v10722_v28  ;;  %v12357_v28 = vld [vmem:[#allocation31_spill] sm:$0xff] }
 0x1e8   : > { %7869 = vmatprep.mubr.f32.mxu0 %v10724_v32  ;;  %9075 = vmatpush3.bf16.msra.mxu0 %v9072_v31  ;;  %v12358_v32 = vld [vmem:[#allocation32_spill] sm:$0xff]  ;;  %v2534_v31 = vld [vmem:[#allocation6 + $0x3c8] sm:$0xff] }
 0x1e9   : > { %9077 = vmatprep.subr.bf16.mxu0 %v9076_v52 }
 0x1eb   : > { %7870 = vmatmul.mubr.f32.gmra.mrb[14].mxu0 %v10728_v1  ;;  %v12359_v1 = vld [vmem:[#allocation33_spill] sm:$0xff] }
 0x1ec   : > { %7872 = vmatprep.mubr.f32.mxu0 %v10730_v25  ;;  %9079 = vmatpush3.bf16.msra.mxu0 %v9076_v52  ;;  %v12360_v25 = vld [vmem:[#allocation34_spill] sm:$0xff]  ;;  %v9096_v52 = vpack.c.bf16 %v2534_v31, %v2533_v20  ;;  %v2210_v20 = vld [vmem:[#allocation2 + $0x150] sm:$0xff] }
 0x1ed   : > { %9081 = vmatprep.subr.bf16.mxu0 %v9080_v61  ;;  %v2211_v31 = vld [vmem:[#allocation2 + $0x158] sm:$0xff] }
 0x1ef   : > { %7873 = vmatmul.mubr.f32.gmra.mrb[16].mxu0 %v10734_v26  ;;  %v10924_v26 = vld [vmem:[#allocation2 + $0x182] sm:$0xff] }
 0x1f0   : > { %7875 = vmatprep.mubr.f32.mxu0 %v10736_v30  ;;  %v12361_v30 = vld [vmem:[#allocation35_spill] sm:$0xff] }
 0x1f3   : > { %7876 = vmatmul.mubr.f32.gmra.mrb[18].mxu0 %v10740_v23  ;;  %v10928_v23 = vld [vmem:[#allocation2 + $0x18a] sm:$0xff] }
 0x1f4   : > { %7878 = vmatprep.mubr.f32.mxu0 %v10742_v24  ;;  %v2186_v24 = vld [vmem:[#allocation2 + $0x30] sm:$0xff] }
 0x1f7   : > { %7879 = vmatmul.mubr.f32.gmra.mrb[20].mxu0 %v10746_v56  ;;  %v2527_v56 = vld [vmem:[#allocation6 + $0x390] sm:$0xff] }
 0x1f8   : > { %7881 = vmatprep.mubr.f32.mxu0 %v12354_v43  ;;  %v9084_v49 = vpack.c.bf16 %v2528_v10, %v2527_v56  ;;  %v2196_v43 = vld [vmem:[#allocation2 + $0xa8] sm:$0xff]  ;;  %v2200_v10 = vld [vmem:[#allocation2 + $0xd8] sm:$0xff] }
 0x1f9   : > { %v2199_v56 = vld [vmem:[#allocation2 + $0xc8] sm:$0xff] }
 0x1fb   : > { %7882 = vmatmul.mubr.f32.gmra.mrb[22].mxu0 %v12355_v6  ;;  %v9100_v6 = vpack.c.bf16 %v2536_v21, %v2535_v62  ;;  %v2216_v62 = vld [vmem:[#allocation2 + $0x198] sm:$0xff]  ;;  %v2217_v21 = vld [vmem:[#allocation2 + $0x1a0] sm:$0xff] }
 0x1fc   : > { %7884 = vmatprep.mubr.f32.mxu0 %v12356_v55  ;;  %v2537_v55 = vld [vmem:[#allocation6 + $0x3e0] sm:$0xff] }
 0x1ff   : > { %7885 = vmatmul.mubr.f32.gmra.mrb[24].mxu0 %v12357_v28  ;;  %v2538_v28 = vld [vmem:[#allocation6 + $0x3e8] sm:$0xff] }
 0x200   : > { %7887 = vmatprep.mubr.f32.mxu0 %v12358_v32  ;;  %v2197_v32 = vld [vmem:[#allocation2 + $0xb0] sm:$0xff] }
 0x203   : > { %7888 = vmatmul.mubr.f32.gmra.mrb[26].mxu0 %v12359_v1  ;;  %v2198_v1 = vld [vmem:[#allocation2 + $0xc0] sm:$0xff] }
 0x204   : > { %7890 = vmatprep.mubr.f32.mxu0 %v12360_v25  ;;  %v9104_v25 = vpack.c.bf16 %v2538_v28, %v2537_v55  ;;  %v2835_v55 = vld [vmem:[#allocation6 + $0x420] sm:$0xff]  ;;  %v2836_v28 = vld [vmem:[#allocation6 + $0x428] sm:$0xff] }
 0x207   : > { %7891 = vmatmul.mubr.f32.gmra.mrb[28].mxu0 %v12361_v30  ;;  %v2539_v30 = vld [vmem:[#allocation6 + $0x3f0] sm:$0xff] }
 0x208   : > { %7893 = vmatprep.mubr.f32.mxu0 %v10924_v26 }
 0x20b   : > { %7894 = vmatmul.mubr.f32.gmra.mrb[30].mxu0 %v10928_v23 }
 0x20c   : > { %7928 = vmatprep.mubr.f32.mxu0 %v2186_v24  ;;  %v2540_v24 = vld [vmem:[#allocation6 + $0x3f8] sm:$0xff] }
 0x20f   : > { %7929 = vmatmul.mubr.f32.vlgmr.msra.gmra.mrb[0].mxu0 %v2187_v15  ;;  %v9108_v15 = vpack.c.bf16 %v2540_v24, %v2539_v30  ;;  %v2842_v30 = vld [vmem:[#allocation6 + $0x458] sm:$0xff]  ;;  %v2844_v24 = vld [vmem:[#allocation6 + $0x468] sm:$0xff] }
 0x210   : > { %9083 = vmatpush3.bf16.msra.mxu0 %v9080_v61  ;;  %7931 = vmatprep.mubr.f32.mxu0 %v2188_v46  ;;  %v2195_v61 = vld [vmem:[#allocation2 + $0x98] sm:$0xff]  ;;  %v2831_v46 = vld [vmem:[#allocation6 + $0x400] sm:$0xff] }
 0x211   : > { %9085 = vmatprep.subr.bf16.mxu0 %v9084_v49 }
 0x213   : > { %7932 = vmatmul.mubr.f32.gmra.mrb[2].mxu0 %v2189_v34 }
 0x214   : > { %7934 = vmatprep.mubr.f32.mxu0 %v2190_v44  ;;  %9087 = vmatpush3.bf16.msra.mxu0 %v9084_v49  ;;  %v2832_v49 = vld [vmem:[#allocation6 + $0x408] sm:$0xff] }
 0x215   : > { %9089 = vmatprep.subr.bf16.mxu0 %v9088_v51  ;;  %v9112_v34 = vpack.c.bf16 %v2832_v49, %v2831_v46  ;;  %v2203_v44 = vld [vmem:[#allocation2 + $0xf8] sm:$0xff]  ;;  %v2510_v46 = vld [vmem:[#allocation2 + $0x109] sm:$0xff] }
 0x216   : > { %v2511_v49 = vld [vmem:[#allocation2 + $0x111] sm:$0xff] }
 0x217   : > { %7935 = vmatmul.mubr.f32.gmra.mrb[4].mxu0 %v2191_v59  ;;  %v2207_v59 = vld [vmem:[#allocation2 + $0x128] sm:$0xff] }
 0x218   : > { %7937 = vmatprep.mubr.f32.mxu0 %v2192_v2  ;;  %9091 = vmatpush3.bf16.msra.mxu0 %v9088_v51  ;;  %v2204_v51 = vld [vmem:[#allocation2 + $0x108] sm:$0xff]  ;;  %v2208_v2 = vld [vmem:[#allocation2 + $0x138] sm:$0xff] }
 0x219   : > { %9093 = vmatprep.subr.bf16.mxu0 %v9092_v3 }
 0x21b   : > { %7938 = vmatmul.mubr.f32.gmra.mrb[6].mxu0 %v2193_v40  ;;  %v2212_v40 = vld [vmem:[#allocation2 + $0x168] sm:$0xff] }
 0x21c   : > { %7940 = vmatprep.mubr.f32.mxu0 %v2194_v16  ;;  %9095 = vmatpush3.bf16.msra.mxu0 %v9092_v3  ;;  %v2209_v3 = vld [vmem:[#allocation2 + $0x140] sm:$0xff]  ;;  %v2213_v16 = vld [vmem:[#allocation2 + $0x170] sm:$0xff] }
 0x21d   : > { %9097 = vmatprep.subr.bf16.mxu0 %v9096_v52 }
 0x21f   : > { %7941 = vmatmul.mubr.f32.gmra.mrb[8].mxu0 %v2195_v61  ;;  %v2833_v61 = vld [vmem:[#allocation6 + $0x410] sm:$0xff] }
 0x220   : > { %7943 = vmatprep.mubr.f32.mxu0 %v2196_v43  ;;  %9099 = vmatpush3.bf16.msra.mxu0 %v9096_v52  ;;  %v395_v52 = vld [vmem:[#allocation2 + $0x1a7] sm:$0x1]  ;;  %v2834_v43 = vld [vmem:[#allocation6 + $0x418] sm:$0xff] }
 0x221   : > { %9101 = vmatprep.subr.bf16.mxu0 %v9100_v6  ;;  %413 = vst [vmem:[#allocation2 + $0x1a9] sm:$0x1] %v395_v52  ;;  %v2802_v52 = vld [vmem:[#allocation2 + $0x62] sm:$0xff] }
 0x223   : > { %7944 = vmatmul.mubr.f32.gmra.mrb[10].mxu0 %v2197_v32  ;;  %v2837_v32 = vld [vmem:[#allocation6 + $0x430] sm:$0xff] }
 0x224   : > { %7946 = vmatprep.mubr.f32.mxu0 %v2198_v1  ;;  %9103 = vmatpush3.bf16.msra.mxu0 %v9100_v6  ;;  %v9116_v6 = vpack.c.bf16 %v2834_v43, %v2833_v61  ;;  %v2838_v1 = vld [vmem:[#allocation6 + $0x438] sm:$0xff]  ;;  %v2806_v43 = vld [vmem:[#allocation2 + $0x92] sm:$0xff] }
 0x225   : > { %9105 = vmatprep.subr.bf16.mxu0 %v9104_v25  ;;  %v2805_v61 = vld [vmem:[#allocation2 + $0x82] sm:$0xff] }
 0x227   : > { %7947 = vmatmul.mubr.f32.gmra.mrb[12].mxu0 %v2199_v56  ;;  %v2845_v56 = vld [vmem:[#allocation6 + $0x470] sm:$0xff] }
 0x228   : > { %7949 = vmatprep.mubr.f32.mxu0 %v2200_v10  ;;  %9107 = vmatpush3.bf16.msra.mxu0 %v9104_v25  ;;  %v2840_v25 = vld [vmem:[#allocation6 + $0x448] sm:$0xff]  ;;  %v2846_v10 = vld [vmem:[#allocation6 + $0x478] sm:$0xff] }
 0x229   : > { %9109 = vmatprep.subr.bf16.mxu0 %v9108_v15 }
 0x22b   : > { %7950 = vmatmul.mubr.f32.gmra.mrb[14].mxu0 %v2201_v29  ;;  %v2513_v29 = vld [vmem:[#allocation2 + $0x129] sm:$0xff] }
 0x22c   : > { %7952 = vmatprep.mubr.f32.mxu0 %v2202_v41  ;;  %9111 = vmatpush3.bf16.msra.mxu0 %v9108_v15  ;;  %v2507_v15 = vld [vmem:[#allocation2 + $0xe1] sm:$0xff]  ;;  %v2514_v41 = vld [vmem:[#allocation2 + $0x139] sm:$0xff] }
 0x22d   : > { %9113 = vmatprep.subr.bf16.mxu0 %v9112_v34 }
 0x22f   : > { %7953 = vmatmul.mubr.f32.gmra.mrb[16].mxu0 %v2203_v44  ;;  %v2517_v44 = vld [vmem:[#allocation2 + $0x159] sm:$0xff] }
 0x230   : > { %7955 = vmatprep.mubr.f32.mxu0 %v2204_v51  ;;  %v2518_v51 = vld [vmem:[#allocation2 + $0x169] sm:$0xff] }
 0x233   : > { %7956 = vmatmul.mubr.f32.gmra.mrb[18].mxu0 %v2205_v57  ;;  %v2519_v57 = vld [vmem:[#allocation2 + $0x171] sm:$0xff] }
 0x234   : > { %7958 = vmatprep.mubr.f32.mxu0 %v2206_v60  ;;  %v10946_v60 = vld [vmem:[#allocation2 + $0x181] sm:$0xff] }
 0x235   : > { %12362 = vst [vmem:[#allocation28_spill] sm:$0xff] %v10946_v60 }
 0x237   : > { %7959 = vmatmul.mubr.f32.gmra.mrb[20].mxu0 %v2207_v59  ;;  %v2522_v59 = vld [vmem:[#allocation2 + $0x199] sm:$0xff] }
 0x238   : > { %7961 = vmatprep.mubr.f32.mxu0 %v2208_v2  ;;  %v10949_v2 = vld [vmem:[#allocation2 + $0x189] sm:$0xff] }
 0x239   : > { %12363 = vst [vmem:[#allocation29_spill] sm:$0xff] %v10949_v2 }
 0x23b   : > { %7962 = vmatmul.mubr.f32.gmra.mrb[22].mxu0 %v2209_v3  ;;  %v2523_v3 = vld [vmem:[#allocation2 + $0x1a1] sm:$0xff] }
 0x23c   : > { %7964 = vmatprep.mubr.f32.mxu0 %v2210_v20  ;;  %v2798_v20 = vld [vmem:[#allocation2 + $0x32] sm:$0xff] }
 0x23f   : > { %7965 = vmatmul.mubr.f32.gmra.mrb[24].mxu0 %v2211_v31  ;;  %v2799_v31 = vld [vmem:[#allocation2 + $0x3a] sm:$0xff] }
 0x240   : > { %7967 = vmatprep.mubr.f32.mxu0 %v2212_v40  ;;  %v2800_v40 = vld [vmem:[#allocation2 + $0x4a] sm:$0xff] }
 0x243   : > { %7968 = vmatmul.mubr.f32.gmra.mrb[26].mxu0 %v2213_v16  ;;  %v2801_v16 = vld [vmem:[#allocation2 + $0x52] sm:$0xff] }
 0x244   : > { %7970 = vmatprep.mubr.f32.mxu0 %v10802_v53  ;;  %v9120_v53 = vpack.c.bf16 %v2836_v28, %v2835_v55  ;;  %v2808_v55 = vld [vmem:[#allocation2 + $0xaa] sm:$0xff]  ;;  %v2809_v28 = vld [vmem:[#allocation2 + $0xb2] sm:$0xff] }
 0x247   : > { %7971 = vmatmul.mubr.f32.gmra.mrb[28].mxu0 %v10806_v54  ;;  %v9124_v54 = vpack.c.bf16 %v2838_v1, %v2837_v32  ;;  %v2811_v32 = vld [vmem:[#allocation2 + $0xca] sm:$0xff]  ;;  %v2812_v1 = vld [vmem:[#allocation2 + $0xda] sm:$0xff] }
 0x248   : > { %7973 = vmatprep.mubr.f32.mxu0 %v2216_v62  ;;  %v2803_v62 = vld [vmem:[#allocation2 + $0x6a] sm:$0xff] }
 0x24b   : > { %7974 = vmatmul.mubr.f32.gmra.mrb[30].mxu0 %v2217_v21  ;;  %v2804_v21 = vld [vmem:[#allocation2 + $0x7a] sm:$0xff] }
 0x24c   : > { %8008 = vmatprep.mubr.f32.mxu0 %v10809_v4  ;;  %v2839_v4 = vld [vmem:[#allocation6 + $0x440] sm:$0xff] }
 0x24f   : > { %8009 = vmatmul.mubr.f32.vlgmr.msra.gmra.mrb[0].mxu0 %v10812_v11  ;;  %v9128_v11 = vpack.c.bf16 %v2840_v25, %v2839_v4  ;;  %v2814_v4 = vld [vmem:[#allocation2 + $0xf2] sm:$0xff]  ;;  %v2815_v25 = vld [vmem:[#allocation2 + $0xfa] sm:$0xff] }
 0x250   : > { %9115 = vmatpush3.bf16.msra.mxu0 %v9112_v34  ;;  %8011 = vmatprep.mubr.f32.mxu0 %v10814_v12  ;;  %v2841_v12 = vld [vmem:[#allocation6 + $0x450] sm:$0xff]  ;;  %v2516_v34 = vld [vmem:[#allocation2 + $0x151] sm:$0xff] }
 0x251   : > { %9117 = vmatprep.subr.bf16.mxu0 %v9116_v6 }
 0x253   : > { %8012 = vmatmul.mubr.f32.gmra.mrb[2].mxu0 %v10818_v33  ;;  %v9132_v33 = vpack.c.bf16 %v2842_v30, %v2841_v12  ;;  %v2817_v12 = vld [vmem:[#allocation2 + $0x112] sm:$0xff]  ;;  %v2818_v30 = vld [vmem:[#allocation2 + $0x122] sm:$0xff] }
 0x254   : > { %8014 = vmatprep.mubr.f32.mxu0 %v10820_v35  ;;  %9119 = vmatpush3.bf16.msra.mxu0 %v9116_v6  ;;  %v2843_v35 = vld [vmem:[#allocation6 + $0x460] sm:$0xff]  ;;  %v2807_v6 = vld [vmem:[#allocation2 + $0x9a] sm:$0xff] }
 0x255   : > { %9121 = vmatprep.subr.bf16.mxu0 %v9120_v53 }
 0x257   : > { %8015 = vmatmul.mubr.f32.gmra.mrb[4].mxu0 %v10824_v47  ;;  %v2503_v47 = vld [vmem:[#allocation2 + $0xb1] sm:$0xff] }
 0x258   : > { %8017 = vmatprep.mubr.f32.mxu0 %v10826_v48  ;;  %9123 = vmatpush3.bf16.msra.mxu0 %v9120_v53  ;;  %v9136_v48 = vpack.c.bf16 %v2844_v24, %v2843_v35  ;;  %v2810_v53 = vld [vmem:[#allocation2 + $0xc2] sm:$0xff]  ;;  %v2820_v35 = vld [vmem:[#allocation2 + $0x13a] sm:$0xff] }
 0x259   : > { %9125 = vmatprep.subr.bf16.mxu0 %v9124_v54  ;;  %v2821_v24 = vld [vmem:[#allocation2 + $0x142] sm:$0xff] }
 0x25b   : > { %8018 = vmatmul.mubr.f32.gmra.mrb[6].mxu0 %v10830_v13  ;;  %v2506_v13 = vld [vmem:[#allocation2 + $0xd9] sm:$0xff] }
 0x25c   : > { %8020 = vmatprep.mubr.f32.mxu0 %v10832_v17  ;;  %9127 = vmatpush3.bf16.msra.mxu0 %v9124_v54  ;;  %v9140_v17 = vpack.c.bf16 %v2846_v10, %v2845_v56  ;;  %v2813_v54 = vld [vmem:[#allocation2 + $0xe2] sm:$0xff]  ;;  %v2824_v56 = vld [vmem:[#allocation2 + $0x16a] sm:$0xff]  ;;  %v2825_v10 = vld [vmem:[#allocation2 + $0x172] sm:$0xff] }
 0x25d   : > { %9129 = vmatprep.subr.bf16.mxu0 %v9128_v11 }
 0x25f   : > { %8021 = vmatmul.mubr.f32.gmra.mrb[8].mxu0 %v10836_v22  ;;  %v2508_v22 = vld [vmem:[#allocation2 + $0xf1] sm:$0xff] }
 0x260   : > { %8023 = vmatprep.mubr.f32.mxu0 %v10838_v9  ;;  %9131 = vmatpush3.bf16.msra.mxu0 %v9128_v11  ;;  %v2509_v9 = vld [vmem:[#allocation2 + $0xf9] sm:$0xff]  ;;  %v2816_v11 = vld [vmem:[#allocation2 + $0x10a] sm:$0xff] }
 0x261   : > { %9133 = vmatprep.subr.bf16.mxu0 %v9132_v33 }
 0x263   : > { %8024 = vmatmul.mubr.f32.gmra.mrb[10].mxu0 %v2503_v47  ;;  %v2822_v47 = vld [vmem:[#allocation2 + $0x152] sm:$0xff] }
 0x264   : > { %8026 = vmatprep.mubr.f32.mxu0 %v10842_v14  ;;  %9135 = vmatpush3.bf16.msra.mxu0 %v9132_v33  ;;  %v2512_v14 = vld [vmem:[#allocation2 + $0x121] sm:$0xff]  ;;  %v2819_v33 = vld [vmem:[#allocation2 + $0x12a] sm:$0xff] }
 0x265   : > { %9137 = vmatprep.subr.bf16.mxu0 %v9136_v48 }
 0x267   : > { %8027 = vmatmul.mubr.f32.gmra.mrb[12].mxu0 %v10848_v58  ;;  %v2515_v58 = vld [vmem:[#allocation2 + $0x141] sm:$0xff] }
 0x268   : > { %8029 = vmatprep.mubr.f32.mxu0 %v2506_v13  ;;  %9139 = vmatpush3.bf16.msra.mxu0 %v9136_v48  ;;  %v2823_v48 = vld [vmem:[#allocation2 + $0x15a] sm:$0xff] }
 0x269   : > { %9141 = vmatprep.subr.bf16.mxu0 %v9140_v17  ;;  %v2828_v13 = vld [vmem:[#allocation2 + $0x19a] sm:$0xff] }
 0x26b   : > { %8030 = vmatmul.mubr.f32.gmra.mrb[14].mxu0 %v2507_v15  ;;  %v10957_v15 = vld [vmem:[%s12240_s2] ss:$0 sm:$0xff] }
 0x26c   : > { %8032 = vmatprep.mubr.f32.mxu0 %v2508_v22  ;;  %9143 = vmatpush3.bf16.msra.mxu0 %v9140_v17  ;;  %v2829_v17 = vld [vmem:[#allocation2 + $0x1a2] sm:$0xff] }
 0x26f   : > { %8033 = vmatmul.mubr.f32.gmra.mrb[16].mxu0 %v2509_v9 }
 0x270   : > { %8035 = vmatprep.mubr.f32.mxu0 %v2510_v46 }
 0x273   : > { %8036 = vmatmul.mubr.f32.gmra.mrb[18].mxu0 %v2511_v49 }
 0x274   : > { %8038 = vmatprep.mubr.f32.mxu0 %v2512_v14 }
 0x277   : > { %8039 = vmatmul.mubr.f32.gmra.mrb[20].mxu0 %v2513_v29 }
 0x278   : > { %8041 = vmatprep.mubr.f32.mxu0 %v2514_v41 }
 0x27b   : > { %8042 = vmatmul.mubr.f32.gmra.mrb[22].mxu0 %v2515_v58 }
 0x27c   : > { %8044 = vmatprep.mubr.f32.mxu0 %v2516_v34 }
 0x27f   : > { %8045 = vmatmul.mubr.f32.gmra.mrb[24].mxu0 %v2517_v44 }
 0x280   : > { %8047 = vmatprep.mubr.f32.mxu0 %v2518_v51 }
 0x283   : > { %8048 = vmatmul.mubr.f32.gmra.mrb[26].mxu0 %v2519_v57 }
 0x284   : > { %8050 = vmatprep.mubr.f32.mxu0 %v10946_v60  ;;  %v9276_v60 = vpack.c.bf16 %v4653_v42, %v4652_v63  ;;  %v4659_v42 = vld [vmem:[#allocation8 + $0x248] sm:$0xff] }
 0x287   : > { %8051 = vmatmul.mubr.f32.gmra.mrb[28].mxu0 %v10949_v2 }
 0x288   : > { %8053 = vmatprep.mubr.f32.mxu0 %v2522_v59 }
 0x28b   : > { %8054 = vmatmul.mubr.f32.gmra.mrb[30].mxu0 %v2523_v3 }
 0x28c   : > { %8088 = vmatprep.mubr.f32.mxu0 %v2798_v20 }
 0x28f   : > { %8089 = vmatmul.mubr.f32.vlgmr.msra.gmra.mrb[0].mxu0 %v2799_v31 }
 0x290   : > { %8091 = vmatprep.mubr.f32.mxu0 %v2800_v40 }
 0x293   : > { %8092 = vmatmul.mubr.f32.gmra.mrb[2].mxu0 %v2801_v16 }
 0x294   : > { %8094 = vmatprep.mubr.f32.mxu0 %v2802_v52 }
 0x297   : > { %8095 = vmatmul.mubr.f32.gmra.mrb[4].mxu0 %v2803_v62 }
 0x298   : > { %8097 = vmatprep.mubr.f32.mxu0 %v2804_v21 }
 0x29b   : > { %8098 = vmatmul.mubr.f32.gmra.mrb[6].mxu0 %v2805_v61 }
 0x29c   : > { %8100 = vmatprep.mubr.f32.mxu0 %v2806_v43 }
 0x29f   : > { %8101 = vmatmul.mubr.f32.gmra.mrb[8].mxu0 %v2807_v6 }
 0x2a0   : > { %8103 = vmatprep.mubr.f32.mxu0 %v2808_v55 }
 0x2a3   : > { %8104 = vmatmul.mubr.f32.gmra.mrb[10].mxu0 %v2809_v28 }
 0x2a4   : > { %8106 = vmatprep.mubr.f32.mxu0 %v2810_v53 }
 0x2a7   : > { %8107 = vmatmul.mubr.f32.gmra.mrb[12].mxu0 %v2811_v32 }
 0x2a8   : > { %8109 = vmatprep.mubr.f32.mxu0 %v2812_v1 }
 0x2ab   : > { %8110 = vmatmul.mubr.f32.gmra.mrb[14].mxu0 %v2813_v54 }
 0x2ac   : > { %8112 = vmatprep.mubr.f32.mxu0 %v2814_v4 }
 0x2af   : > { %8113 = vmatmul.mubr.f32.gmra.mrb[16].mxu0 %v2815_v25 }
 0x2b0   : > { %8115 = vmatprep.mubr.f32.mxu0 %v2816_v11 }
 0x2b3   : > { %8116 = vmatmul.mubr.f32.gmra.mrb[18].mxu0 %v2817_v12 }
 0x2b4   : > { %8118 = vmatprep.mubr.f32.mxu0 %v2818_v30 }
 0x2b7   : > { %8119 = vmatmul.mubr.f32.gmra.mrb[20].mxu0 %v2819_v33 }
 0x2b8   : > { %8121 = vmatprep.mubr.f32.mxu0 %v2820_v35 }
 0x2bb   : > { %8122 = vmatmul.mubr.f32.gmra.mrb[22].mxu0 %v2821_v24 }
 0x2bc   : > { %8124 = vmatprep.mubr.f32.mxu0 %v2822_v47 }
 0x2bf   : > { %8125 = vmatmul.mubr.f32.gmra.mrb[24].mxu0 %v2823_v48 }
 0x2c0   : > { %8127 = vmatprep.mubr.f32.mxu0 %v2824_v56 }
 0x2c3   : > { %8128 = vmatmul.mubr.f32.gmra.mrb[26].mxu0 %v2825_v10 }
 0x2c4   : > { %8130 = vmatprep.mubr.f32.mxu0 %v10924_v26 }
 0x2c7   : > { %8131 = vmatmul.mubr.f32.gmra.mrb[28].mxu0 %v10928_v23 }
 0x2c8   : > { %8133 = vmatprep.mubr.f32.mxu0 %v2828_v13 }
 0x2cb   : > { %8134 = vmatmul.mubr.f32.gmra.mrb[30].mxu0 %v2829_v17 }
 0x362   : > { %v8090_v22 = vpop.f32.mrb[0].mxu0 }
 0x363   : > { %v2913_v9 = vpop.f32.mrb[1].mxu0  ;;  %v10960_v46 = vadd.f32 %v8090_v22, %v10957_v15 }
 0x364   : > { %v10963_v49 = vadd.f32 %v10957_v15, %v2913_v9 }
 0x366   : > { %v8093_v26 = vpop.f32.mrb[2].mxu0  ;;  %v3143_v23 = vadd.f32 %v10960_v46, %v10963_v49 }
 0x367   : > { %v2923_v14 = vpop.f32.mrb[3].mxu0  ;;  %v10971_v41 = vadd.f32 %v8093_v26, %v10957_v15 }
 0x368   : > { %v10968_v29 = vadd.f32 %v10957_v15, %v2923_v14 }
 0x36a   : > { %v3144_v58 = vadd.f32 %v3143_v23, %v10968_v29  ;;  %v8096_v34 = vpop.f32.mrb[4].mxu0 }
 0x36b   : > { %v2933_v44 = vpop.f32.mrb[5].mxu0  ;;  %v10979_v59 = vadd.f32 %v8096_v34, %v10957_v15 }
 0x36c   : > { %v10975_v51 = vadd.f32 %v10957_v15, %v2933_v44  ;;  %v3145_v57 = vadd.f32 %v3144_v58, %v10971_v41 }
 0x36e   : > { %v3146_v3 = vadd.f32 %v3145_v57, %v10975_v51  ;;  %v8099_v20 = vpop.f32.mrb[6].mxu0 }
 0x36f   : > { %v2943_v31 = vpop.f32.mrb[7].mxu0  ;;  %v10987_v52 = vadd.f32 %v8099_v20, %v10957_v15 }
 0x370   : > { %v10983_v40 = vadd.f32 %v10957_v15, %v2943_v31  ;;  %v3147_v16 = vadd.f32 %v3146_v3, %v10979_v59 }
 0x372   : > { %v3148_v62 = vadd.f32 %v3147_v16, %v10983_v40  ;;  %v8102_v21 = vpop.f32.mrb[8].mxu0 }
 0x373   : > { %v2953_v61 = vpop.f32.mrb[9].mxu0  ;;  %v10995_v55 = vadd.f32 %v8102_v21, %v10957_v15 }
 0x374   : > { %v10991_v43 = vadd.f32 %v10957_v15, %v2953_v61  ;;  %v3149_v6 = vadd.f32 %v3148_v62, %v10987_v52 }
 0x376   : > { %v3150_v28 = vadd.f32 %v3149_v6, %v10991_v43  ;;  %v8105_v53 = vpop.f32.mrb[10].mxu0  ;;  %v3539_v6 = vld [vmem:[#allocation8 + $0x80] sm:$0xff] }
 0x377   : > { %v2963_v32 = vpop.f32.mrb[11].mxu0  ;;  %v11003_v4 = vadd.f32 %v8105_v53, %v10957_v15 }
 0x378   : > { %v10999_v1 = vadd.f32 %v10957_v15, %v2963_v32  ;;  %v3151_v54 = vadd.f32 %v3150_v28, %v10995_v55  ;;  %v3540_v28 = vld [vmem:[#allocation8 + $0x88] sm:$0xff] }
 0x379   : > { %v9144_v53 = vpack.c.bf16 %v3540_v28, %v3539_v6 }
 0x37a   : > { %v3152_v25 = vadd.f32 %v3151_v54, %v10999_v1  ;;  %v8108_v11 = vpop.f32.mrb[12].mxu0 }
 0x37b   : > { %v2973_v12 = vpop.f32.mrb[13].mxu0  ;;  %v11011_v35 = vadd.f32 %v8108_v11, %v10957_v15  ;;  %9145 = vmatprep.subr.bf16.mxu1 %v9144_v53 }
 0x37c   : > { %v11007_v30 = vadd.f32 %v10957_v15, %v2973_v12  ;;  %v3153_v33 = vadd.f32 %v3152_v25, %v11003_v4  ;;  %9147 = vmatpush3.bf16.msra.mxu1 %v9144_v53  ;;  %v3545_v53 = vld [vmem:[#allocation8 + $0xb0] sm:$0xff] }
 0x37e   : > { %v3154_v24 = vadd.f32 %v3153_v33, %v11007_v30  ;;  %v8111_v47 = vpop.f32.mrb[14].mxu0 }
 0x37f   : > { %v2983_v48 = vpop.f32.mrb[15].mxu0  ;;  %v11019_v13 = vadd.f32 %v8111_v47, %v10957_v15  ;;  %v3542_v47 = vld [vmem:[#allocation8 + $0x98] sm:$0xff] }
 0x380   : > { %v11015_v56 = vadd.f32 %v10957_v15, %v2983_v48  ;;  %v3155_v10 = vadd.f32 %v3154_v24, %v11011_v35  ;;  %v3541_v24 = vld [vmem:[#allocation8 + $0x90] sm:$0xff] }
 0x381   : > { %v9148_v48 = vpack.c.bf16 %v3542_v47, %v3541_v24 }
 0x382   : > { %v3156_v17 = vadd.f32 %v3155_v10, %v11015_v56  ;;  %v8114_v22 = vpop.f32.mrb[16].mxu0 }
 0x383   : > { %v2993_v9 = vpop.f32.mrb[17].mxu0  ;;  %v11027_v23 = vadd.f32 %v8114_v22, %v10957_v15  ;;  %9149 = vmatprep.subr.bf16.mxu1 %v9148_v48 }
 0x384   : > { %v11023_v26 = vadd.f32 %v10957_v15, %v2993_v9  ;;  %v3157_v14 = vadd.f32 %v3156_v17, %v11019_v13  ;;  %9151 = vmatpush3.bf16.msra.mxu1 %v9148_v48 }
 0x386   : > { %v3158_v58 = vadd.f32 %v3157_v14, %v11023_v26  ;;  %v8117_v34 = vpop.f32.mrb[18].mxu0 }
 0x387   : > { %v3003_v44 = vpop.f32.mrb[19].mxu0  ;;  %v11035_v20 = vadd.f32 %v8117_v34, %v10957_v15  ;;  %v3543_v34 = vld [vmem:[#allocation8 + $0xa0] sm:$0xff] }
 0x388   : > { %v11031_v57 = vadd.f32 %v10957_v15, %v3003_v44  ;;  %v3159_v3 = vadd.f32 %v3158_v58, %v11027_v23  ;;  %v3544_v44 = vld [vmem:[#allocation8 + $0xa8] sm:$0xff] }
 0x38a   : > { %v3160_v31 = vadd.f32 %v3159_v3, %v11031_v57  ;;  %v8120_v16 = vpop.f32.mrb[20].mxu0  ;;  %v9152_v3 = vpack.c.bf16 %v3544_v44, %v3543_v34 }
 0x38b   : > { %v3013_v62 = vpop.f32.mrb[21].mxu0  ;;  %v11043_v32 = vadd.f32 %v8120_v16, %v10957_v15 }
 0x38c   : > { %v11039_v21 = vadd.f32 %v10957_v15, %v3013_v62  ;;  %v3161_v61 = vadd.f32 %v3160_v31, %v11035_v20  ;;  %9153 = vmatprep.subr.bf16.mxu1 %v9152_v3 }
 0x38d   : > { %9155 = vmatpush3.bf16.msra.mxu1 %v9152_v3 }
 0x38e   : > { %v3162_v54 = vadd.f32 %v3161_v61, %v11039_v21  ;;  %v8123_v25 = vpop.f32.mrb[22].mxu0 }
 0x38f   : > { %v3023_v11 = vpop.f32.mrb[23].mxu0  ;;  %v11051_v10 = vadd.f32 %v8123_v25, %v10957_v15 }
 0x390   : > { %v11047_v12 = vadd.f32 %v10957_v15, %v3023_v11  ;;  %v3163_v33 = vadd.f32 %v3162_v54, %v11043_v32  ;;  %v3546_v54 = vld [vmem:[#allocation8 + $0xb8] sm:$0xff] }
 0x391   : > { %v9156_v25 = vpack.c.bf16 %v3546_v54, %v3545_v53  ;;  %v3550_v53 = vld [vmem:[#allocation8 + $0xd8] sm:$0xff] }
 0x392   : > { %v3164_v17 = vadd.f32 %v3163_v33, %v11047_v12  ;;  %v8126_v22 = vpop.f32.mrb[24].mxu0 }
 0x393   : > { %v3033_v9 = vpop.f32.mrb[25].mxu0  ;;  %v11059_v31 = vadd.f32 %v8126_v22, %v10957_v15  ;;  %9157 = vmatprep.subr.bf16.mxu1 %v9156_v25  ;;  %v3547_v22 = vld [vmem:[#allocation8 + $0xc0] sm:$0xff] }
 0x394   : > { %v11055_v14 = vadd.f32 %v10957_v15, %v3033_v9  ;;  %v3165_v58 = vadd.f32 %v3164_v17, %v11051_v10  ;;  %9159 = vmatpush3.bf16.msra.mxu1 %v9156_v25  ;;  %v3548_v9 = vld [vmem:[#allocation8 + $0xc8] sm:$0xff] }
 0x396   : > { %v3166_v16 = vadd.f32 %v3165_v58, %v11055_v14  ;;  %v8129_v62 = vpop.f32.mrb[26].mxu0  ;;  %v9160_v58 = vpack.c.bf16 %v3548_v9, %v3547_v22  ;;  %v3551_v22 = vld [vmem:[#allocation8 + $0xe0] sm:$0xff] }
 0x397   : > { %v3043_v61 = vpop.f32.mrb[27].mxu0  ;;  %v11067_v11 = vadd.f32 %v8129_v62, %v10957_v15 }
 0x398   : > { %v11063_v6 = vadd.f32 %v10957_v15, %v3043_v61  ;;  %v3167_v28 = vadd.f32 %v3166_v16, %v11059_v31  ;;  %9161 = vmatprep.subr.bf16.mxu1 %v9160_v58 }
 0x399   : > { %9163 = vmatpush3.bf16.msra.mxu1 %v9160_v58 }
 0x39a   : > { %v3168_v33 = vadd.f32 %v3167_v28, %v11063_v6  ;;  %v8132_v24 = vpop.f32.mrb[28].mxu0  ;;  %v3549_v28 = vld [vmem:[#allocation8 + $0xd0] sm:$0xff] }
 0x39b   : > { %v3053_v47 = vpop.f32.mrb[29].mxu0  ;;  %v3140_v34 = vadd.f32 %v8132_v24, %v10957_v15  ;;  %v9164_v54 = vpack.c.bf16 %v3550_v53, %v3549_v28  ;;  %v3552_v24 = vld [vmem:[#allocation8 + $0xe8] sm:$0xff] }
 0x39c   : > { %v11071_v48 = vadd.f32 %v10957_v15, %v3053_v47  ;;  %v3169_v17 = vadd.f32 %v3168_v33, %v11067_v11  ;;  %v9168_v9 = vpack.c.bf16 %v3552_v24, %v3551_v22 }
 0x39d   : > { %9165 = vmatprep.subr.bf16.mxu1 %v9164_v54 }
 0x39e   : > { %v3170_v44 = vadd.f32 %v3169_v17, %v11071_v48  ;;  %v8135_v3 = vpop.f32.mrb[30].mxu0  ;;  %9167 = vmatpush3.bf16.msra.mxu1 %v9164_v54 }
 0x39f   : > { %v3063_v16 = vpop.f32.mrb[31].mxu0  ;;  %v3142_v33 = vadd.f32 %v8135_v3, %v10957_v15  ;;  %9169 = vmatprep.subr.bf16.mxu1 %v9168_v9  ;;  %v3491_v3 = vld [vmem:[#allocation8 + $0x8] sm:$0xff] }
 0x3a0   : > { %v3141_v62 = vadd.f32 %v10957_v15, %v3063_v16  ;;  %v3171_v61 = vadd.f32 %v3170_v44, %v3140_v34  ;;  %v3554_v16 = vld [vmem:[#allocation8 + $0xf8] sm:$0xff]  ;;  %v3490_v15 = vld [vmem:[#allocation8] sm:$0xff] }
 0x3a1   : > { %v9172_v44 = vpack.c.bf16 %v3554_v16, %v3553_v45 }
 0x3a2   : > { %v3172_v25 = vadd.f32 %v3171_v61, %v3141_v62  ;;  %9171 = vmatpush3.bf16.msra.mxu1 %v9168_v9  ;;  %v11078_v61 = vpack.c.bf16 %v3491_v3, %v3490_v15 }
 0x3a3   : > { %9173 = vmatprep.subr.bf16.mxu1 %v9172_v44 }
 0x3a4   : > { %v3173_v47 = vadd.f32 %v3172_v25, %v3142_v33 }
 0x3a6   : > { %v3174_v17 = vrot.slane %v3173_v47, 4  ;;  %9175 = vmatpush3.bf16.msra.mxu1 %v9172_v44 }
 0x3a7   : > { %9177 = vmatprep.subr.bf16.mxu1 %v11078_v61 }
 0x3a8   : > { %v3175_v2 = vadd.f32 %v3174_v17, %v3173_v47 }
 0x3aa   : > { %v3176_v58 = vrot.slane %v3175_v2, 2 }
 0x3ac   : > { %v3177_v38 = vadd.f32 %v3176_v58, %v3175_v2 }
 0x3ae   : > { %v3178_v28 = vrot.slane %v3177_v38, 1 }
 0x3b0   : > { %v3179_v53 = vadd.f32 %v3178_v28, %v3177_v38 }
 0x3b2   : > { %v3181_v54 = vmul.f32 0.00390625, %v3179_v53 }
 0x3b4   : > { %v11082_v25 = vsub.f32 %v10991_v43, %v3181_v54  ;;  %v11085_v47 = vsub.f32 %v10995_v55, %v3181_v54  ;;  %v11088_v45 = vsub.f32 %v10999_v1, %v3181_v54  ;;  %v11091_v2 = vsub.f32 %v11003_v4, %v3181_v54 }
 0x3b5   : > { %v11094_v22 = vsub.f32 %v11007_v30, %v3181_v54  ;;  %v11097_v38 = vsub.f32 %v11011_v35, %v3181_v54  ;;  %v11100_v24 = vsub.f32 %v11015_v56, %v3181_v54  ;;  %v11103_v43 = vsub.f32 %v11019_v13, %v3181_v54 }
 0x3b6   : > { %v11106_v55 = vsub.f32 %v11023_v26, %v3181_v54  ;;  %v11109_v1 = vsub.f32 %v11027_v23, %v3181_v54  ;;  %v11112_v4 = vsub.f32 %v11031_v57, %v3181_v54  ;;  %v11115_v30 = vsub.f32 %v11035_v20, %v3181_v54 }
 0x3b7   : > { %v11118_v35 = vsub.f32 %v11039_v21, %v3181_v54  ;;  %v11121_v56 = vsub.f32 %v11043_v32, %v3181_v54  ;;  %v11124_v13 = vsub.f32 %v11047_v12, %v3181_v54  ;;  %v11127_v26 = vsub.f32 %v11051_v10, %v3181_v54 }
 0x3b8   : > { %v11130_v23 = vsub.f32 %v11055_v14, %v3181_v54  ;;  %v11133_v57 = vsub.f32 %v11059_v31, %v3181_v54  ;;  %v11136_v20 = vsub.f32 %v11063_v6, %v3181_v54  ;;  %v11139_v21 = vsub.f32 %v11067_v11, %v3181_v54 }
 0x3b9   : > { %v11142_v32 = vsub.f32 %v11071_v48, %v3181_v54  ;;  %v11144_v12 = vsub.f32 %v3140_v34, %v3181_v54  ;;  %v11146_v9 = vsub.f32 %v3141_v62, %v3181_v54  ;;  %v11148_v10 = vsub.f32 %v3142_v33, %v3181_v54 }
 0x3ba   : > { %v11151_v14 = vsub.f32 %v10963_v49, %v3181_v54  ;;  %v11154_v31 = vsub.f32 %v10960_v46, %v3181_v54  ;;  %v11157_v6 = vsub.f32 %v10968_v29, %v3181_v54  ;;  %v11164_v34 = vsub.f32 %v10971_v41, %v3181_v54 }
 0x3bb   : > { %v11167_v62 = vsub.f32 %v10975_v51, %v3181_v54  ;;  %v11172_v33 = vsub.f32 %v10979_v59, %v3181_v54  ;;  %v11177_v16 = vsub.f32 %v10983_v40, %v3181_v54  ;;  %v11182_v51 = vsub.f32 %v10987_v52, %v3181_v54 }
 0x3bc   : > { %v3214_v11 = vmul.f32 %v11151_v14, %v11151_v14  ;;  %v3215_v48 = vmul.f32 %v11154_v31, %v11154_v31  ;;  %v3216_v49 = vmul.f32 %v11157_v6, %v11157_v6  ;;  %v3217_v29 = vmul.f32 %v11164_v34, %v11164_v34 }
 0x3bd   : > { %v3218_v41 = vmul.f32 %v11167_v62, %v11167_v62  ;;  %v3219_v58 = vmul.f32 %v11172_v33, %v11172_v33  ;;  %v3220_v59 = vmul.f32 %v11177_v16, %v11177_v16  ;;  %v3221_v3 = vmul.f32 %v11182_v51, %v11182_v51 }
 0x3be   : > { %v3246_v46 = vadd.f32 %v3215_v48, %v3214_v11  ;;  %v3222_v53 = vmul.f32 %v11082_v25, %v11082_v25  ;;  %v3223_v52 = vmul.f32 %v11085_v47, %v11085_v47  ;;  %v3224_v48 = vmul.f32 %v11088_v45, %v11088_v45 }
 0x3c0   : > { %v3247_v17 = vadd.f32 %v3246_v46, %v3216_v49  ;;  %v3225_v46 = vmul.f32 %v11091_v2, %v11091_v2 }
 0x3c2   : > { %v3248_v44 = vadd.f32 %v3247_v17, %v3217_v29  ;;  %v3226_v17 = vmul.f32 %v11094_v22, %v11094_v22 }
 0x3c4   : > { %v3249_v28 = vadd.f32 %v3248_v44, %v3218_v41  ;;  %v3227_v44 = vmul.f32 %v11097_v38, %v11097_v38 }
 0x3c6   : > { %v3250_v15 = vadd.f32 %v3249_v28, %v3219_v58  ;;  %v3228_v28 = vmul.f32 %v11100_v24, %v11100_v24 }
 0x3c8   : > { %v3251_v40 = vadd.f32 %v3250_v15, %v3220_v59  ;;  %v3229_v15 = vmul.f32 %v11103_v43, %v11103_v43 }
 0x3ca   : > { %v3252_v11 = vadd.f32 %v3251_v40, %v3221_v3  ;;  %v3230_v40 = vmul.f32 %v11106_v55, %v11106_v55 }
 0x3cc   : > { %v3253_v54 = vadd.f32 %v3252_v11, %v3222_v53  ;;  %v3231_v11 = vmul.f32 %v11109_v1, %v11109_v1 }
 0x3ce   : > { %v3254_v49 = vadd.f32 %v3253_v54, %v3223_v52  ;;  %v3232_v54 = vmul.f32 %v11112_v4, %v11112_v4 }
 0x3d0   : > { %v3255_v29 = vadd.f32 %v3254_v49, %v3224_v48  ;;  %v3233_v49 = vmul.f32 %v11115_v30, %v11115_v30 }
 0x3d2   : > { %v3256_v41 = vadd.f32 %v3255_v29, %v3225_v46  ;;  %v3234_v29 = vmul.f32 %v11118_v35, %v11118_v35 }
 0x3d4   : > { %v3257_v58 = vadd.f32 %v3256_v41, %v3226_v17  ;;  %v3235_v41 = vmul.f32 %v11121_v56, %v11121_v56 }
 0x3d6   : > { %v3258_v59 = vadd.f32 %v3257_v58, %v3227_v44  ;;  %v3236_v58 = vmul.f32 %v11124_v13, %v11124_v13 }
 0x3d8   : > { %v3259_v3 = vadd.f32 %v3258_v59, %v3228_v28  ;;  %v3237_v59 = vmul.f32 %v11127_v26, %v11127_v26 }
 0x3da   : > { %v3260_v53 = vadd.f32 %v3259_v3, %v3229_v15  ;;  %v3238_v3 = vmul.f32 %v11130_v23, %v11130_v23 }
 0x3dc   : > { %v3261_v52 = vadd.f32 %v3260_v53, %v3230_v40  ;;  %v3239_v53 = vmul.f32 %v11133_v57, %v11133_v57 }
 0x3de   : > { %v3262_v48 = vadd.f32 %v3261_v52, %v3231_v11  ;;  %v3240_v52 = vmul.f32 %v11136_v20, %v11136_v20 }
 0x3e0   : > { %v3263_v46 = vadd.f32 %v3262_v48, %v3232_v54  ;;  %v3241_v48 = vmul.f32 %v11139_v21, %v11139_v21 }
 0x3e2   : > { %v3264_v17 = vadd.f32 %v3263_v46, %v3233_v49  ;;  %v3242_v46 = vmul.f32 %v11142_v32, %v11142_v32 }
 0x3e4   : > { %v3265_v44 = vadd.f32 %v3264_v17, %v3234_v29  ;;  %v3243_v17 = vmul.f32 %v11144_v12, %v11144_v12 }
 0x3e6   : > { %v3266_v28 = vadd.f32 %v3265_v44, %v3235_v41  ;;  %v3244_v44 = vmul.f32 %v11146_v9, %v11146_v9 }
 0x3e8   : > { %v3267_v15 = vadd.f32 %v3266_v28, %v3236_v58  ;;  %v3245_v28 = vmul.f32 %v11148_v10, %v11148_v10 }
 0x3ea   : > { %v3268_v40 = vadd.f32 %v3267_v15, %v3237_v59 }
 0x3ec   : > { %v3269_v11 = vadd.f32 %v3268_v40, %v3238_v3 }
 0x3ee   : > { %v3270_v54 = vadd.f32 %v3269_v11, %v3239_v53 }
 0x3f0   : > { %v3271_v49 = vadd.f32 %v3270_v54, %v3240_v52 }
 0x3f2   : > { %v3272_v29 = vadd.f32 %v3271_v49, %v3241_v48 }
 0x3f4   : > { %v3273_v41 = vadd.f32 %v3272_v29, %v3242_v46  ;;  %v3493_v46 = vld [vmem:[#allocation8 + $0x18] sm:$0xff]  ;;  %v3494_v29 = vld [vmem:[#allocation8 + $0x20] sm:$0xff] }
 0x3f6   : > { %v3274_v58 = vadd.f32 %v3273_v41, %v3243_v17  ;;  %v11238_v17 = vpack.c.bf16 %v3493_v46, %v3492_v50  ;;  %v11240_v41 = vpack.c.bf16 %v3495_v39, %v3494_v29 }
 0x3f8   : > { %v3275_v59 = vadd.f32 %v3274_v58, %v3244_v44 }
 0x3fa   : > { %v3276_v15 = vadd.f32 %v3275_v59, %v3245_v28 }
 0x3fc   : > { %v3277_v3 = vrot.slane %v3276_v15, 4 }
 0x3fe   : > { %v3278_v40 = vadd.f32 %v3277_v3, %v3276_v15 }
 0x400   : > { %v3279_v53 = vrot.slane %v3278_v40, 2 }
 0x402   : > { %v3280_v11 = vadd.f32 %v3279_v53, %v3278_v40 }
 0x404   : > { %v3281_v52 = vrot.slane %v3280_v11, 1 }
 0x406   : > { %v3282_v54 = vadd.f32 %v3281_v52, %v3280_v11 }
 0x408   : > { %v3283_v48 = vmul.f32 0.00390625, %v3282_v54 }
 0x40a   : > { %v3284_v49 = vadd.f32 1e-05, %v3283_v48 }
 0x40c   : > { %10015 = vrsqrt.f32 %v3284_v49 }
 0x416   : > { %v10016_v37 = vpop.eup %10015 }
 0x417   : > { %v3316_v44 = vmul.f32 %v10016_v37, %v11146_v9  ;;  %v11244_v58 = vmul.f32 %v10016_v37, %v11151_v14  ;;  %v11247_v28 = vmul.f32 %v10016_v37, %v11154_v31  ;;  %v3288_v59 = vmul.f32 %v10016_v37, %v11157_v6 }
 0x418   : > { %v3289_v15 = vmul.f32 %v10016_v37, %v11164_v34  ;;  %v11252_v3 = vmul.f32 %v10016_v37, %v11167_v62  ;;  %v11255_v50 = vmul.f32 %v10016_v37, %v11172_v33  ;;  %v11258_v39 = vmul.f32 %v10016_v37, %v11177_v16 }
 0x419   : > { %v3348_v9 = vmax.f32 %v3316_v44, 0.0  ;;  %v11261_v14 = vmul.f32 %v10016_v37, %v11182_v51  ;;  %v11264_v31 = vmul.f32 %v10016_v37, %v11082_v25  ;;  %v11267_v6 = vmul.f32 %v10016_v37, %v11085_v47 }
 0x41a   : > { %v11270_v34 = vmul.f32 %v10016_v37, %v11088_v45  ;;  %v11273_v62 = vmul.f32 %v10016_v37, %v11091_v2  ;;  %v11276_v33 = vmul.f32 %v10016_v37, %v11094_v22  ;;  %v11279_v16 = vmul.f32 %v10016_v37, %v11097_v38 }
 0x41b   : > { %v11282_v51 = vmul.f32 %v10016_v37, %v11100_v24  ;;  %v11285_v25 = vmul.f32 %v10016_v37, %v11103_v43  ;;  %v11288_v47 = vmul.f32 %v10016_v37, %v11106_v55  ;;  %v11291_v45 = vmul.f32 %v10016_v37, %v11109_v1  ;;  %3380 = vst [vmem:[#allocation2 + $0x181] sm:$0xff] %v3348_v9 }
 0x41c   : > { %v11294_v2 = vmul.f32 %v10016_v37, %v11112_v4  ;;  %v11297_v22 = vmul.f32 %v10016_v37, %v11115_v30  ;;  %v11300_v38 = vmul.f32 %v10016_v37, %v11118_v35  ;;  %v11303_v24 = vmul.f32 %v10016_v37, %v11121_v56 }
 0x41d   : > { %v11306_v43 = vmul.f32 %v10016_v37, %v11124_v13  ;;  %v11309_v55 = vmul.f32 %v10016_v37, %v11127_v26  ;;  %v11312_v1 = vmul.f32 %v10016_v37, %v11130_v23  ;;  %v11315_v4 = vmul.f32 %v10016_v37, %v11133_v57 }
 0x41e   : > { %v11318_v30 = vmul.f32 %v10016_v37, %v11136_v20  ;;  %v11321_v35 = vmul.f32 %v10016_v37, %v11139_v21  ;;  %v3314_v56 = vmul.f32 %v10016_v37, %v11142_v32  ;;  %v3315_v13 = vmul.f32 %v10016_v37, %v11144_v12 }
 0x41f   : > { %v11326_v40 = vmul.f32 %v10016_v37, %v11148_v10  ;;  %v3318_v26 = vmax.f32 %v11244_v58, 0.0  ;;  %v3319_v23 = vmax.f32 %v11247_v28, 0.0  ;;  %v11330_v53 = vmax.f32 %v3288_v59, 0.0 }
 0x420   : > { %v11332_v57 = vmax.f32 %v3289_v15, 0.0  ;;  %v3322_v20 = vmax.f32 %v11252_v3, 0.0  ;;  %v3323_v21 = vmax.f32 %v11255_v50, 0.0  ;;  %v12276_v11 = vmax.f32 %v11258_v39, 0.0 }
 0x421   : > { %v12277_v32 = vmax.f32 %v11261_v14, 0.0  ;;  %v12284_v12 = vmax.f32 %v11264_v31, 0.0  ;;  %v12283_v37 = vmax.f32 %v11267_v6, 0.0  ;;  %v12278_v10 = vmax.f32 %v11270_v34, 0.0  ;;  %3350 = vst [vmem:[#allocation2 + $0x19] sm:$0xff] %v3318_v26  ;;  %3351 = vst [vmem:[#allocation2 + $0x21] sm:$0xff] %v3319_v23  ;;  %8168 = vmatprep.mubr.f32.mxu1 %v11330_v53 }
 0x422   : > { %3352 = vst [vmem:[#allocation2 + $0x31] sm:$0xff] %v11330_v53  ;;  %3382 = vst [vmem:[#allocation2 + $0x1] sm:$0xff] %v11330_v53  ;;  %v12279_v52 = vmax.f32 %v11273_v62, 0.0  ;;  %v12282_v54 = vmax.f32 %v11276_v33, 0.0  ;;  %v12281_v48 = vmax.f32 %v11279_v16, 0.0  ;;  %v12280_v49 = vmax.f32 %v11282_v51, 0.0  ;;  %8169 = vmatmul.mubr.f32.vlgmr.msra.gmra.mrb[0].mxu1 %v11332_v57 }
 0x423   : > { %3353 = vst [vmem:[#allocation2 + $0x39] sm:$0xff] %v11332_v57  ;;  %3354 = vst [vmem:[#allocation2 + $0x49] sm:$0xff] %v3322_v20  ;;  %v3333_v46 = vmax.f32 %v11285_v25, 0.0  ;;  %v3334_v29 = vmax.f32 %v11288_v47, 0.0  ;;  %v3335_v44 = vmax.f32 %v11291_v45, 0.0  ;;  %v3336_v58 = vmax.f32 %v11294_v2, 0.0  ;;  %8171 = vmatprep.mubr.f32.mxu1 %v3318_v26  ;;  %9179 = vmatpush3.bf16.msra.mxu1 %v11078_v61 }
 0x424   : > { %3355 = vst [vmem:[#allocation2 + $0x51] sm:$0xff] %v3323_v21  ;;  %3356 = vst [vmem:[#allocation2 + $0x61] sm:$0xff] %v12276_v11  ;;  %v3402_v59 = vld [vmem:[#allocation2 + $0x182] sm:$0x1]  ;;  %v3337_v15 = vmax.f32 %v11297_v22, 0.0  ;;  %v3338_v9 = vmax.f32 %v11300_v38, 0.0  ;;  %9181 = vmatprep.subr.bf16.mxu1 %v11238_v17 }
 0x425   : > { %3383 = vst [vmem:[#allocation2 + $0x9] sm:$0xff] %v11332_v57  ;;  %3357 = vst [vmem:[#allocation2 + $0x69] sm:$0xff] %v12277_v32  ;;  %v3339_v11 = vmax.f32 %v11303_v24, 0.0  ;;  %v3340_v32 = vmax.f32 %v11306_v43, 0.0  ;;  %v3341_v61 = vmax.f32 %v11309_v55, 0.0  ;;  %v3342_v26 = vmax.f32 %v11312_v1, 0.0 }
 0x426   : > { %3358 = vst [vmem:[#allocation2 + $0x79] sm:$0xff] %v12284_v12  ;;  %3359 = vst [vmem:[#allocation2 + $0x81] sm:$0xff] %v12283_v37  ;;  %v11400_v37 = vmax.f32 %v3315_v13, 0.0  ;;  %v3349_v12 = vmax.f32 %v11326_v40, 0.0  ;;  %8172 = vmatmul.mubr.f32.gmra.mrb[2].mxu1 %v3319_v23  ;;  %v3498_v40 = vld [vmem:[#allocation8 + $0x40] sm:$0xff]  ;;  %v3499_v23 = vld [vmem:[#allocation8 + $0x48] sm:$0xff] }
 0x427   : > { %3360 = vst [vmem:[#allocation2 + $0x91] sm:$0xff] %v12278_v10  ;;  %3361 = vst [vmem:[#allocation2 + $0x99] sm:$0xff] %v12279_v52  ;;  %v3343_v10 = vmax.f32 %v11315_v4, 0.0  ;;  %v12286_v52 = vmax.f32 %v11318_v30, 0.0  ;;  %8174 = vmatprep.mubr.f32.mxu1 %v11330_v53  ;;  %9183 = vmatpush3.bf16.msra.mxu1 %v11238_v17  ;;  %v12365_v50 = vmax.f32 %v11261_v14, 0.0  ;;  %v12368_v14 = vmax.f32 %v11270_v34, 0.0 }
 0x428   : > { %3362 = vst [vmem:[#allocation2 + $0xa9] sm:$0xff] %v12282_v54  ;;  %3363 = vst [vmem:[#allocation2 + $0xb1] sm:$0xff] %v12281_v48  ;;  %v12285_v48 = vmax.f32 %v11321_v35, 0.0  ;;  %v11398_v54 = vmax.f32 %v3314_v56, 0.0  ;;  %9185 = vmatprep.subr.bf16.mxu1 %v11240_v41  ;;  %v3387_v13 = vld [vmem:[#allocation2 + $0x1a] sm:$0x1] }
 0x429   : > { %3364 = vst [vmem:[#allocation2 + $0xc1] sm:$0xff] %v12280_v49  ;;  %3420 = vst [vmem:[#allocation2 + $0x180] sm:$0x1] %v3402_v59  ;;  %v3496_v59 = vld [vmem:[#allocation8 + $0x30] sm:$0xff]  ;;  %v3497_v49 = vld [vmem:[#allocation8 + $0x38] sm:$0xff]  ;;  %v12373_v47 = vmax.f32 %v11318_v30, 0.0 }
 0x42a   : > { %3365 = vst [vmem:[#allocation2 + $0xc9] sm:$0xff] %v3333_v46  ;;  %3366 = vst [vmem:[#allocation2 + $0xd9] sm:$0xff] %v3334_v29  ;;  %v9188_v28 = vpack.c.bf16 %v3497_v49, %v3496_v59  ;;  %v3386_v56 = vld [vmem:[#allocation2 + $0x2] sm:$0x1]  ;;  %v3388_v17 = vld [vmem:[#allocation2 + $0x32] sm:$0x1]  ;;  %8175 = vmatmul.mubr.f32.gmra.mrb[4].mxu1 %v11332_v57  ;;  %v9192_v49 = vpack.c.bf16 %v3499_v23, %v3498_v40 }
 0x42b   : > { %3367 = vst [vmem:[#allocation2 + $0xe1] sm:$0xff] %v3335_v44  ;;  %3368 = vst [vmem:[#allocation2 + $0xf1] sm:$0xff] %v3336_v58  ;;  %v3389_v53 = vld [vmem:[#allocation2 + $0x4a] sm:$0x1]  ;;  %8177 = vmatprep.mubr.f32.mxu1 %v3322_v20  ;;  %9187 = vmatpush3.bf16.msra.mxu1 %v11240_v41  ;;  %v12364_v41 = vmax.f32 %v11258_v39, 0.0  ;;  %v12374_v2 = vmax.f32 %v11321_v35, 0.0 }
 0x42c   : > { %3369 = vst [vmem:[#allocation2 + $0xf9] sm:$0xff] %v3337_v15  ;;  %3370 = vst [vmem:[#allocation2 + $0x109] sm:$0xff] %v3338_v9  ;;  %9189 = vmatprep.subr.bf16.mxu1 %v9188_v28  ;;  %v3426_v34 = vld [vmem:[#allocation2 + $0x6f] sm:$0x1]  ;;  %v4040_v22 = vld [vmem:[#allocation8 + $0x110] sm:$0xff] }
 0x42d   : > { %3371 = vst [vmem:[#allocation2 + $0x111] sm:$0xff] %v3339_v11  ;;  %3372 = vst [vmem:[#allocation2 + $0x121] sm:$0xff] %v3340_v32  ;;  %v4041_v38 = vld [vmem:[#allocation8 + $0x118] sm:$0xff]  ;;  %v4042_v1 = vld [vmem:[#allocation8 + $0x120] sm:$0xff] }
 0x42e   : > { %3373 = vst [vmem:[#allocation2 + $0x129] sm:$0xff] %v3341_v61  ;;  %3374 = vst [vmem:[#allocation2 + $0x139] sm:$0xff] %v3342_v26  ;;  %v3392_v59 = vld [vmem:[#allocation2 + $0x92] sm:$0x1]  ;;  %8178 = vmatmul.mubr.f32.gmra.mrb[6].mxu1 %v3323_v21  ;;  %v12366_v21 = vmax.f32 %v11264_v31, 0.0  ;;  %v9212_v43 = vpack.c.bf16 %v4041_v38, %v4040_v22  ;;  %v3459_v55 = vld [vmem:[#allocation2 + $0x8] sm:$0xff] }
 0x42f   : > { %3375 = vst [vmem:[#allocation2 + $0x141] sm:$0xff] %v3343_v10  ;;  %3376 = vst [vmem:[#allocation2 + $0x151] sm:$0xff] %v12286_v52  ;;  %v3501_v52 = vld [vmem:[#allocation8 + $0x58] sm:$0xff]  ;;  %8180 = vmatprep.mubr.f32.mxu1 %v12364_v41  ;;  %9191 = vmatpush3.bf16.msra.mxu1 %v9188_v28  ;;  %v3423_v31 = vld [vmem:[#allocation2 + $0x27] sm:$0x1] }
 0x430   : > { %3377 = vst [vmem:[#allocation2 + $0x159] sm:$0xff] %v12285_v48  ;;  %3378 = vst [vmem:[#allocation2 + $0x169] sm:$0xff] %v11398_v54  ;;  %v3390_v48 = vld [vmem:[#allocation2 + $0x62] sm:$0x1]  ;;  %9193 = vmatprep.subr.bf16.mxu1 %v9192_v49  ;;  %v4039_v41 = vld [vmem:[#allocation8 + $0x108] sm:$0xff] }
 0x431   : > { %3379 = vst [vmem:[#allocation2 + $0x171] sm:$0xff] %v11400_v37  ;;  %3381 = vst [vmem:[#allocation2 + $0x189] sm:$0xff] %v3349_v12  ;;  %v3391_v12 = vld [vmem:[#allocation2 + $0x7a] sm:$0x1]  ;;  %v3394_v57 = vld [vmem:[#allocation2 + $0xc2] sm:$0x1] }
 0x432   : > { %3384 = vst [vmem:[#allocation2 + $0x199] sm:$0xff] %v11398_v54  ;;  %3385 = vst [vmem:[#allocation2 + $0x1a1] sm:$0xff] %v11400_v37  ;;  %v3395_v3 = vld [vmem:[#allocation2 + $0xda] sm:$0x1]  ;;  %v3396_v20 = vld [vmem:[#allocation2 + $0xf2] sm:$0x1]  ;;  %8181 = vmatmul.mubr.f32.gmra.mrb[8].mxu1 %v12365_v50 }
 0x433   : > { %3404 = vst [vmem:[#allocation2] sm:$0x1] %v3386_v56  ;;  %3405 = vst [vmem:[#allocation2 + $0x18] sm:$0x1] %v3387_v13  ;;  %v3393_v56 = vld [vmem:[#allocation2 + $0xaa] sm:$0x1]  ;;  %8183 = vmatprep.mubr.f32.mxu1 %v12366_v21  ;;  %9195 = vmatpush3.bf16.msra.mxu1 %v9192_v49 }
 0x434   : > { %3406 = vst [vmem:[#allocation2 + $0x30] sm:$0x1] %v3388_v17  ;;  %3407 = vst [vmem:[#allocation2 + $0x48] sm:$0x1] %v3389_v53  ;;  %v3500_v13 = vld [vmem:[#allocation8 + $0x50] sm:$0xff]  ;;  %v3502_v17 = vld [vmem:[#allocation8 + $0x60] sm:$0xff] }
 0x435   : > { %3408 = vst [vmem:[#allocation2 + $0x60] sm:$0x1] %v3390_v48  ;;  %3409 = vst [vmem:[#allocation2 + $0x78] sm:$0x1] %v3391_v12  ;;  %v3397_v48 = vld [vmem:[#allocation2 + $0x10a] sm:$0x1]  ;;  %v9196_v40 = vpack.c.bf16 %v3501_v52, %v3500_v13 }
 0x436   : > { %3410 = vst [vmem:[#allocation2 + $0x90] sm:$0x1] %v3392_v59  ;;  %3411 = vst [vmem:[#allocation2 + $0xa8] sm:$0x1] %v3393_v56  ;;  %v3398_v23 = vld [vmem:[#allocation2 + $0x122] sm:$0x1] }
 0x437   : > { %3412 = vst [vmem:[#allocation2 + $0xc0] sm:$0x1] %v3394_v57  ;;  %3413 = vst [vmem:[#allocation2 + $0xd8] sm:$0x1] %v3395_v3  ;;  %v3503_v53 = vld [vmem:[#allocation8 + $0x68] sm:$0xff]  ;;  %9197 = vmatprep.subr.bf16.mxu1 %v9196_v40  ;;  %v3504_v52 = vld [vmem:[#allocation8 + $0x70] sm:$0xff] }
 0x438   : > { %3414 = vst [vmem:[#allocation2 + $0xf0] sm:$0x1] %v3396_v20  ;;  %3415 = vst [vmem:[#allocation2 + $0x108] sm:$0x1] %v3397_v48  ;;  %v3399_v12 = vld [vmem:[#allocation2 + $0x13a] sm:$0x1]  ;;  %v9200_v28 = vpack.c.bf16 %v3503_v53, %v3502_v17  ;;  %9199 = vmatpush3.bf16.msra.mxu1 %v9196_v40 }
 0x439   : > { %3416 = vst [vmem:[#allocation2 + $0x120] sm:$0x1] %v3398_v23  ;;  %3417 = vst [vmem:[#allocation2 + $0x138] sm:$0x1] %v3399_v12  ;;  %v3400_v39 = vld [vmem:[#allocation2 + $0x152] sm:$0x1] }
 0x43a   : > { %3418 = vst [vmem:[#allocation2 + $0x150] sm:$0x1] %v3400_v39  ;;  %v3401_v59 = vld [vmem:[#allocation2 + $0x16a] sm:$0x1]  ;;  %v12367_v13 = vmax.f32 %v11267_v6, 0.0  ;;  %9201 = vmatprep.subr.bf16.mxu1 %v9200_v28  ;;  %v4038_v20 = vld [vmem:[#allocation8 + $0x100] sm:$0xff] }
 0x43b   : > { %v3505_v56 = vld [vmem:[#allocation8 + $0x78] sm:$0xff]  ;;  %3419 = vst [vmem:[#allocation2 + $0x168] sm:$0x1] %v3401_v59  ;;  %3441 = vst [vmem:[#allocation2 + $0x29] sm:$0x1] %v3423_v31  ;;  %v12369_v48 = vmax.f32 %v11273_v62, 0.0  ;;  %v9208_v40 = vpack.c.bf16 %v4039_v41, %v4038_v20 }
 0x43c   : > { %8184 = vmatmul.mubr.f32.gmra.mrb[10].mxu1 %v12367_v13  ;;  %v3422_v57 = vld [vmem:[#allocation2 + $0xf] sm:$0x1]  ;;  %v9204_v49 = vpack.c.bf16 %v3505_v56, %v3504_v52  ;;  %v3424_v3 = vld [vmem:[#allocation2 + $0x3f] sm:$0x1]  ;;  %v3425_v23 = vld [vmem:[#allocation2 + $0x57] sm:$0x1] }
 0x43d   : > { %8186 = vmatprep.mubr.f32.mxu1 %v12368_v14  ;;  %3440 = vst [vmem:[#allocation2 + $0x11] sm:$0x1] %v3422_v57  ;;  %3442 = vst [vmem:[#allocation2 + $0x41] sm:$0x1] %v3424_v3  ;;  %v12370_v6 = vmax.f32 %v11276_v33, 0.0  ;;  %9203 = vmatpush3.bf16.msra.mxu1 %v9200_v28  ;;  %v12371_v12 = vmax.f32 %v11279_v16, 0.0 }
 0x43e   : > { %3443 = vst [vmem:[#allocation2 + $0x59] sm:$0x1] %v3425_v23  ;;  %9205 = vmatprep.subr.bf16.mxu1 %v9204_v49  ;;  %3444 = vst [vmem:[#allocation2 + $0x71] sm:$0x1] %v3426_v34  ;;  %v3427_v17 = vld [vmem:[#allocation2 + $0x87] sm:$0x1] }
 0x43f   : > { %v3428_v53 = vld [vmem:[#allocation2 + $0x9f] sm:$0x1]  ;;  %3445 = vst [vmem:[#allocation2 + $0x89] sm:$0x1] %v3427_v17  ;;  %v12372_v62 = vmax.f32 %v11282_v51, 0.0  ;;  %v3458_v24 = vld [vmem:[#allocation2] sm:$0xff] }
 0x440   : > { %8187 = vmatmul.mubr.f32.gmra.mrb[12].mxu1 %v12369_v48  ;;  %3446 = vst [vmem:[#allocation2 + $0xa1] sm:$0x1] %v3428_v53  ;;  %v3429_v50 = vld [vmem:[#allocation2 + $0xb7] sm:$0x1]  ;;  %v3430_v33 = vld [vmem:[#allocation2 + $0xcf] sm:$0x1] }
 0x441   : > { %8189 = vmatprep.mubr.f32.mxu1 %v12370_v6  ;;  %9207 = vmatpush3.bf16.msra.mxu1 %v9204_v49  ;;  %3447 = vst [vmem:[#allocation2 + $0xb9] sm:$0x1] %v3429_v50  ;;  %3448 = vst [vmem:[#allocation2 + $0xd1] sm:$0x1] %v3430_v33  ;;  %v3431_v21 = vld [vmem:[#allocation2 + $0xe7] sm:$0x1] }
 0x442   : > { %9209 = vmatprep.subr.bf16.mxu1 %v9208_v40  ;;  %3449 = vst [vmem:[#allocation2 + $0xe9] sm:$0x1] %v3431_v21  ;;  %v3432_v16 = vld [vmem:[#allocation2 + $0xff] sm:$0x1]  ;;  %v3433_v39 = vld [vmem:[#allocation2 + $0x117] sm:$0x1] }
 0x443   : > { %3450 = vst [vmem:[#allocation2 + $0x101] sm:$0x1] %v3432_v16  ;;  %v3434_v28 = vld [vmem:[#allocation2 + $0x12f] sm:$0x1]  ;;  %3451 = vst [vmem:[#allocation2 + $0x119] sm:$0x1] %v3433_v39 }
 0x444   : > { %8190 = vmatmul.mubr.f32.gmra.mrb[14].mxu1 %v12371_v12  ;;  %3452 = vst [vmem:[#allocation2 + $0x131] sm:$0x1] %v3434_v28  ;;  %v3435_v51 = vld [vmem:[#allocation2 + $0x147] sm:$0x1]  ;;  %v3436_v59 = vld [vmem:[#allocation2 + $0x15f] sm:$0x1] }
 0x445   : > { %8192 = vmatprep.mubr.f32.mxu1 %v12372_v62  ;;  %3453 = vst [vmem:[#allocation2 + $0x149] sm:$0x1] %v3435_v51  ;;  %3454 = vst [vmem:[#allocation2 + $0x161] sm:$0x1] %v3436_v59  ;;  %v3437_v25 = vld [vmem:[#allocation2 + $0x177] sm:$0x1] }
 0x446   : > { %3455 = vst [vmem:[#allocation2 + $0x179] sm:$0x1] %v3437_v25  ;;  %v3438_v45 = vld [vmem:[#allocation2 + $0x18f] sm:$0x1]  ;;  %v4043_v4 = vld [vmem:[#allocation8 + $0x128] sm:$0xff]  ;;  %v11500_v56 = vld [vmem:[#allocation2 + $0x60] sm:$0xff] }
 0x447   : > { %3456 = vst [vmem:[#allocation2 + $0x191] sm:$0x1] %v3438_v45  ;;  %v11482_v30 = vld [vmem:[#allocation2 + $0x18] sm:$0xff]  ;;  %v9216_v35 = vpack.c.bf16 %v4043_v4, %v4042_v1  ;;  %v4049_v52 = vld [vmem:[#allocation8 + $0x158] sm:$0xff]  ;;  %v3439_v13 = vld [vmem:[#allocation2 + $0x1a7] sm:$0x1] }
 0x448   : > { %8193 = vmatmul.mubr.f32.gmra.mrb[16].mxu1 %v3333_v46  ;;  %3457 = vst [vmem:[#allocation2 + $0x1a9] sm:$0x1] %v3439_v13  ;;  %v11503_v14 = vld [vmem:[#allocation2 + $0x68] sm:$0xff]  ;;  %v4050_v31 = vld [vmem:[#allocation8 + $0x160] sm:$0xff]  ;;  %v4051_v49 = vld [vmem:[#allocation8 + $0x168] sm:$0xff] }
 0x449   : > { %8195 = vmatprep.mubr.f32.mxu1 %v3334_v29  ;;  %v11491_v29 = vld [vmem:[#allocation2 + $0x38] sm:$0xff]  ;;  %v9232_v20 = vpack.c.bf16 %v4051_v49, %v4050_v31  ;;  %v11509_v41 = vld [vmem:[#allocation2 + $0x80] sm:$0xff]  ;;  %v4053_v23 = vld [vmem:[#allocation8 + $0x178] sm:$0xff] }
 0x44a   : > { %v11506_v3 = vld [vmem:[#allocation2 + $0x78] sm:$0xff]  ;;  %v4052_v48 = vld [vmem:[#allocation8 + $0x170] sm:$0xff]  ;;  %v11512_v6 = vld [vmem:[#allocation2 + $0x90] sm:$0xff] }
 0x44b   : > { %v9236_v34 = vpack.c.bf16 %v4053_v23, %v4052_v48  ;;  %v4344_v17 = vld [vmem:[#allocation8 + $0x180] sm:$0xff]  ;;  %v4345_v53 = vld [vmem:[#allocation8 + $0x188] sm:$0xff]  ;;  %v11518_v12 = vld [vmem:[#allocation2 + $0xa8] sm:$0xff] }
 0x44c   : > { %8196 = vmatmul.mubr.f32.gmra.mrb[18].mxu1 %v3335_v44  ;;  %v4046_v44 = vld [vmem:[#allocation8 + $0x140] sm:$0xff]  ;;  %v9240_v62 = vpack.c.bf16 %v4345_v53, %v4344_v17  ;;  %v11524_v33 = vld [vmem:[#allocation2 + $0xc0] sm:$0xff]  ;;  %v11527_v21 = vld [vmem:[#allocation2 + $0xc8] sm:$0xff] }
 0x44d   : > { %8198 = vmatprep.mubr.f32.mxu1 %v3336_v58  ;;  %v4047_v58 = vld [vmem:[#allocation8 + $0x148] sm:$0xff]  ;;  %v11521_v50 = vld [vmem:[#allocation2 + $0xb0] sm:$0xff]  ;;  %v11533_v39 = vld [vmem:[#allocation2 + $0xe0] sm:$0xff] }
 0x44e   : > { %v11530_v16 = vld [vmem:[#allocation2 + $0xd8] sm:$0xff]  ;;  %v11536_v28 = vld [vmem:[#allocation2 + $0xf0] sm:$0xff]  ;;  %v11542_v59 = vld [vmem:[#allocation2 + $0x108] sm:$0xff] }
 0x44f   : > { %v11539_v51 = vld [vmem:[#allocation2 + $0xf8] sm:$0xff]  ;;  %v11545_v25 = vld [vmem:[#allocation2 + $0x110] sm:$0xff]  ;;  %v11551_v45 = vld [vmem:[#allocation2 + $0x128] sm:$0xff] }
 0x450   : > { %8199 = vmatmul.mubr.f32.gmra.mrb[20].mxu1 %v3337_v15  ;;  %v11494_v15 = vld [vmem:[#allocation2 + $0x48] sm:$0xff]  ;;  %v11557_v22 = vld [vmem:[#allocation2 + $0x140] sm:$0xff]  ;;  %v11560_v38 = vld [vmem:[#allocation2 + $0x150] sm:$0xff] }
 0x451   : > { %8201 = vmatprep.mubr.f32.mxu1 %v3338_v9  ;;  %v9224_v9 = vpack.c.bf16 %v4047_v58, %v4046_v44  ;;  %v4346_v1 = vld [vmem:[#allocation8 + $0x190] sm:$0xff]  ;;  %v4347_v4 = vld [vmem:[#allocation8 + $0x198] sm:$0xff]  ;;  %v11578_v13 = vld [vmem:[#allocation2 + $0x32] sm:$0xff] }
 0x452   : > { %v11572_v44 = vld [vmem:[#allocation2 + $0x1a] sm:$0xff]  ;;  %v4352_v49 = vld [vmem:[#allocation8 + $0x1c0] sm:$0xff]  ;;  %v4355_v53 = vld [vmem:[#allocation8 + $0x1d8] sm:$0xff] }
 0x453   : > { %v11581_v31 = vld [vmem:[#allocation2 + $0x3a] sm:$0xff]  ;;  %v11584_v48 = vld [vmem:[#allocation2 + $0x4a] sm:$0xff]  ;;  %v11638_v36 = vld [vmem:[#allocation2 + $0x122] sm:$0xff] }
 0x454   : > { %8202 = vmatmul.mubr.f32.gmra.mrb[22].mxu1 %v3339_v11  ;;  %v3403_v11 = vld [vmem:[#allocation2 + $0x19a] sm:$0x1]  ;;  %v4354_v17 = vld [vmem:[#allocation8 + $0x1d0] sm:$0xff]  ;;  %v11641_v19 = vld [vmem:[#allocation2 + $0x12a] sm:$0xff] }
 0x455   : > { %8204 = vmatprep.mubr.f32.mxu1 %v3340_v32  ;;  %3421 = vst [vmem:[#allocation2 + $0x198] sm:$0x1] %v3403_v11  ;;  %v11485_v32 = vld [vmem:[#allocation2 + $0x20] sm:$0xff]  ;;  %v11650_v8 = vld [vmem:[#allocation2 + $0x152] sm:$0xff]  ;;  %v11656_v5 = vld [vmem:[#allocation2 + $0x16a] sm:$0xff] }
 0x456   : > { %v4005_v11 = vld [vmem:[#allocation2 + $0x2] sm:$0xff]  ;;  %v11644_v27 = vld [vmem:[#allocation2 + $0x13a] sm:$0xff]  ;;  %12377 = vst [vmem:[#allocation32_spill] sm:$0xff] %v11650_v8  ;;  %12379 = vst [vmem:[#allocation34_spill] sm:$0xff] %v11656_v5 }
 0x457   : > { %12375 = vst [vmem:[#allocation30_spill] sm:$0xff] %v11644_v27  ;;  %v11647_v18 = vld [vmem:[#allocation2 + $0x142] sm:$0xff]  ;;  %v11653_v7 = vld [vmem:[#allocation2 + $0x15a] sm:$0xff]  ;;  %v11659_v0 = vld [vmem:[#allocation2 + $0x172] sm:$0xff] }
 0x458   : > { %8205 = vmatmul.mubr.f32.gmra.mrb[24].mxu1 %v3341_v61  ;;  %v11497_v61 = vld [vmem:[#allocation2 + $0x50] sm:$0xff]  ;;  %12376 = vst [vmem:[#allocation31_spill] sm:$0xff] %v11647_v18  ;;  %12378 = vst [vmem:[#allocation33_spill] sm:$0xff] %v11653_v7 }
 0x459   : > { %8207 = vmatprep.mubr.f32.mxu1 %v3342_v26  ;;  %v4048_v26 = vld [vmem:[#allocation8 + $0x150] sm:$0xff]  ;;  %12380 = vst [vmem:[#allocation35_spill] sm:$0xff] %v11659_v0 }
 0x45a   : > { %v9228_v57 = vpack.c.bf16 %v4049_v52, %v4048_v26  ;;  %v4350_v26 = vld [vmem:[#allocation8 + $0x1b0] sm:$0xff]  ;;  %v4351_v52 = vld [vmem:[#allocation8 + $0x1b8] sm:$0xff] }
 0x45c   : > { %8208 = vmatmul.mubr.f32.gmra.mrb[26].mxu1 %v3343_v10  ;;  %v4044_v10 = vld [vmem:[#allocation8 + $0x130] sm:$0xff] }
 0x45d   : > { %8210 = vmatprep.mubr.f32.mxu1 %v12373_v47  ;;  %v11548_v47 = vld [vmem:[#allocation2 + $0x120] sm:$0xff] }
 0x460   : > { %8211 = vmatmul.mubr.f32.gmra.mrb[28].mxu1 %v12374_v2  ;;  %v11554_v2 = vld [vmem:[#allocation2 + $0x138] sm:$0xff] }
 0x461   : > { %8213 = vmatprep.mubr.f32.mxu1 %v11398_v54  ;;  %v11488_v54 = vld [vmem:[#allocation2 + $0x30] sm:$0xff] }
 0x464   : > { %8214 = vmatmul.mubr.f32.gmra.mrb[30].mxu1 %v11400_v37  ;;  %v4045_v37 = vld [vmem:[#allocation8 + $0x138] sm:$0xff] }
 0x465   : > { %8248 = vmatprep.mubr.f32.mxu1 %v3458_v24  ;;  %v9220_v46 = vpack.c.bf16 %v4045_v37, %v4044_v10  ;;  %v11563_v24 = vld [vmem:[#allocation2 + $0x158] sm:$0xff]  ;;  %v4006_v10 = vld [vmem:[#allocation2 + $0xa] sm:$0xff] }
 0x466   : > { %v4348_v37 = vld [vmem:[#allocation8 + $0x1a0] sm:$0xff] }
 0x468   : > { %8249 = vmatmul.mubr.f32.vlgmr.msra.gmra.mrb[0].mxu1 %v3459_v55  ;;  %v11569_v55 = vld [vmem:[#allocation2 + $0x170] sm:$0xff] }
 0x469   : > { %8251 = vmatprep.mubr.f32.mxu1 %v11482_v30  ;;  %9211 = vmatpush3.bf16.msra.mxu1 %v9208_v40  ;;  %v11515_v40 = vld [vmem:[#allocation2 + $0x98] sm:$0xff] }
 0x46a   : > { %9213 = vmatprep.subr.bf16.mxu1 %v9212_v43 }
 0x46c   : > { %8252 = vmatmul.mubr.f32.gmra.mrb[2].mxu1 %v11485_v32 }
 0x46d   : > { %8254 = vmatprep.mubr.f32.mxu1 %v11488_v54  ;;  %9215 = vmatpush3.bf16.msra.mxu1 %v9212_v43  ;;  %v11566_v43 = vld [vmem:[#allocation2 + $0x168] sm:$0xff] }
 0x46e   : > { %9217 = vmatprep.subr.bf16.mxu1 %v9216_v35 }
 0x470   : > { %8255 = vmatmul.mubr.f32.gmra.mrb[4].mxu1 %v11491_v29 }
 0x471   : > { %8257 = vmatprep.mubr.f32.mxu1 %v11494_v15  ;;  %9219 = vmatpush3.bf16.msra.mxu1 %v9216_v35  ;;  %v9244_v35 = vpack.c.bf16 %v4347_v4, %v4346_v1  ;;  %v9260_v1 = vpack.c.bf16 %v4355_v53, %v4354_v17  ;;  %v11593_v4 = vld [vmem:[#allocation2 + $0x6a] sm:$0xff]  ;;  %v4651_v17 = vld [vmem:[#allocation8 + $0x208] sm:$0xff] }
 0x472   : > { %9221 = vmatprep.subr.bf16.mxu1 %v9220_v46 }
 0x474   : > { %8258 = vmatmul.mubr.f32.gmra.mrb[6].mxu1 %v11497_v61 }
 0x475   : > { %8260 = vmatprep.mubr.f32.mxu1 %v11500_v56  ;;  %9223 = vmatpush3.bf16.msra.mxu1 %v9220_v46  ;;  %v4349_v46 = vld [vmem:[#allocation8 + $0x1a8] sm:$0xff] }
 0x476   : > { %9225 = vmatprep.subr.bf16.mxu1 %v9224_v9  ;;  %v9248_v58 = vpack.c.bf16 %v4349_v46, %v4348_v37  ;;  %v11599_v46 = vld [vmem:[#allocation2 + $0x82] sm:$0xff] }
 0x478   : > { %8261 = vmatmul.mubr.f32.gmra.mrb[8].mxu1 %v11503_v14 }
 0x479   : > { %8263 = vmatprep.mubr.f32.mxu1 %v11506_v3  ;;  %9227 = vmatpush3.bf16.msra.mxu1 %v9224_v9  ;;  %v11575_v9 = vld [vmem:[#allocation2 + $0x22] sm:$0xff] }
 0x47a   : > { %9229 = vmatprep.subr.bf16.mxu1 %v9228_v57 }
 0x47c   : > { %8264 = vmatmul.mubr.f32.gmra.mrb[10].mxu1 %v11509_v41 }
 0x47d   : > { %8266 = vmatprep.mubr.f32.mxu1 %v11512_v6  ;;  %9231 = vmatpush3.bf16.msra.mxu1 %v9228_v57  ;;  %v9252_v57 = vpack.c.bf16 %v4351_v52, %v4350_v26  ;;  %v4359_v26 = vld [vmem:[#allocation8 + $0x1f8] sm:$0xff]  ;;  %v11602_v52 = vld [vmem:[#allocation2 + $0x92] sm:$0xff] }
 0x47e   : > { %9233 = vmatprep.subr.bf16.mxu1 %v9232_v20 }
 0x480   : > { %8267 = vmatmul.mubr.f32.gmra.mrb[12].mxu1 %v11515_v40 }
 0x481   : > { %8269 = vmatprep.mubr.f32.mxu1 %v11518_v12  ;;  %9235 = vmatpush3.bf16.msra.mxu1 %v9232_v20  ;;  %v4353_v20 = vld [vmem:[#allocation8 + $0x1c8] sm:$0xff] }
 0x482   : > { %9237 = vmatprep.subr.bf16.mxu1 %v9236_v34  ;;  %v9256_v23 = vpack.c.bf16 %v4353_v20, %v4352_v49  ;;  %v11605_v49 = vld [vmem:[#allocation2 + $0x9a] sm:$0xff]  ;;  %v4650_v20 = vld [vmem:[#allocation8 + $0x200] sm:$0xff] }
 0x483   : > { %v9272_v53 = vpack.c.bf16 %v4651_v17, %v4650_v20  ;;  %v11629_v20 = vld [vmem:[#allocation2 + $0xfa] sm:$0xff]  ;;  %v11635_v17 = vld [vmem:[#allocation2 + $0x112] sm:$0xff] }
 0x484   : > { %8270 = vmatmul.mubr.f32.gmra.mrb[14].mxu1 %v11521_v50 }
 0x485   : > { %8272 = vmatprep.mubr.f32.mxu1 %v11524_v33  ;;  %9239 = vmatpush3.bf16.msra.mxu1 %v9236_v34  ;;  %v11587_v34 = vld [vmem:[#allocation2 + $0x52] sm:$0xff] }
 0x486   : > { %9241 = vmatprep.subr.bf16.mxu1 %v9240_v62 }
 0x488   : > { %8273 = vmatmul.mubr.f32.gmra.mrb[16].mxu1 %v11527_v21 }
 0x489   : > { %8275 = vmatprep.mubr.f32.mxu1 %v11530_v16 }
 0x48c   : > { %8276 = vmatmul.mubr.f32.gmra.mrb[18].mxu1 %v11533_v39 }
 0x48d   : > { %8278 = vmatprep.mubr.f32.mxu1 %v11536_v28 }
 0x490   : > { %8279 = vmatmul.mubr.f32.gmra.mrb[20].mxu1 %v11539_v51 }
 0x491   : > { %8281 = vmatprep.mubr.f32.mxu1 %v11542_v59 }
 0x494   : > { %8282 = vmatmul.mubr.f32.gmra.mrb[22].mxu1 %v11545_v25 }
 0x495   : > { %8284 = vmatprep.mubr.f32.mxu1 %v11548_v47 }
 0x498   : > { %8285 = vmatmul.mubr.f32.gmra.mrb[24].mxu1 %v11551_v45 }
 0x499   : > { %8287 = vmatprep.mubr.f32.mxu1 %v11554_v2 }
 0x49c   : > { %8288 = vmatmul.mubr.f32.gmra.mrb[26].mxu1 %v11557_v22 }
 0x49d   : > { %8290 = vmatprep.mubr.f32.mxu1 %v11560_v38 }
 0x4a0   : > { %8291 = vmatmul.mubr.f32.gmra.mrb[28].mxu1 %v11563_v24 }
 0x4a1   : > { %8293 = vmatprep.mubr.f32.mxu1 %v11566_v43 }
 0x4a4   : > { %8294 = vmatmul.mubr.f32.gmra.mrb[30].mxu1 %v11569_v55 }
 0x4a5   : > { %8328 = vmatprep.mubr.f32.mxu1 %v4005_v11  ;;  %v4356_v11 = vld [vmem:[#allocation8 + $0x1e0] sm:$0xff] }
 0x4a8   : > { %8329 = vmatmul.mubr.f32.vlgmr.msra.gmra.mrb[0].mxu1 %v4006_v10  ;;  %v11596_v10 = vld [vmem:[#allocation2 + $0x7a] sm:$0xff] }
 0x4a9   : > { %8331 = vmatprep.mubr.f32.mxu1 %v11572_v44  ;;  %9243 = vmatpush3.bf16.msra.mxu1 %v9240_v62  ;;  %v11590_v62 = vld [vmem:[#allocation2 + $0x62] sm:$0xff] }
 0x4aa   : > { %9245 = vmatprep.subr.bf16.mxu1 %v9244_v35 }
 0x4ac   : > { %8332 = vmatmul.mubr.f32.gmra.mrb[2].mxu1 %v11575_v9 }
 0x4ad   : > { %8334 = vmatprep.mubr.f32.mxu1 %v11578_v13  ;;  %9247 = vmatpush3.bf16.msra.mxu1 %v9244_v35  ;;  %v4357_v35 = vld [vmem:[#allocation8 + $0x1e8] sm:$0xff] }
 0x4ae   : > { %9249 = vmatprep.subr.bf16.mxu1 %v9248_v58  ;;  %v9264_v37 = vpack.c.bf16 %v4357_v35, %v4356_v11  ;;  %v11611_v11 = vld [vmem:[#allocation2 + $0xb2] sm:$0xff]  ;;  %v11617_v35 = vld [vmem:[#allocation2 + $0xca] sm:$0xff] }
 0x4b0   : > { %8335 = vmatmul.mubr.f32.gmra.mrb[4].mxu1 %v11581_v31 }
 0x4b1   : > { %8337 = vmatprep.mubr.f32.mxu1 %v11584_v48  ;;  %9251 = vmatpush3.bf16.msra.mxu1 %v9248_v58  ;;  %v4358_v58 = vld [vmem:[#allocation8 + $0x1f0] sm:$0xff] }
 0x4b2   : > { %9253 = vmatprep.subr.bf16.mxu1 %v9252_v57 }
 0x4b4   : > { %8338 = vmatmul.mubr.f32.gmra.mrb[6].mxu1 %v11587_v34 }
 0x4b5   : > { %8340 = vmatprep.mubr.f32.mxu1 %v11590_v62  ;;  %9255 = vmatpush3.bf16.msra.mxu1 %v9252_v57  ;;  %v9268_v57 = vpack.c.bf16 %v4359_v26, %v4358_v58  ;;  %v11620_v58 = vld [vmem:[#allocation2 + $0xda] sm:$0xff]  ;;  %v11626_v26 = vld [vmem:[#allocation2 + $0xf2] sm:$0xff] }
 0x4b6   : > { %9257 = vmatprep.subr.bf16.mxu1 %v9256_v23 }
 0x4b8   : > { %8341 = vmatmul.mubr.f32.gmra.mrb[8].mxu1 %v11593_v4 }
 0x4b9   : > { %8343 = vmatprep.mubr.f32.mxu1 %v11596_v10  ;;  %9259 = vmatpush3.bf16.msra.mxu1 %v9256_v23  ;;  %v11608_v23 = vld [vmem:[#allocation2 + $0xaa] sm:$0xff] }
 0x4ba   : > { %9261 = vmatprep.subr.bf16.mxu1 %v9260_v1 }
 0x4bc   : > { %8344 = vmatmul.mubr.f32.gmra.mrb[10].mxu1 %v11599_v46 }
 0x4bd   : > { %8346 = vmatprep.mubr.f32.mxu1 %v11602_v52  ;;  %9263 = vmatpush3.bf16.msra.mxu1 %v9260_v1  ;;  %v11614_v1 = vld [vmem:[#allocation2 + $0xc2] sm:$0xff] }
 0x4be   : > { %9265 = vmatprep.subr.bf16.mxu1 %v9264_v37 }
 0x4c0   : > { %8347 = vmatmul.mubr.f32.gmra.mrb[12].mxu1 %v11605_v49 }
 0x4c1   : > { %8349 = vmatprep.mubr.f32.mxu1 %v11608_v23  ;;  %9267 = vmatpush3.bf16.msra.mxu1 %v9264_v37  ;;  %v11623_v37 = vld [vmem:[#allocation2 + $0xe2] sm:$0xff] }
 0x4c2   : > { %9269 = vmatprep.subr.bf16.mxu1 %v9268_v57 }
 0x4c4   : > { %8350 = vmatmul.mubr.f32.gmra.mrb[14].mxu1 %v11611_v11 }
 0x4c5   : > { %8352 = vmatprep.mubr.f32.mxu1 %v11614_v1  ;;  %9271 = vmatpush3.bf16.msra.mxu1 %v9268_v57  ;;  %v11632_v57 = vld [vmem:[#allocation2 + $0x10a] sm:$0xff] }
 0x4c6   : > { %9273 = vmatprep.subr.bf16.mxu1 %v9272_v53 }
 0x4c8   : > { %8353 = vmatmul.mubr.f32.gmra.mrb[16].mxu1 %v11617_v35 }
 0x4c9   : > { %8355 = vmatprep.mubr.f32.mxu1 %v11620_v58 }
 0x4cc   : > { %8356 = vmatmul.mubr.f32.gmra.mrb[18].mxu1 %v11623_v37 }
 0x4cd   : > { %8358 = vmatprep.mubr.f32.mxu1 %v11626_v26 }
 0x4d0   : > { %8359 = vmatmul.mubr.f32.gmra.mrb[20].mxu1 %v11629_v20 }
 0x4d1   : > { %8361 = vmatprep.mubr.f32.mxu1 %v11632_v57 }
 0x4d4   : > { %8362 = vmatmul.mubr.f32.gmra.mrb[22].mxu1 %v11635_v17 }
 0x4d5   : > { %8364 = vmatprep.mubr.f32.mxu1 %v11638_v36 }
 0x4d8   : > { %8365 = vmatmul.mubr.f32.gmra.mrb[24].mxu1 %v11641_v19 }
 0x4d9   : > { %8367 = vmatprep.mubr.f32.mxu1 %v11644_v27  ;;  %v4655_v27 = vld [vmem:[#allocation8 + $0x228] sm:$0xff] }
 0x4dc   : > { %8368 = vmatmul.mubr.f32.gmra.mrb[26].mxu1 %v11647_v18  ;;  %v4654_v18 = vld [vmem:[#allocation8 + $0x220] sm:$0xff] }
 0x4dd   : > { %8370 = vmatprep.mubr.f32.mxu1 %v11650_v8  ;;  %v4656_v8 = vld [vmem:[#allocation8 + $0x230] sm:$0xff] }
 0x4e0   : > { %8371 = vmatmul.mubr.f32.gmra.mrb[28].mxu1 %v11653_v7  ;;  %v9280_v7 = vpack.c.bf16 %v4655_v27, %v4654_v18  ;;  %v4661_v18 = vld [vmem:[#allocation8 + $0x258] sm:$0xff] }
 0x4e1   : > { %8373 = vmatprep.mubr.f32.mxu1 %v11656_v5  ;;  %v4657_v5 = vld [vmem:[#allocation8 + $0x238] sm:$0xff] }
 0x4e4   : > { %8374 = vmatmul.mubr.f32.gmra.mrb[30].mxu1 %v11659_v0  ;;  %v9284_v0 = vpack.c.bf16 %v4657_v5, %v4656_v8  ;;  %v4663_v5 = vld [vmem:[#allocation8 + $0x268] sm:$0xff]  ;;  %v4664_v8 = vld [vmem:[#allocation8 + $0x270] sm:$0xff] }
 0x4e5   : > { %8408 = vmatprep.mubr.f32.mxu1 %v11482_v30  ;;  %v4658_v30 = vld [vmem:[#allocation8 + $0x240] sm:$0xff] }
 0x4e6   : > { %v9288_v63 = vpack.c.bf16 %v4659_v42, %v4658_v30  ;;  %v11719_v42 = vld [vmem:[#allocation2 + $0x81] sm:$0xff] }
 0x4e8   : > { %8409 = vmatmul.mubr.f32.vlgmr.msra.gmra.mrb[0].mxu1 %v11485_v32  ;;  %v4660_v32 = vld [vmem:[#allocation8 + $0x250] sm:$0xff] }
 0x4e9   : > { %8411 = vmatprep.mubr.f32.mxu1 %v11488_v54  ;;  %9275 = vmatpush3.bf16.msra.mxu1 %v9272_v53  ;;  %v9292_v27 = vpack.c.bf16 %v4661_v18, %v4660_v32  ;;  %v4665_v54 = vld [vmem:[#allocation8 + $0x278] sm:$0xff]  ;;  %v11716_v53 = vld [vmem:[#allocation2 + $0x79] sm:$0xff]  ;;  %v11722_v18 = vld [vmem:[#allocation2 + $0x91] sm:$0xff] }
 0x4ea   : > { %9277 = vmatprep.subr.bf16.mxu1 %v9276_v60  ;;  %v4969_v32 = vld [vmem:[#allocation8 + $0x2e8] sm:$0xff] }
 0x4ec   : > { %8412 = vmatmul.mubr.f32.gmra.mrb[2].mxu1 %v11491_v29  ;;  %v4956_v29 = vld [vmem:[#allocation8 + $0x280] sm:$0xff] }
 0x4ed   : > { %8414 = vmatprep.mubr.f32.mxu1 %v11494_v15  ;;  %9279 = vmatpush3.bf16.msra.mxu1 %v9276_v60  ;;  %v4662_v60 = vld [vmem:[#allocation8 + $0x260] sm:$0xff]  ;;  %v4957_v15 = vld [vmem:[#allocation8 + $0x288] sm:$0xff] }
 0x4ee   : > { %9281 = vmatprep.subr.bf16.mxu1 %v9280_v7 }
 0x4f0   : > { %8415 = vmatmul.mubr.f32.gmra.mrb[4].mxu1 %v11497_v61  ;;  %v9304_v61 = vpack.c.bf16 %v4957_v15, %v4956_v29  ;;  %v5262_v29 = vld [vmem:[#allocation8 + $0x300] sm:$0xff]  ;;  %v5263_v15 = vld [vmem:[#allocation8 + $0x308] sm:$0xff] }
 0x4f1   : > { %8417 = vmatprep.mubr.f32.mxu1 %v11500_v56  ;;  %9283 = vmatpush3.bf16.msra.mxu1 %v9280_v7  ;;  %v9296_v7 = vpack.c.bf16 %v4663_v5, %v4662_v60  ;;  %v11692_v56 = vld [vmem:[#allocation2 + $0x180] sm:$0xff] }
 0x4f2   : > { %9285 = vmatprep.subr.bf16.mxu1 %v9284_v0  ;;  %v11725_v60 = vld [vmem:[#allocation2 + $0x99] sm:$0xff] }
 0x4f3   : > { %v4970_v5 = vld [vmem:[#allocation8 + $0x2f0] sm:$0xff] }
 0x4f4   : > { %8418 = vmatmul.mubr.f32.gmra.mrb[6].mxu1 %v11503_v14  ;;  %v11695_v14 = vld [vmem:[#allocation2 + $0x188] sm:$0xff] }
 0x4f5   : > { %8420 = vmatprep.mubr.f32.mxu1 %v11506_v3  ;;  %9287 = vmatpush3.bf16.msra.mxu1 %v9284_v0  ;;  %v9300_v0 = vpack.c.bf16 %v4665_v54, %v4664_v8  ;;  %v4958_v3 = vld [vmem:[#allocation8 + $0x290] sm:$0xff]  ;;  %v11728_v8 = vld [vmem:[#allocation2 + $0xa9] sm:$0xff] }
 0x4f6   : > { %9289 = vmatprep.subr.bf16.mxu1 %v9288_v63 }
 0x4f8   : > { %8421 = vmatmul.mubr.f32.gmra.mrb[8].mxu1 %v11509_v41  ;;  %v4959_v41 = vld [vmem:[#allocation8 + $0x298] sm:$0xff] }
 0x4f9   : > { %8423 = vmatprep.mubr.f32.mxu1 %v11512_v6  ;;  %9291 = vmatpush3.bf16.msra.mxu1 %v9288_v63  ;;  %v4617_v6 = vld [vmem:[#allocation2 + $0x19] sm:$0xff]  ;;  %v4968_v63 = vld [vmem:[#allocation8 + $0x2e0] sm:$0xff] }
 0x4fa   : > { %9293 = vmatprep.subr.bf16.mxu1 %v9292_v27 }
 0x4fc   : > { %8424 = vmatmul.mubr.f32.gmra.mrb[10].mxu1 %v11515_v40  ;;  %v9308_v40 = vpack.c.bf16 %v4959_v41, %v4958_v3  ;;  %v9336_v3 = vpack.c.bf16 %v5263_v15, %v5262_v29  ;;  %v11737_v41 = vld [vmem:[#allocation2 + $0xc9] sm:$0xff]  ;;  %v5268_v15 = vld [vmem:[#allocation8 + $0x330] sm:$0xff] }
 0x4fd   : > { %8426 = vmatprep.mubr.f32.mxu1 %v11518_v12  ;;  %9295 = vmatpush3.bf16.msra.mxu1 %v9292_v27  ;;  %v4618_v12 = vld [vmem:[#allocation2 + $0x21] sm:$0xff]  ;;  %v9328_v27 = vpack.c.bf16 %v4969_v32, %v4968_v63  ;;  %v11785_v63 = vld [vmem:[#allocation2 + $0x189] sm:$0xff] }
 0x4fe   : > { %9297 = vmatprep.subr.bf16.mxu1 %v9296_v7  ;;  %12382 = vst [vmem:[#allocation52_spill] sm:$0xff] %v11785_v63  ;;  %v5264_v32 = vld [vmem:[#allocation8 + $0x310] sm:$0xff] }
 0x500   : > { %8427 = vmatmul.mubr.f32.gmra.mrb[12].mxu1 %v11521_v50  ;;  %v4960_v50 = vld [vmem:[#allocation8 + $0x2a0] sm:$0xff] }
 0x501   : > { %8429 = vmatprep.mubr.f32.mxu1 %v11524_v33  ;;  %9299 = vmatpush3.bf16.msra.mxu1 %v9296_v7  ;;  %v4961_v33 = vld [vmem:[#allocation8 + $0x2a8] sm:$0xff]  ;;  %v4971_v7 = vld [vmem:[#allocation8 + $0x2f8] sm:$0xff] }
 0x502   : > { %9301 = vmatprep.subr.bf16.mxu1 %v9300_v0  ;;  %v9332_v54 = vpack.c.bf16 %v4971_v7, %v4970_v5  ;;  %v5266_v7 = vld [vmem:[#allocation8 + $0x320] sm:$0xff] }
 0x504   : > { %8430 = vmatmul.mubr.f32.gmra.mrb[14].mxu1 %v11527_v21  ;;  %v11698_v21 = vld [vmem:[#allocation2 + $0x31] sm:$0xff] }
 0x505   : > { %8432 = vmatprep.mubr.f32.mxu1 %v11530_v16  ;;  %9303 = vmatpush3.bf16.msra.mxu1 %v9300_v0  ;;  %v9312_v16 = vpack.c.bf16 %v4961_v33, %v4960_v50  ;;  %v11731_v0 = vld [vmem:[#allocation2 + $0xb1] sm:$0xff]  ;;  %v11749_v50 = vld [vmem:[#allocation2 + $0xf9] sm:$0xff]  ;;  %v11752_v33 = vld [vmem:[#allocation2 + $0x109] sm:$0xff] }
 0x506   : > { %9305 = vmatprep.subr.bf16.mxu1 %v9304_v61 }
 0x508   : > { %8433 = vmatmul.mubr.f32.gmra.mrb[16].mxu1 %v11533_v39  ;;  %v11701_v39 = vld [vmem:[#allocation2 + $0x39] sm:$0xff] }
 0x509   : > { %8435 = vmatprep.mubr.f32.mxu1 %v11536_v28  ;;  %v4962_v28 = vld [vmem:[#allocation8 + $0x2b0] sm:$0xff] }
 0x50c   : > { %8436 = vmatmul.mubr.f32.gmra.mrb[18].mxu1 %v11539_v51  ;;  %v4963_v51 = vld [vmem:[#allocation8 + $0x2b8] sm:$0xff] }
 0x50d   : > { %8438 = vmatprep.mubr.f32.mxu1 %v11542_v59  ;;  %v11704_v59 = vld [vmem:[#allocation2 + $0x49] sm:$0xff] }
 0x510   : > { %8439 = vmatmul.mubr.f32.gmra.mrb[20].mxu1 %v11545_v25  ;;  %v9316_v25 = vpack.c.bf16 %v4963_v51, %v4962_v28  ;;  %v11758_v28 = vld [vmem:[#allocation2 + $0x121] sm:$0xff]  ;;  %v11761_v51 = vld [vmem:[#allocation2 + $0x129] sm:$0xff] }
 0x511   : > { %8441 = vmatprep.mubr.f32.mxu1 %v11548_v47  ;;  %v11707_v47 = vld [vmem:[#allocation2 + $0x51] sm:$0xff] }
 0x514   : > { %8442 = vmatmul.mubr.f32.gmra.mrb[22].mxu1 %v11551_v45  ;;  %v4964_v45 = vld [vmem:[#allocation8 + $0x2c0] sm:$0xff] }
 0x515   : > { %8444 = vmatprep.mubr.f32.mxu1 %v11554_v2  ;;  %v4965_v2 = vld [vmem:[#allocation8 + $0x2c8] sm:$0xff] }
 0x518   : > { %8445 = vmatmul.mubr.f32.gmra.mrb[24].mxu1 %v11557_v22  ;;  %v11710_v22 = vld [vmem:[#allocation2 + $0x61] sm:$0xff] }
 0x519   : > { %8447 = vmatprep.mubr.f32.mxu1 %v11560_v38  ;;  %v9320_v38 = vpack.c.bf16 %v4965_v2, %v4964_v45  ;;  %v11767_v45 = vld [vmem:[#allocation2 + $0x141] sm:$0xff]  ;;  %v11770_v2 = vld [vmem:[#allocation2 + $0x151] sm:$0xff] }
 0x51c   : > { %8448 = vmatmul.mubr.f32.gmra.mrb[26].mxu1 %v11563_v24  ;;  %v11713_v24 = vld [vmem:[#allocation2 + $0x69] sm:$0xff] }
 0x51d   : > { %8450 = vmatprep.mubr.f32.mxu1 %v11566_v43  ;;  %v4966_v43 = vld [vmem:[#allocation8 + $0x2d0] sm:$0xff] }
 0x520   : > { %8451 = vmatmul.mubr.f32.gmra.mrb[28].mxu1 %v11569_v55  ;;  %v4967_v55 = vld [vmem:[#allocation8 + $0x2d8] sm:$0xff] }
 0x521   : > { %8453 = vmatprep.mubr.f32.mxu1 %v11692_v56  ;;  %v9324_v30 = vpack.c.bf16 %v4967_v55, %v4966_v43  ;;  %v11776_v43 = vld [vmem:[#allocation2 + $0x169] sm:$0xff]  ;;  %v11779_v55 = vld [vmem:[#allocation2 + $0x171] sm:$0xff] }
 0x524   : > { %8454 = vmatmul.mubr.f32.gmra.mrb[30].mxu1 %v11695_v14 }
 0x525   : > { %8488 = vmatprep.mubr.f32.mxu1 %v4617_v6  ;;  %v11740_v6 = vld [vmem:[#allocation2 + $0xd9] sm:$0xff] }
 0x528   : > { %8489 = vmatmul.mubr.f32.vlgmr.msra.gmra.mrb[0].mxu1 %v4618_v12  ;;  %v11746_v12 = vld [vmem:[#allocation2 + $0xf1] sm:$0xff] }
 0x529   : > { %8491 = vmatprep.mubr.f32.mxu1 %v11698_v21  ;;  %9307 = vmatpush3.bf16.msra.mxu1 %v9304_v61  ;;  %v11734_v61 = vld [vmem:[#allocation2 + $0xc1] sm:$0xff] }
 0x52a   : > { %9309 = vmatprep.subr.bf16.mxu1 %v9308_v40 }
 0x52c   : > { %8492 = vmatmul.mubr.f32.gmra.mrb[2].mxu1 %v11701_v39 }
 0x52d   : > { %8494 = vmatprep.mubr.f32.mxu1 %v11704_v59  ;;  %9311 = vmatpush3.bf16.msra.mxu1 %v9308_v40  ;;  %v11743_v40 = vld [vmem:[#allocation2 + $0xe1] sm:$0xff] }
 0x52e   : > { %9313 = vmatprep.subr.bf16.mxu1 %v9312_v16 }
 0x530   : > { %8495 = vmatmul.mubr.f32.gmra.mrb[4].mxu1 %v11707_v47 }
 0x531   : > { %8497 = vmatprep.mubr.f32.mxu1 %v11710_v22  ;;  %9315 = vmatpush3.bf16.msra.mxu1 %v9312_v16  ;;  %v11755_v16 = vld [vmem:[#allocation2 + $0x111] sm:$0xff] }
 0x532   : > { %9317 = vmatprep.subr.bf16.mxu1 %v9316_v25 }
 0x534   : > { %8498 = vmatmul.mubr.f32.gmra.mrb[6].mxu1 %v11713_v24 }
 0x535   : > { %8500 = vmatprep.mubr.f32.mxu1 %v11716_v53  ;;  %9319 = vmatpush3.bf16.msra.mxu1 %v9316_v25  ;;  %v11764_v25 = vld [vmem:[#allocation2 + $0x139] sm:$0xff] }
 0x536   : > { %9321 = vmatprep.subr.bf16.mxu1 %v9320_v38 }
 0x538   : > { %8501 = vmatmul.mubr.f32.gmra.mrb[8].mxu1 %v11719_v42 }
 0x539   : > { %8503 = vmatprep.mubr.f32.mxu1 %v11722_v18  ;;  %9323 = vmatpush3.bf16.msra.mxu1 %v9320_v38  ;;  %v11773_v38 = vld [vmem:[#allocation2 + $0x159] sm:$0xff] }
 0x53a   : > { %9325 = vmatprep.subr.bf16.mxu1 %v9324_v30 }
 0x53c   : > { %8504 = vmatmul.mubr.f32.gmra.mrb[10].mxu1 %v11725_v60 }
 0x53d   : > { %8506 = vmatprep.mubr.f32.mxu1 %v11728_v8  ;;  %9327 = vmatpush3.bf16.msra.mxu1 %v9324_v30  ;;  %v11782_v30 = vld [vmem:[#allocation2 + $0x181] sm:$0xff] }
 0x53e   : > { %9329 = vmatprep.subr.bf16.mxu1 %v9328_v27  ;;  %12381 = vst [vmem:[#allocation51_spill] sm:$0xff] %v11782_v30 }
 0x540   : > { %8507 = vmatmul.mubr.f32.gmra.mrb[12].mxu1 %v11731_v0 }
 0x541   : > { %8509 = vmatprep.mubr.f32.mxu1 %v11734_v61  ;;  %9331 = vmatpush3.bf16.msra.mxu1 %v9328_v27  ;;  %v5265_v27 = vld [vmem:[#allocation8 + $0x318] sm:$0xff] }
 0x542   : > { %9333 = vmatprep.subr.bf16.mxu1 %v9332_v54  ;;  %v9340_v5 = vpack.c.bf16 %v5265_v27, %v5264_v32  ;;  %v5271_v32 = vld [vmem:[#allocation8 + $0x348] sm:$0xff]  ;;  %v5277_v27 = vld [vmem:[#allocation8 + $0x378] sm:$0xff] }
 0x544   : > { %8510 = vmatmul.mubr.f32.gmra.mrb[14].mxu1 %v11737_v41 }
 0x545   : > { %8512 = vmatprep.mubr.f32.mxu1 %v11740_v6  ;;  %9335 = vmatpush3.bf16.msra.mxu1 %v9332_v54  ;;  %v5267_v54 = vld [vmem:[#allocation8 + $0x328] sm:$0xff] }
 0x546   : > { %9337 = vmatprep.subr.bf16.mxu1 %v9336_v3  ;;  %v9344_v29 = vpack.c.bf16 %v5267_v54, %v5266_v7  ;;  %v5231_v7 = vld [vmem:[#allocation2 + $0x48] sm:$0xff] }
 0x548   : > { %8513 = vmatmul.mubr.f32.gmra.mrb[16].mxu1 %v11743_v40 }
 0x549   : > { %8515 = vmatprep.mubr.f32.mxu1 %v11746_v12 }
 0x54c   : > { %8516 = vmatmul.mubr.f32.gmra.mrb[18].mxu1 %v11749_v50 }
 0x54d   : > { %8518 = vmatprep.mubr.f32.mxu1 %v11752_v33 }
 0x550   : > { %8519 = vmatmul.mubr.f32.gmra.mrb[20].mxu1 %v11755_v16 }
 0x551   : > { %8521 = vmatprep.mubr.f32.mxu1 %v11758_v28 }
 0x554   : > { %8522 = vmatmul.mubr.f32.gmra.mrb[22].mxu1 %v11761_v51 }
 0x555   : > { %8524 = vmatprep.mubr.f32.mxu1 %v11764_v25 }
 0x558   : > { %8525 = vmatmul.mubr.f32.gmra.mrb[24].mxu1 %v11767_v45 }
 0x559   : > { %8527 = vmatprep.mubr.f32.mxu1 %v11770_v2 }
 0x55c   : > { %8528 = vmatmul.mubr.f32.gmra.mrb[26].mxu1 %v11773_v38 }
 0x55d   : > { %8530 = vmatprep.mubr.f32.mxu1 %v11776_v43 }
 0x560   : > { %8531 = vmatmul.mubr.f32.gmra.mrb[28].mxu1 %v11779_v55 }
 0x561   : > { %8533 = vmatprep.mubr.f32.mxu1 %v11782_v30  ;;  %v5269_v30 = vld [vmem:[#allocation8 + $0x338] sm:$0xff] }
 0x564   : > { %8534 = vmatmul.mubr.f32.gmra.mrb[30].mxu1 %v11785_v63  ;;  %v9348_v63 = vpack.c.bf16 %v5269_v30, %v5268_v15  ;;  %v5275_v30 = vld [vmem:[#allocation8 + $0x368] sm:$0xff]  ;;  %v5574_v15 = vld [vmem:[#allocation8 + $0x3b0] sm:$0xff] }
 0x565   : > { %8568 = vmatprep.mubr.f32.mxu1 %v11572_v44  ;;  %v5270_v44 = vld [vmem:[#allocation8 + $0x340] sm:$0xff] }
 0x568   : > { %8569 = vmatmul.mubr.f32.vlgmr.msra.gmra.mrb[0].mxu1 %v11575_v9  ;;  %v9352_v9 = vpack.c.bf16 %v5271_v32, %v5270_v44  ;;  %v5575_v44 = vld [vmem:[#allocation8 + $0x3b8] sm:$0xff]  ;;  %v5233_v32 = vld [vmem:[#allocation2 + $0x60] sm:$0xff] }
 0x569   : > { %8571 = vmatprep.mubr.f32.mxu1 %v11578_v13  ;;  %9339 = vmatpush3.bf16.msra.mxu1 %v9336_v3  ;;  %v5272_v13 = vld [vmem:[#allocation8 + $0x350] sm:$0xff]  ;;  %v5273_v3 = vld [vmem:[#allocation8 + $0x358] sm:$0xff] }
 0x56a   : > { %9341 = vmatprep.subr.bf16.mxu1 %v9340_v5 }
 0x56c   : > { %8572 = vmatmul.mubr.f32.gmra.mrb[2].mxu1 %v11581_v31  ;;  %v9356_v31 = vpack.c.bf16 %v5273_v3, %v5272_v13  ;;  %v5234_v13 = vld [vmem:[#allocation2 + $0x68] sm:$0xff]  ;;  %v5576_v3 = vld [vmem:[#allocation8 + $0x3c0] sm:$0xff] }
 0x56d   : > { %8574 = vmatprep.mubr.f32.mxu1 %v11584_v48  ;;  %9343 = vmatpush3.bf16.msra.mxu1 %v9340_v5  ;;  %v5274_v48 = vld [vmem:[#allocation8 + $0x360] sm:$0xff]  ;;  %v5573_v5 = vld [vmem:[#allocation8 + $0x3a8] sm:$0xff] }
 0x56e   : > { %9345 = vmatprep.subr.bf16.mxu1 %v9344_v29 }
 0x570   : > { %8575 = vmatmul.mubr.f32.gmra.mrb[4].mxu1 %v11587_v34  ;;  %v9360_v34 = vpack.c.bf16 %v5275_v30, %v5274_v48  ;;  %v5235_v48 = vld [vmem:[#allocation2 + $0x78] sm:$0xff] }
 0x571   : > { %8577 = vmatprep.mubr.f32.mxu1 %v11590_v62  ;;  %9347 = vmatpush3.bf16.msra.mxu1 %v9344_v29  ;;  %v5276_v62 = vld [vmem:[#allocation8 + $0x370] sm:$0xff]  ;;  %v5232_v29 = vld [vmem:[#allocation2 + $0x50] sm:$0xff] }
 0x572   : > { %9349 = vmatprep.subr.bf16.mxu1 %v9348_v63 }
 0x574   : > { %8578 = vmatmul.mubr.f32.gmra.mrb[6].mxu1 %v11593_v4  ;;  %v9364_v4 = vpack.c.bf16 %v5277_v27, %v5276_v62  ;;  %v5578_v62 = vld [vmem:[#allocation8 + $0x3d0] sm:$0xff]  ;;  %v5579_v27 = vld [vmem:[#allocation8 + $0x3d8] sm:$0xff] }
 0x575   : > { %8580 = vmatprep.mubr.f32.mxu1 %v11596_v10  ;;  %9351 = vmatpush3.bf16.msra.mxu1 %v9348_v63  ;;  %v5568_v10 = vld [vmem:[#allocation8 + $0x380] sm:$0xff]  ;;  %v5569_v63 = vld [vmem:[#allocation8 + $0x388] sm:$0xff] }
 0x576   : > { %9353 = vmatprep.subr.bf16.mxu1 %v9352_v9 }
 0x578   : > { %8581 = vmatmul.mubr.f32.gmra.mrb[8].mxu1 %v11599_v46  ;;  %v9368_v46 = vpack.c.bf16 %v5569_v63, %v5568_v10  ;;  %v9388_v10 = vpack.c.bf16 %v5579_v27, %v5578_v62  ;;  %v5238_v63 = vld [vmem:[#allocation2 + $0x98] sm:$0xff]  ;;  %v5260_v27 = vld [vmem:[#allocation2 + $0x1a0] sm:$0xff] }
 0x579   : > { %8583 = vmatprep.mubr.f32.mxu1 %v11602_v52  ;;  %9355 = vmatpush3.bf16.msra.mxu1 %v9352_v9  ;;  %v12383_v52 = vld [vmem:[#allocation30_spill] sm:$0xff]  ;;  %v9380_v9 = vpack.c.bf16 %v5575_v44, %v5574_v15  ;;  %v5247_v15 = vld [vmem:[#allocation2 + $0x108] sm:$0xff]  ;;  %v5248_v44 = vld [vmem:[#allocation2 + $0x110] sm:$0xff] }
 0x57a   : > { %9357 = vmatprep.subr.bf16.mxu1 %v9356_v31  ;;  %v5259_v62 = vld [vmem:[#allocation2 + $0x198] sm:$0xff] }
 0x57c   : > { %8584 = vmatmul.mubr.f32.gmra.mrb[10].mxu1 %v11605_v49  ;;  %v12384_v49 = vld [vmem:[#allocation31_spill] sm:$0xff] }
 0x57d   : > { %8586 = vmatprep.mubr.f32.mxu1 %v11608_v23  ;;  %9359 = vmatpush3.bf16.msra.mxu1 %v9356_v31  ;;  %v12385_v23 = vld [vmem:[#allocation32_spill] sm:$0xff]  ;;  %v5577_v31 = vld [vmem:[#allocation8 + $0x3c8] sm:$0xff] }
 0x57e   : > { %9361 = vmatprep.subr.bf16.mxu1 %v9360_v34  ;;  %v9384_v30 = vpack.c.bf16 %v5577_v31, %v5576_v3  ;;  %v5252_v3 = vld [vmem:[#allocation2 + $0x140] sm:$0xff]  ;;  %v5253_v31 = vld [vmem:[#allocation2 + $0x150] sm:$0xff] }
 0x580   : > { %8587 = vmatmul.mubr.f32.gmra.mrb[12].mxu1 %v11611_v11  ;;  %v12386_v11 = vld [vmem:[#allocation33_spill] sm:$0xff] }
 0x581   : > { %8589 = vmatprep.mubr.f32.mxu1 %v11614_v1  ;;  %9363 = vmatpush3.bf16.msra.mxu1 %v9360_v34  ;;  %v12387_v1 = vld [vmem:[#allocation34_spill] sm:$0xff]  ;;  %v5236_v34 = vld [vmem:[#allocation2 + $0x80] sm:$0xff] }
 0x582   : > { %9365 = vmatprep.subr.bf16.mxu1 %v9364_v4 }
 0x584   : > { %8590 = vmatmul.mubr.f32.gmra.mrb[14].mxu1 %v11617_v35  ;;  %v12388_v35 = vld [vmem:[#allocation35_spill] sm:$0xff] }
 0x585   : > { %8592 = vmatprep.mubr.f32.mxu1 %v11620_v58  ;;  %9367 = vmatpush3.bf16.msra.mxu1 %v9364_v4  ;;  %v11818_v58 = vld [vmem:[#allocation2 + $0x182] sm:$0xff]  ;;  %v5237_v4 = vld [vmem:[#allocation2 + $0x90] sm:$0xff] }
 0x586   : > { %9369 = vmatprep.subr.bf16.mxu1 %v9368_v46 }
 0x588   : > { %8593 = vmatmul.mubr.f32.gmra.mrb[16].mxu1 %v11623_v37  ;;  %v11821_v37 = vld [vmem:[#allocation2 + $0x18a] sm:$0xff] }
 0x589   : > { %8595 = vmatprep.mubr.f32.mxu1 %v11626_v26  ;;  %v5229_v26 = vld [vmem:[#allocation2 + $0x30] sm:$0xff] }
 0x58c   : > { %8596 = vmatmul.mubr.f32.gmra.mrb[18].mxu1 %v11629_v20 }
 0x58d   : > { %8598 = vmatprep.mubr.f32.mxu1 %v11632_v57  ;;  %v5230_v57 = vld [vmem:[#allocation2 + $0x38] sm:$0xff] }
 0x590   : > { %8599 = vmatmul.mubr.f32.gmra.mrb[20].mxu1 %v11635_v17  ;;  %v5572_v17 = vld [vmem:[#allocation8 + $0x3a0] sm:$0xff] }
 0x591   : > { %8601 = vmatprep.mubr.f32.mxu1 %v11638_v36  ;;  %v5570_v36 = vld [vmem:[#allocation8 + $0x390] sm:$0xff]  ;;  %v9376_v54 = vpack.c.bf16 %v5573_v5, %v5572_v17  ;;  %v5243_v17 = vld [vmem:[#allocation2 + $0xd8] sm:$0xff] }
 0x594   : > { %8602 = vmatmul.mubr.f32.gmra.mrb[22].mxu1 %v11641_v19  ;;  %v5571_v19 = vld [vmem:[#allocation8 + $0x398] sm:$0xff] }
 0x595   : > { %8604 = vmatprep.mubr.f32.mxu1 %v12383_v52  ;;  %v9372_v20 = vpack.c.bf16 %v5571_v19, %v5570_v36  ;;  %v5581_v52 = vld [vmem:[#allocation8 + $0x3e8] sm:$0xff]  ;;  %v5241_v36 = vld [vmem:[#allocation2 + $0xc0] sm:$0xff] }
 0x598   : > { %8605 = vmatmul.mubr.f32.gmra.mrb[24].mxu1 %v12384_v49  ;;  %v5239_v49 = vld [vmem:[#allocation2 + $0xa8] sm:$0xff] }
 0x599   : > { %8607 = vmatprep.mubr.f32.mxu1 %v12385_v23 }
 0x59c   : > { %8608 = vmatmul.mubr.f32.gmra.mrb[26].mxu1 %v12386_v11  ;;  %v5240_v11 = vld [vmem:[#allocation2 + $0xb0] sm:$0xff] }
 0x59d   : > { %8610 = vmatprep.mubr.f32.mxu1 %v12387_v1  ;;  %v5582_v1 = vld [vmem:[#allocation8 + $0x3f0] sm:$0xff] }
 0x5a0   : > { %8611 = vmatmul.mubr.f32.gmra.mrb[28].mxu1 %v12388_v35  ;;  %v5583_v35 = vld [vmem:[#allocation8 + $0x3f8] sm:$0xff] }
 0x5a1   : > { %8613 = vmatprep.mubr.f32.mxu1 %v11818_v58  ;;  %v9396_v19 = vpack.c.bf16 %v5583_v35, %v5582_v1  ;;  %v5885_v1 = vld [vmem:[#allocation8 + $0x458] sm:$0xff]  ;;  %v5887_v35 = vld [vmem:[#allocation8 + $0x468] sm:$0xff] }
 0x5a4   : > { %8614 = vmatmul.mubr.f32.gmra.mrb[30].mxu1 %v11821_v37 }
 0x5a5   : > { %8648 = vmatprep.mubr.f32.mxu1 %v5229_v26  ;;  %v5242_v26 = vld [vmem:[#allocation2 + $0xc8] sm:$0xff] }
 0x5a8   : > { %8649 = vmatmul.mubr.f32.vlgmr.msra.gmra.mrb[0].mxu1 %v5230_v57  ;;  %v5875_v57 = vld [vmem:[#allocation8 + $0x408] sm:$0xff] }
 0x5a9   : > { %8651 = vmatprep.mubr.f32.mxu1 %v5231_v7  ;;  %9371 = vmatpush3.bf16.msra.mxu1 %v9368_v46  ;;  %v5580_v46 = vld [vmem:[#allocation8 + $0x3e0] sm:$0xff]  ;;  %v5244_v7 = vld [vmem:[#allocation2 + $0xe0] sm:$0xff] }
 0x5aa   : > { %9373 = vmatprep.subr.bf16.mxu1 %v9372_v20  ;;  %v9392_v23 = vpack.c.bf16 %v5581_v52, %v5580_v46  ;;  %v5878_v46 = vld [vmem:[#allocation8 + $0x420] sm:$0xff]  ;;  %v5879_v52 = vld [vmem:[#allocation8 + $0x428] sm:$0xff] }
 0x5ac   : > { %8652 = vmatmul.mubr.f32.gmra.mrb[2].mxu1 %v5232_v29  ;;  %v5246_v29 = vld [vmem:[#allocation2 + $0xf8] sm:$0xff] }
 0x5ad   : > { %8654 = vmatprep.mubr.f32.mxu1 %v5233_v32  ;;  %9375 = vmatpush3.bf16.msra.mxu1 %v9372_v20  ;;  %v5874_v20 = vld [vmem:[#allocation8 + $0x400] sm:$0xff]  ;;  %v5249_v32 = vld [vmem:[#allocation2 + $0x120] sm:$0xff] }
 0x5ae   : > { %9377 = vmatprep.subr.bf16.mxu1 %v9376_v54  ;;  %v9400_v5 = vpack.c.bf16 %v5875_v57, %v5874_v20  ;;  %v5859_v20 = vld [vmem:[#allocation2 + $0x10a] sm:$0xff]  ;;  %v5860_v57 = vld [vmem:[#allocation2 + $0x112] sm:$0xff] }
 0x5b0   : > { %8655 = vmatmul.mubr.f32.gmra.mrb[4].mxu1 %v5234_v13  ;;  %v5251_v13 = vld [vmem:[#allocation2 + $0x138] sm:$0xff] }
 0x5b1   : > { %8657 = vmatprep.mubr.f32.mxu1 %v5235_v48  ;;  %9379 = vmatpush3.bf16.msra.mxu1 %v9376_v54  ;;  %v5245_v54 = vld [vmem:[#allocation2 + $0xf0] sm:$0xff]  ;;  %v5254_v48 = vld [vmem:[#allocation2 + $0x158] sm:$0xff] }
 0x5b2   : > { %9381 = vmatprep.subr.bf16.mxu1 %v9380_v9 }
 0x5b4   : > { %8658 = vmatmul.mubr.f32.gmra.mrb[6].mxu1 %v5236_v34  ;;  %v5256_v34 = vld [vmem:[#allocation2 + $0x170] sm:$0xff] }
 0x5b5   : > { %8660 = vmatprep.mubr.f32.mxu1 %v5237_v4  ;;  %9383 = vmatpush3.bf16.msra.mxu1 %v9380_v9  ;;  %v5250_v9 = vld [vmem:[#allocation2 + $0x128] sm:$0xff]  ;;  %v5876_v4 = vld [vmem:[#allocation8 + $0x410] sm:$0xff] }
 0x5b6   : > { %9385 = vmatprep.subr.bf16.mxu1 %v9384_v30 }
 0x5b8   : > { %8661 = vmatmul.mubr.f32.gmra.mrb[8].mxu1 %v5238_v63 }
 0x5b9   : > { %8663 = vmatprep.mubr.f32.mxu1 %v5239_v49  ;;  %9387 = vmatpush3.bf16.msra.mxu1 %v9384_v30  ;;  %v5255_v30 = vld [vmem:[#allocation2 + $0x168] sm:$0xff]  ;;  %v5880_v49 = vld [vmem:[#allocation8 + $0x430] sm:$0xff] }
 0x5ba   : > { %9389 = vmatprep.subr.bf16.mxu1 %v9388_v10 }
 0x5bc   : > { %8664 = vmatmul.mubr.f32.gmra.mrb[10].mxu1 %v5240_v11  ;;  %v5883_v11 = vld [vmem:[#allocation8 + $0x448] sm:$0xff] }
 0x5bd   : > { %8666 = vmatprep.mubr.f32.mxu1 %v5241_v36  ;;  %9391 = vmatpush3.bf16.msra.mxu1 %v9388_v10  ;;  %v5877_v10 = vld [vmem:[#allocation8 + $0x418] sm:$0xff] }
 0x5be   : > { %9393 = vmatprep.subr.bf16.mxu1 %v9392_v23  ;;  %v9404_v63 = vpack.c.bf16 %v5877_v10, %v5876_v4  ;;  %v5889_v36 = vld [vmem:[#allocation8 + $0x478] sm:$0xff] }
 0x5c0   : > { %8667 = vmatmul.mubr.f32.gmra.mrb[12].mxu1 %v5242_v26  ;;  %v5858_v26 = vld [vmem:[#allocation2 + $0xfa] sm:$0xff] }
 0x5c1   : > { %8669 = vmatprep.mubr.f32.mxu1 %v5243_v17  ;;  %9395 = vmatpush3.bf16.msra.mxu1 %v9392_v23  ;;  %v5861_v17 = vld [vmem:[#allocation2 + $0x122] sm:$0xff] }
 0x5c2   : > { %9397 = vmatprep.subr.bf16.mxu1 %v9396_v19 }
 0x5c4   : > { %8670 = vmatmul.mubr.f32.gmra.mrb[14].mxu1 %v5244_v7  ;;  %v5863_v7 = vld [vmem:[#allocation2 + $0x13a] sm:$0xff] }
 0x5c5   : > { %8672 = vmatprep.mubr.f32.mxu1 %v5245_v54  ;;  %9399 = vmatpush3.bf16.msra.mxu1 %v9396_v19  ;;  %v5857_v19 = vld [vmem:[#allocation2 + $0xf2] sm:$0xff]  ;;  %v5864_v54 = vld [vmem:[#allocation2 + $0x142] sm:$0xff] }
 0x5c6   : > { %9401 = vmatprep.subr.bf16.mxu1 %v9400_v5 }
 0x5c8   : > { %8673 = vmatmul.mubr.f32.gmra.mrb[16].mxu1 %v5246_v29  ;;  %v5865_v29 = vld [vmem:[#allocation2 + $0x152] sm:$0xff] }
 0x5c9   : > { %8675 = vmatprep.mubr.f32.mxu1 %v5247_v15  ;;  %v5866_v15 = vld [vmem:[#allocation2 + $0x15a] sm:$0xff] }
 0x5cc   : > { %8676 = vmatmul.mubr.f32.gmra.mrb[18].mxu1 %v5248_v44  ;;  %v5867_v44 = vld [vmem:[#allocation2 + $0x16a] sm:$0xff] }
 0x5cd   : > { %8678 = vmatprep.mubr.f32.mxu1 %v5249_v32  ;;  %v5868_v32 = vld [vmem:[#allocation2 + $0x172] sm:$0xff] }
 0x5d0   : > { %8679 = vmatmul.mubr.f32.gmra.mrb[20].mxu1 %v5250_v9  ;;  %v5871_v9 = vld [vmem:[#allocation2 + $0x19a] sm:$0xff] }
 0x5d1   : > { %8681 = vmatprep.mubr.f32.mxu1 %v5251_v13  ;;  %v5872_v13 = vld [vmem:[#allocation2 + $0x1a2] sm:$0xff] }
 0x5d4   : > { %8682 = vmatmul.mubr.f32.gmra.mrb[22].mxu1 %v5252_v3  ;;  %v11861_v3 = vld [vmem:[%s12242_s4] ss:$0 sm:$0xff] }
 0x5d5   : > { %8684 = vmatprep.mubr.f32.mxu1 %v5253_v31 }
 0x5d8   : > { %8685 = vmatmul.mubr.f32.gmra.mrb[24].mxu1 %v5254_v48 }
 0x5d9   : > { %8687 = vmatprep.mubr.f32.mxu1 %v5255_v30 }
 0x5dc   : > { %8688 = vmatmul.mubr.f32.gmra.mrb[26].mxu1 %v5256_v34 }
 0x5dd   : > { %8690 = vmatprep.mubr.f32.mxu1 %v11692_v56  ;;  %v9408_v56 = vpack.c.bf16 %v5879_v52, %v5878_v46 }
 0x5e0   : > { %8691 = vmatmul.mubr.f32.gmra.mrb[28].mxu1 %v11695_v14  ;;  %v5881_v14 = vld [vmem:[#allocation8 + $0x438] sm:$0xff] }
 0x5e1   : > { %8693 = vmatprep.mubr.f32.mxu1 %v5259_v62  ;;  %v9412_v23 = vpack.c.bf16 %v5881_v14, %v5880_v49 }
 0x5e4   : > { %8694 = vmatmul.mubr.f32.gmra.mrb[30].mxu1 %v5260_v27 }
 0x5e5   : > { %8728 = vmatprep.mubr.f32.mxu1 %v11698_v21  ;;  %v5882_v21 = vld [vmem:[#allocation8 + $0x440] sm:$0xff] }
 0x5e8   : > { %8729 = vmatmul.mubr.f32.vlgmr.msra.gmra.mrb[0].mxu1 %v11701_v39  ;;  %v9416_v39 = vpack.c.bf16 %v5883_v11, %v5882_v21 }
 0x5e9   : > { %8731 = vmatprep.mubr.f32.mxu1 %v11704_v59  ;;  %9403 = vmatpush3.bf16.msra.mxu1 %v9400_v5  ;;  %v5884_v59 = vld [vmem:[#allocation8 + $0x450] sm:$0xff]  ;;  %v5862_v5 = vld [vmem:[#allocation2 + $0x12a] sm:$0xff] }
 0x5ea   : > { %9405 = vmatprep.subr.bf16.mxu1 %v9404_v63 }
 0x5ec   : > { %8732 = vmatmul.mubr.f32.gmra.mrb[2].mxu1 %v11707_v47  ;;  %v9420_v47 = vpack.c.bf16 %v5885_v1, %v5884_v59 }
 0x5ed   : > { %8734 = vmatprep.mubr.f32.mxu1 %v11710_v22  ;;  %9407 = vmatpush3.bf16.msra.mxu1 %v9404_v63  ;;  %v5886_v22 = vld [vmem:[#allocation8 + $0x460] sm:$0xff] }
 0x5ee   : > { %9409 = vmatprep.subr.bf16.mxu1 %v9408_v56 }
 0x5f0   : > { %8735 = vmatmul.mubr.f32.gmra.mrb[4].mxu1 %v11713_v24  ;;  %v9424_v24 = vpack.c.bf16 %v5887_v35, %v5886_v22 }
 0x5f1   : > { %8737 = vmatprep.mubr.f32.mxu1 %v11716_v53  ;;  %9411 = vmatpush3.bf16.msra.mxu1 %v9408_v56  ;;  %v5888_v53 = vld [vmem:[#allocation8 + $0x470] sm:$0xff] }
 0x5f2   : > { %9413 = vmatprep.subr.bf16.mxu1 %v9412_v23 }
 0x5f4   : > { %8738 = vmatmul.mubr.f32.gmra.mrb[6].mxu1 %v11719_v42  ;;  %v9428_v42 = vpack.c.bf16 %v5889_v36, %v5888_v53 }
 0x5f5   : > { %8740 = vmatprep.mubr.f32.mxu1 %v11722_v18  ;;  %9415 = vmatpush3.bf16.msra.mxu1 %v9412_v23  ;;  %v12389_v18 = vld [vmem:[#allocation51_spill] sm:$0xff] }
 0x5f6   : > { %9417 = vmatprep.subr.bf16.mxu1 %v9416_v39 }
 0x5f8   : > { %8741 = vmatmul.mubr.f32.gmra.mrb[8].mxu1 %v11725_v60  ;;  %v12390_v60 = vld [vmem:[#allocation52_spill] sm:$0xff] }
 0x5f9   : > { %8743 = vmatprep.mubr.f32.mxu1 %v11728_v8  ;;  %9419 = vmatpush3.bf16.msra.mxu1 %v9416_v39  ;;  %v5565_v8 = vld [vmem:[#allocation2 + $0x199] sm:$0xff] }
 0x5fa   : > { %9421 = vmatprep.subr.bf16.mxu1 %v9420_v47 }
 0x5fc   : > { %8744 = vmatmul.mubr.f32.gmra.mrb[10].mxu1 %v11731_v0  ;;  %v5566_v0 = vld [vmem:[#allocation2 + $0x1a1] sm:$0xff] }
 0x5fd   : > { %8746 = vmatprep.mubr.f32.mxu1 %v11734_v61  ;;  %9423 = vmatpush3.bf16.msra.mxu1 %v9420_v47  ;;  %v5841_v61 = vld [vmem:[#allocation2 + $0x32] sm:$0xff] }
 0x5fe   : > { %9425 = vmatprep.subr.bf16.mxu1 %v9424_v24 }
 0x600   : > { %8747 = vmatmul.mubr.f32.gmra.mrb[12].mxu1 %v11737_v41  ;;  %v5842_v41 = vld [vmem:[#allocation2 + $0x3a] sm:$0xff] }
 0x601   : > { %8749 = vmatprep.mubr.f32.mxu1 %v11740_v6  ;;  %9427 = vmatpush3.bf16.msra.mxu1 %v9424_v24  ;;  %v5843_v6 = vld [vmem:[#allocation2 + $0x4a] sm:$0xff] }
 0x602   : > { %9429 = vmatprep.subr.bf16.mxu1 %v9428_v42 }
 0x604   : > { %8750 = vmatmul.mubr.f32.gmra.mrb[14].mxu1 %v11743_v40  ;;  %v5844_v40 = vld [vmem:[#allocation2 + $0x52] sm:$0xff] }
 0x605   : > { %8752 = vmatprep.mubr.f32.mxu1 %v11746_v12  ;;  %9431 = vmatpush3.bf16.msra.mxu1 %v9428_v42  ;;  %v5845_v12 = vld [vmem:[#allocation2 + $0x62] sm:$0xff] }
 0x608   : > { %8753 = vmatmul.mubr.f32.gmra.mrb[16].mxu1 %v11749_v50  ;;  %v5846_v50 = vld [vmem:[#allocation2 + $0x6a] sm:$0xff] }
 0x609   : > { %8755 = vmatprep.mubr.f32.mxu1 %v11752_v33  ;;  %v5847_v33 = vld [vmem:[#allocation2 + $0x7a] sm:$0xff] }
 0x60c   : > { %8756 = vmatmul.mubr.f32.gmra.mrb[18].mxu1 %v11755_v16  ;;  %v5848_v16 = vld [vmem:[#allocation2 + $0x82] sm:$0xff] }
 0x60d   : > { %8758 = vmatprep.mubr.f32.mxu1 %v11758_v28  ;;  %v5849_v28 = vld [vmem:[#allocation2 + $0x92] sm:$0xff] }
 0x610   : > { %8759 = vmatmul.mubr.f32.gmra.mrb[20].mxu1 %v11761_v51  ;;  %v5850_v51 = vld [vmem:[#allocation2 + $0x9a] sm:$0xff] }
 0x611   : > { %8761 = vmatprep.mubr.f32.mxu1 %v11764_v25  ;;  %v5851_v25 = vld [vmem:[#allocation2 + $0xaa] sm:$0xff] }
 0x614   : > { %8762 = vmatmul.mubr.f32.gmra.mrb[22].mxu1 %v11767_v45  ;;  %v5852_v45 = vld [vmem:[#allocation2 + $0xb2] sm:$0xff] }
 0x615   : > { %8764 = vmatprep.mubr.f32.mxu1 %v11770_v2  ;;  %v5853_v2 = vld [vmem:[#allocation2 + $0xc2] sm:$0xff] }
 0x618   : > { %8765 = vmatmul.mubr.f32.gmra.mrb[24].mxu1 %v11773_v38  ;;  %v5854_v38 = vld [vmem:[#allocation2 + $0xca] sm:$0xff] }
 0x619   : > { %8767 = vmatprep.mubr.f32.mxu1 %v11776_v43  ;;  %v5855_v43 = vld [vmem:[#allocation2 + $0xda] sm:$0xff] }
 0x61c   : > { %8768 = vmatmul.mubr.f32.gmra.mrb[26].mxu1 %v11779_v55  ;;  %v5856_v55 = vld [vmem:[#allocation2 + $0xe2] sm:$0xff] }
 0x61d   : > { %8770 = vmatprep.mubr.f32.mxu1 %v12389_v18 }
 0x620   : > { %8771 = vmatmul.mubr.f32.gmra.mrb[28].mxu1 %v12390_v60 }
 0x621   : > { %8773 = vmatprep.mubr.f32.mxu1 %v5565_v8 }
 0x624   : > { %8774 = vmatmul.mubr.f32.gmra.mrb[30].mxu1 %v5566_v0 }
 0x625   : > { %8808 = vmatprep.mubr.f32.mxu1 %v5841_v61 }
 0x628   : > { %8809 = vmatmul.mubr.f32.vlgmr.msra.gmra.mrb[0].mxu1 %v5842_v41 }
 0x629   : > { %8811 = vmatprep.mubr.f32.mxu1 %v5843_v6 }
 0x62c   : > { %8812 = vmatmul.mubr.f32.gmra.mrb[2].mxu1 %v5844_v40 }
 0x62d   : > { %8814 = vmatprep.mubr.f32.mxu1 %v5845_v12 }
 0x630   : > { %8815 = vmatmul.mubr.f32.gmra.mrb[4].mxu1 %v5846_v50 }
 0x631   : > { %8817 = vmatprep.mubr.f32.mxu1 %v5847_v33 }
 0x634   : > { %8818 = vmatmul.mubr.f32.gmra.mrb[6].mxu1 %v5848_v16 }
 0x635   : > { %8820 = vmatprep.mubr.f32.mxu1 %v5849_v28 }
 0x638   : > { %8821 = vmatmul.mubr.f32.gmra.mrb[8].mxu1 %v5850_v51 }
 0x639   : > { %8823 = vmatprep.mubr.f32.mxu1 %v5851_v25 }
 0x63c   : > { %8824 = vmatmul.mubr.f32.gmra.mrb[10].mxu1 %v5852_v45 }
 0x63d   : > { %8826 = vmatprep.mubr.f32.mxu1 %v5853_v2 }
 0x640   : > { %8827 = vmatmul.mubr.f32.gmra.mrb[12].mxu1 %v5854_v38 }
 0x641   : > { %8829 = vmatprep.mubr.f32.mxu1 %v5855_v43 }
 0x644   : > { %8830 = vmatmul.mubr.f32.gmra.mrb[14].mxu1 %v5856_v55 }
 0x645   : > { %8832 = vmatprep.mubr.f32.mxu1 %v5857_v19 }
 0x648   : > { %8833 = vmatmul.mubr.f32.gmra.mrb[16].mxu1 %v5858_v26 }
 0x649   : > { %8835 = vmatprep.mubr.f32.mxu1 %v5859_v20 }
 0x64c   : > { %8836 = vmatmul.mubr.f32.gmra.mrb[18].mxu1 %v5860_v57 }
 0x64d   : > { %8838 = vmatprep.mubr.f32.mxu1 %v5861_v17 }
 0x650   : > { %8839 = vmatmul.mubr.f32.gmra.mrb[20].mxu1 %v5862_v5 }
 0x651   : > { %8841 = vmatprep.mubr.f32.mxu1 %v5863_v7 }
 0x654   : > { %8842 = vmatmul.mubr.f32.gmra.mrb[22].mxu1 %v5864_v54 }
 0x655   : > { %8844 = vmatprep.mubr.f32.mxu1 %v5865_v29 }
 0x658   : > { %8845 = vmatmul.mubr.f32.gmra.mrb[24].mxu1 %v5866_v15 }
 0x659   : > { %8847 = vmatprep.mubr.f32.mxu1 %v5867_v44 }
 0x65c   : > { %8848 = vmatmul.mubr.f32.gmra.mrb[26].mxu1 %v5868_v32 }
 0x65d   : > { %8850 = vmatprep.mubr.f32.mxu1 %v11818_v58 }
 0x660   : > { %8851 = vmatmul.mubr.f32.gmra.mrb[28].mxu1 %v11821_v37 }
 0x661   : > { %8853 = vmatprep.mubr.f32.mxu1 %v5871_v9 }
 0x664   : > { %8854 = vmatmul.mubr.f32.gmra.mrb[30].mxu1 %v5872_v13 }
 0x6fb   : > { %v8810_v31 = vpop.f32.mrb[0].mxu1 }
 0x6fc   : > { %v5956_v48 = vpop.f32.mrb[1].mxu1  ;;  %v11864_v30 = vadd.f32 %v8810_v31, %v11861_v3 }
 0x6fd   : > { %v11867_v34 = vadd.f32 %v11861_v3, %v5956_v48 }
 0x6ff   : > { %v8813_v58 = vpop.f32.mrb[2].mxu1  ;;  %v6186_v37 = vadd.f32 %v11864_v30, %v11867_v34 }
 0x700   : > { %v5966_v62 = vpop.f32.mrb[3].mxu1  ;;  %v11875_v4 = vadd.f32 %v8813_v58, %v11861_v3 }
 0x701   : > { %v11872_v27 = vadd.f32 %v11861_v3, %v5966_v62 }
 0x703   : > { %v6187_v10 = vadd.f32 %v6186_v37, %v11872_v27  ;;  %v8816_v63 = vpop.f32.mrb[4].mxu1 }
 0x704   : > { %v5976_v46 = vpop.f32.mrb[5].mxu1  ;;  %v11883_v49 = vadd.f32 %v8816_v63, %v11861_v3 }
 0x705   : > { %v11879_v52 = vadd.f32 %v11861_v3, %v5976_v46  ;;  %v6188_v56 = vadd.f32 %v6187_v10, %v11875_v4 }
 0x707   : > { %v6189_v14 = vadd.f32 %v6188_v56, %v11879_v52  ;;  %v8819_v23 = vpop.f32.mrb[6].mxu1 }
 0x708   : > { %v5986_v21 = vpop.f32.mrb[7].mxu1  ;;  %v11891_v59 = vadd.f32 %v8819_v23, %v11861_v3 }
 0x709   : > { %v11887_v11 = vadd.f32 %v11861_v3, %v5986_v21  ;;  %v6190_v39 = vadd.f32 %v6189_v14, %v11883_v49 }
 0x70b   : > { %v6191_v1 = vadd.f32 %v6190_v39, %v11887_v11  ;;  %v8822_v47 = vpop.f32.mrb[8].mxu1 }
 0x70c   : > { %v5996_v22 = vpop.f32.mrb[9].mxu1  ;;  %v11899_v53 = vadd.f32 %v8822_v47, %v11861_v3 }
 0x70d   : > { %v11895_v35 = vadd.f32 %v11861_v3, %v5996_v22  ;;  %v6192_v24 = vadd.f32 %v6191_v1, %v11891_v59 }
 0x70f   : > { %v6193_v36 = vadd.f32 %v6192_v24, %v11895_v35  ;;  %v8825_v42 = vpop.f32.mrb[10].mxu1 }
 0x710   : > { %v6006_v18 = vpop.f32.mrb[11].mxu1  ;;  %v11907_v0 = vadd.f32 %v8825_v42, %v11861_v3 }
 0x711   : > { %v11903_v60 = vadd.f32 %v11861_v3, %v6006_v18  ;;  %v6194_v8 = vadd.f32 %v6193_v36, %v11899_v53 }
 0x713   : > { %v6195_v61 = vadd.f32 %v6194_v8, %v11903_v60  ;;  %v8828_v41 = vpop.f32.mrb[12].mxu1 }
 0x714   : > { %v6016_v6 = vpop.f32.mrb[13].mxu1  ;;  %v11915_v50 = vadd.f32 %v8828_v41, %v11861_v3 }
 0x715   : > { %v11911_v40 = vadd.f32 %v11861_v3, %v6016_v6  ;;  %v6196_v12 = vadd.f32 %v6195_v61, %v11907_v0 }
 0x717   : > { %v6197_v33 = vadd.f32 %v6196_v12, %v11911_v40  ;;  %v8831_v16 = vpop.f32.mrb[14].mxu1 }
 0x718   : > { %v6026_v28 = vpop.f32.mrb[15].mxu1  ;;  %v11923_v45 = vadd.f32 %v8831_v16, %v11861_v3 }
 0x719   : > { %v11919_v51 = vadd.f32 %v11861_v3, %v6026_v28  ;;  %v6198_v25 = vadd.f32 %v6197_v33, %v11915_v50 }
 0x71b   : > { %v6199_v2 = vadd.f32 %v6198_v25, %v11919_v51  ;;  %v8834_v38 = vpop.f32.mrb[16].mxu1 }
 0x71c   : > { %v6036_v43 = vpop.f32.mrb[17].mxu1  ;;  %v6171_v26 = vadd.f32 %v8834_v38, %v11861_v3 }
 0x71d   : > { %v6170_v55 = vadd.f32 %v11861_v3, %v6036_v43  ;;  %v6200_v19 = vadd.f32 %v6199_v2, %v11923_v45 }
 0x71f   : > { %v6201_v20 = vadd.f32 %v6200_v19, %v6170_v55  ;;  %v8837_v57 = vpop.f32.mrb[18].mxu1 }
 0x720   : > { %v6046_v17 = vpop.f32.mrb[19].mxu1  ;;  %v6173_v54 = vadd.f32 %v8837_v57, %v11861_v3 }
 0x721   : > { %v6172_v5 = vadd.f32 %v11861_v3, %v6046_v17  ;;  %v6202_v7 = vadd.f32 %v6201_v20, %v6171_v26 }
 0x723   : > { %v6203_v29 = vadd.f32 %v6202_v7, %v6172_v5  ;;  %v8840_v15 = vpop.f32.mrb[20].mxu1 }
 0x724   : > { %v6056_v44 = vpop.f32.mrb[21].mxu1  ;;  %v6175_v13 = vadd.f32 %v8840_v15, %v11861_v3 }
 0x725   : > { %v6174_v32 = vadd.f32 %v11861_v3, %v6056_v44  ;;  %v6204_v9 = vadd.f32 %v6203_v29, %v6173_v54 }
 0x727   : > { %v6205_v31 = vadd.f32 %v6204_v9, %v6174_v32  ;;  %v8843_v48 = vpop.f32.mrb[22].mxu1 }
 0x728   : > { %v6066_v58 = vpop.f32.mrb[23].mxu1  ;;  %v6177_v10 = vadd.f32 %v8843_v48, %v11861_v3 }
 0x729   : > { %v6176_v62 = vadd.f32 %v11861_v3, %v6066_v58  ;;  %v6206_v37 = vadd.f32 %v6205_v31, %v6175_v13 }
 0x72b   : > { %v6207_v63 = vadd.f32 %v6206_v37, %v6176_v62  ;;  %v8846_v46 = vpop.f32.mrb[24].mxu1 }
 0x72c   : > { %v6076_v56 = vpop.f32.mrb[25].mxu1  ;;  %v6179_v21 = vadd.f32 %v8846_v46, %v11861_v3 }
 0x72d   : > { %v6178_v14 = vadd.f32 %v11861_v3, %v6076_v56  ;;  %v6208_v23 = vadd.f32 %v6207_v63, %v6177_v10 }
 0x72f   : > { %v6209_v39 = vadd.f32 %v6208_v23, %v6178_v14  ;;  %v8849_v1 = vpop.f32.mrb[26].mxu1 }
 0x730   : > { %v6086_v47 = vpop.f32.mrb[27].mxu1  ;;  %v6181_v36 = vadd.f32 %v8849_v1, %v11861_v3 }
 0x731   : > { %v6180_v22 = vadd.f32 %v11861_v3, %v6086_v47  ;;  %v6210_v24 = vadd.f32 %v6209_v39, %v6179_v21 }
 0x733   : > { %v6211_v42 = vadd.f32 %v6210_v24, %v6180_v22  ;;  %v8852_v18 = vpop.f32.mrb[28].mxu1 }
 0x734   : > { %v6096_v8 = vpop.f32.mrb[29].mxu1  ;;  %v6183_v6 = vadd.f32 %v8852_v18, %v11861_v3 }
 0x735   : > { %v6182_v61 = vadd.f32 %v11861_v3, %v6096_v8  ;;  %v6212_v41 = vadd.f32 %v6211_v42, %v6181_v36 }
 0x737   : > { %v6213_v12 = vadd.f32 %v6212_v41, %v6182_v61  ;;  %v8855_v33 = vpop.f32.mrb[30].mxu1 }
 0x738   : > { %v6106_v16 = vpop.f32.mrb[31].mxu1  ;;  %v6185_v2 = vadd.f32 %v8855_v33, %v11861_v3 }
 0x739   : > { %v6184_v28 = vadd.f32 %v11861_v3, %v6106_v16  ;;  %v6214_v25 = vadd.f32 %v6213_v12, %v6183_v6 }
 0x73b   : > { %v6215_v38 = vadd.f32 %v6214_v25, %v6184_v28 }
 0x73d   : > { %v6216_v43 = vadd.f32 %v6215_v38, %v6185_v2 }
 0x73f   : > { %v6217_v19 = vrot.slane %v6216_v43, 4 }
 0x741   : > { %v6218_v20 = vadd.f32 %v6217_v19, %v6216_v43 }
 0x743   : > { %v6219_v57 = vrot.slane %v6218_v20, 2 }
 0x745   : > { %v6220_v17 = vadd.f32 %v6219_v57, %v6218_v20 }
 0x747   : > { %v6221_v7 = vrot.slane %v6220_v17, 1 }
 0x749   : > { %v6222_v29 = vadd.f32 %v6221_v7, %v6220_v17 }
 0x74b   : > { %v6223_v15 = vmul.f32 0.00390625, %v6222_v29 }
 0x74d   : > { %v11944_v44 = vsub.f32 %v11895_v35, %v6223_v15  ;;  %v11947_v9 = vsub.f32 %v11899_v53, %v6223_v15  ;;  %v11950_v31 = vsub.f32 %v11903_v60, %v6223_v15  ;;  %v11953_v3 = vsub.f32 %v11907_v0, %v6223_v15 }
 0x74e   : > { %v11956_v48 = vsub.f32 %v11911_v40, %v6223_v15  ;;  %v11959_v58 = vsub.f32 %v11915_v50, %v6223_v15  ;;  %v11962_v37 = vsub.f32 %v11919_v51, %v6223_v15  ;;  %v11965_v35 = vsub.f32 %v11923_v45, %v6223_v15 }
 0x74f   : > { %v11967_v53 = vsub.f32 %v6170_v55, %v6223_v15  ;;  %v11969_v63 = vsub.f32 %v6171_v26, %v6223_v15  ;;  %v11971_v60 = vsub.f32 %v6172_v5, %v6223_v15  ;;  %v11973_v0 = vsub.f32 %v6173_v54, %v6223_v15 }
 0x750   : > { %v11975_v46 = vsub.f32 %v6174_v32, %v6223_v15  ;;  %v11977_v40 = vsub.f32 %v6175_v13, %v6223_v15  ;;  %v11979_v50 = vsub.f32 %v6176_v62, %v6223_v15  ;;  %v11981_v56 = vsub.f32 %v6177_v10, %v6223_v15 }
 0x751   : > { %v11983_v51 = vsub.f32 %v6178_v14, %v6223_v15  ;;  %v11985_v45 = vsub.f32 %v6179_v21, %v6223_v15  ;;  %v11987_v55 = vsub.f32 %v6180_v22, %v6223_v15  ;;  %v11989_v26 = vsub.f32 %v6181_v36, %v6223_v15 }
 0x752   : > { %v11991_v5 = vsub.f32 %v6182_v61, %v6223_v15  ;;  %v11993_v54 = vsub.f32 %v6183_v6, %v6223_v15  ;;  %v11995_v32 = vsub.f32 %v6184_v28, %v6223_v15  ;;  %v11997_v13 = vsub.f32 %v6185_v2, %v6223_v15 }
 0x753   : > { %v12000_v62 = vsub.f32 %v11867_v34, %v6223_v15  ;;  %v12003_v10 = vsub.f32 %v11864_v30, %v6223_v15  ;;  %v12006_v14 = vsub.f32 %v11872_v27, %v6223_v15  ;;  %v12013_v39 = vsub.f32 %v11875_v4, %v6223_v15 }
 0x754   : > { %v12016_v1 = vsub.f32 %v11879_v52, %v6223_v15  ;;  %v12021_v47 = vsub.f32 %v11883_v49, %v6223_v15  ;;  %v12026_v24 = vsub.f32 %v11887_v11, %v6223_v15  ;;  %v12031_v52 = vsub.f32 %v11891_v59, %v6223_v15 }
 0x755   : > { %v6256_v23 = vmul.f32 %v12000_v62, %v12000_v62  ;;  %v6257_v21 = vmul.f32 %v12003_v10, %v12003_v10  ;;  %v6258_v34 = vmul.f32 %v12006_v14, %v12006_v14  ;;  %v6259_v27 = vmul.f32 %v12013_v39, %v12013_v39 }
 0x756   : > { %v6260_v4 = vmul.f32 %v12016_v1, %v12016_v1  ;;  %v6261_v42 = vmul.f32 %v12021_v47, %v12021_v47  ;;  %v6262_v49 = vmul.f32 %v12026_v24, %v12026_v24  ;;  %v6263_v61 = vmul.f32 %v12031_v52, %v12031_v52 }
 0x757   : > { %v6288_v30 = vadd.f32 %v6257_v21, %v6256_v23  ;;  %v6264_v41 = vmul.f32 %v11944_v44, %v11944_v44  ;;  %v6265_v59 = vmul.f32 %v11947_v9, %v11947_v9  ;;  %v6266_v33 = vmul.f32 %v11950_v31, %v11950_v31 }
 0x758   : > { %v6267_v28 = vmul.f32 %v11953_v3, %v11953_v3  ;;  %v6268_v2 = vmul.f32 %v11956_v48, %v11956_v48  ;;  %v6269_v43 = vmul.f32 %v11959_v58, %v11959_v58  ;;  %v6270_v20 = vmul.f32 %v11962_v37, %v11962_v37 }
 0x759   : > { %v6289_v22 = vadd.f32 %v6288_v30, %v6258_v34  ;;  %v6271_v17 = vmul.f32 %v11965_v35, %v11965_v35  ;;  %v6272_v29 = vmul.f32 %v11967_v53, %v11967_v53  ;;  %v6273_v23 = vmul.f32 %v11969_v63, %v11969_v63 }
 0x75a   : > { %v6274_v34 = vmul.f32 %v11971_v60, %v11971_v60 }
 0x75b   : > { %v6290_v36 = vadd.f32 %v6289_v22, %v6259_v27  ;;  %v6275_v27 = vmul.f32 %v11973_v0, %v11973_v0 }
 0x75d   : > { %v6291_v18 = vadd.f32 %v6290_v36, %v6260_v4  ;;  %v6276_v4 = vmul.f32 %v11975_v46, %v11975_v46 }
 0x75f   : > { %v6292_v8 = vadd.f32 %v6291_v18, %v6261_v42  ;;  %v6277_v42 = vmul.f32 %v11977_v40, %v11977_v40 }
 0x761   : > { %v6293_v11 = vadd.f32 %v6292_v8, %v6262_v49  ;;  %v6278_v49 = vmul.f32 %v11979_v50, %v11979_v50 }
 0x763   : > { %v6294_v6 = vadd.f32 %v6293_v11, %v6263_v61  ;;  %v6279_v61 = vmul.f32 %v11981_v56, %v11981_v56 }
 0x765   : > { %v6295_v12 = vadd.f32 %v6294_v6, %v6264_v41  ;;  %v6280_v41 = vmul.f32 %v11983_v51, %v11983_v51 }
 0x767   : > { %v6296_v16 = vadd.f32 %v6295_v12, %v6265_v59  ;;  %v6281_v59 = vmul.f32 %v11985_v45, %v11985_v45 }
 0x769   : > { %v6297_v25 = vadd.f32 %v6296_v16, %v6266_v33  ;;  %v6282_v33 = vmul.f32 %v11987_v55, %v11987_v55 }
 0x76b   : > { %v6298_v38 = vadd.f32 %v6297_v25, %v6267_v28  ;;  %v6283_v28 = vmul.f32 %v11989_v26, %v11989_v26 }
 0x76d   : > { %v6299_v19 = vadd.f32 %v6298_v38, %v6268_v2  ;;  %v6284_v2 = vmul.f32 %v11991_v5, %v11991_v5 }
 0x76f   : > { %v6300_v57 = vadd.f32 %v6299_v19, %v6269_v43  ;;  %v6285_v43 = vmul.f32 %v11993_v54, %v11993_v54 }
 0x771   : > { %v6301_v7 = vadd.f32 %v6300_v57, %v6270_v20  ;;  %v6286_v20 = vmul.f32 %v11995_v32, %v11995_v32 }
 0x773   : > { %v6302_v15 = vadd.f32 %v6301_v7, %v6271_v17  ;;  %v6287_v17 = vmul.f32 %v11997_v13, %v11997_v13 }
 0x775   : > { %v6303_v21 = vadd.f32 %v6302_v15, %v6272_v29 }
 0x777   : > { %v6304_v30 = vadd.f32 %v6303_v21, %v6273_v23 }
 0x779   : > { %v6305_v22 = vadd.f32 %v6304_v30, %v6274_v34 }
 0x77b   : > { %v6306_v36 = vadd.f32 %v6305_v22, %v6275_v27 }
 0x77d   : > { %v6307_v18 = vadd.f32 %v6306_v36, %v6276_v4 }
 0x77f   : > { %v6308_v8 = vadd.f32 %v6307_v18, %v6277_v42 }
 0x781   : > { %v6309_v11 = vadd.f32 %v6308_v8, %v6278_v49 }
 0x783   : > { %v6310_v6 = vadd.f32 %v6309_v11, %v6279_v61 }
 0x785   : > { %v6311_v12 = vadd.f32 %v6310_v6, %v6280_v41 }
 0x787   : > { %v6312_v16 = vadd.f32 %v6311_v12, %v6281_v59  ;;  %v12391_v59 = vld [vmem:[#allocation28_spill] sm:$0xff] }
 0x789   : > { %v6313_v25 = vadd.f32 %v6312_v16, %v6282_v33 }
 0x78b   : > { %v6314_v38 = vadd.f32 %v6313_v25, %v6283_v28 }
 0x78d   : > { %v6315_v19 = vadd.f32 %v6314_v38, %v6284_v2  ;;  %v12396_v2 = vld [vmem:[#allocation17_spill] sm:$0xff]  ;;  %v12397_v38 = vld [vmem:[#allocation18_spill] sm:$0xff] }
 0x78f   : > { %v6316_v57 = vadd.f32 %v6315_v19, %v6285_v43  ;;  %v12398_v43 = vld [vmem:[#allocation19_spill] sm:$0xff]  ;;  %v12399_v19 = vld [vmem:[#allocation20_spill] sm:$0xff] }
 0x791   : > { %v6317_v7 = vadd.f32 %v6316_v57, %v6286_v20  ;;  %v12400_v20 = vld [vmem:[#allocation21_spill] sm:$0xff] }
 0x793   : > { %v6318_v29 = vadd.f32 %v6317_v7, %v6287_v17  ;;  %v12401_v17 = vld [vmem:[#allocation22_spill] sm:$0xff] }
 0x795   : > { %v6319_v15 = vrot.slane %v6318_v29, 4 }
 0x797   : > { %v6320_v23 = vadd.f32 %v6319_v15, %v6318_v29  ;;  %v12402_v29 = vld [vmem:[#allocation23_spill] sm:$0xff] }
 0x799   : > { %v6321_v21 = vrot.slane %v6320_v23, 2 }
 0x79b   : > { %v6322_v34 = vadd.f32 %v6321_v21, %v6320_v23  ;;  %v12403_v23 = vld [vmem:[#allocation24_spill] sm:$0xff] }
 0x79d   : > { %v6323_v30 = vrot.slane %v6322_v34, 1 }
 0x79f   : > { %v6324_v27 = vadd.f32 %v6323_v30, %v6322_v34  ;;  %v12404_v34 = vld [vmem:[#allocation25_spill] sm:$0xff] }
 0x7a1   : > { %v6325_v22 = vmul.f32 0.00390625, %v6324_v27  ;;  %v12405_v27 = vld [vmem:[#allocation36_spill] sm:$0xff] }
 0x7a3   : > { %v6326_v4 = vadd.f32 1e-05, %v6325_v22 }
 0x7a5   : > { %10017 = vrsqrt.f32 %v6326_v4  ;;  %v12406_v4 = vld [vmem:[#allocation26_spill] sm:$0xff] }
 0x7af   : > { %v10018_v36 = vpop.eup %10017 }
 0x7b0   : > { %v6358_v42 = vmul.f32 %v10018_v36, %v11995_v32  ;;  %v6328_v18 = vmul.f32 %v10018_v36, %v12000_v62  ;;  %v6329_v49 = vmul.f32 %v10018_v36, %v12003_v10  ;;  %v6330_v8 = vmul.f32 %v10018_v36, %v12006_v14 }
 0x7b1   : > { %v6331_v61 = vmul.f32 %v10018_v36, %v12013_v39  ;;  %v6332_v11 = vmul.f32 %v10018_v36, %v12016_v1  ;;  %v6333_v41 = vmul.f32 %v10018_v36, %v12021_v47  ;;  %v6334_v6 = vmul.f32 %v10018_v36, %v12026_v24 }
 0x7b2   : > { %v6390_v12 = vadd.f32 %v12391_v59, %v6358_v42  ;;  %v6335_v33 = vmul.f32 %v10018_v36, %v12031_v52  ;;  %v6336_v32 = vmul.f32 %v10018_v36, %v11944_v44  ;;  %v6337_v62 = vmul.f32 %v10018_v36, %v11947_v9  ;;  %v12407_v42 = vld [vmem:[#allocation27_spill] sm:$0xff]  ;;  %v12411_v59 = vld [vmem:[#allocation40_spill] sm:$0xff] }
 0x7b3   : > { %v6338_v10 = vmul.f32 %v10018_v36, %v11950_v31  ;;  %v6339_v14 = vmul.f32 %v10018_v36, %v11953_v3  ;;  %v6340_v39 = vmul.f32 %v10018_v36, %v11956_v48  ;;  %v6341_v1 = vmul.f32 %v10018_v36, %v11959_v58 }
 0x7b4   : > { %6422 = vst [vmem:[%s12105_s10 + $0xf0] sm:$0xff] %v6390_v12  ;;  %v6342_v47 = vmul.f32 %v10018_v36, %v11962_v37  ;;  %v6343_v24 = vmul.f32 %v10018_v36, %v11965_v35  ;;  %v6344_v44 = vmul.f32 %v10018_v36, %v11967_v53  ;;  %v6345_v9 = vmul.f32 %v10018_v36, %v11969_v63 }
 0x7b5   : > { %v6346_v31 = vmul.f32 %v10018_v36, %v11971_v60  ;;  %v6347_v3 = vmul.f32 %v10018_v36, %v11973_v0  ;;  %v6348_v48 = vmul.f32 %v10018_v36, %v11975_v46  ;;  %v6349_v58 = vmul.f32 %v10018_v36, %v11977_v40  ;;  %v12392_v40 = vld [vmem:[#allocation15_spill] sm:$0xff] }
 0x7b6   : > { %v6350_v52 = vmul.f32 %v10018_v36, %v11979_v50  ;;  %v6351_v16 = vmul.f32 %v10018_v36, %v11981_v56  ;;  %v6352_v37 = vmul.f32 %v10018_v36, %v11983_v51  ;;  %v6353_v35 = vmul.f32 %v10018_v36, %v11985_v45  ;;  %v12393_v56 = vld [vmem:[#allocation16_spill] sm:$0xff]  ;;  %v12394_v51 = vld [vmem:[#allocation13_spill] sm:$0xff]  ;;  %v12395_v45 = vld [vmem:[#allocation14_spill] sm:$0xff] }
 0x7b7   : > { %v6354_v53 = vmul.f32 %v10018_v36, %v11987_v55  ;;  %v6355_v63 = vmul.f32 %v10018_v36, %v11989_v26  ;;  %v6356_v60 = vmul.f32 %v10018_v36, %v11991_v5  ;;  %v6357_v0 = vmul.f32 %v10018_v36, %v11993_v54 }
 0x7b8   : > { %v6359_v46 = vmul.f32 %v10018_v36, %v11997_v13  ;;  %v6360_v50 = vadd.f32 %v6328_v18, %v12392_v40  ;;  %v6361_v28 = vadd.f32 %v6329_v49, %v12393_v56  ;;  %v6362_v25 = vadd.f32 %v6330_v8, %v12394_v51  ;;  %v12408_v49 = vld [vmem:[#allocation37_spill] sm:$0xff] }
 0x7b9   : > { %v6363_v55 = vadd.f32 %v6331_v61, %v12395_v45  ;;  %v6364_v26 = vadd.f32 %v6332_v11, %v12396_v2  ;;  %v6365_v5 = vadd.f32 %v6333_v41, %v12397_v38  ;;  %v6366_v54 = vadd.f32 %v6334_v6, %v12398_v43  ;;  %v12409_v61 = vld [vmem:[#allocation38_spill] sm:$0xff]  ;;  %v12410_v41 = vld [vmem:[#allocation39_spill] sm:$0xff]  ;;  %v12422_v40 = vld [vmem:[#allocation29_spill] sm:$0xff] }
 0x7ba   : > { %v6367_v13 = vadd.f32 %v6335_v33, %v12399_v19  ;;  %v6368_v57 = vadd.f32 %v6336_v32, %v12400_v20  ;;  %v6369_v7 = vadd.f32 %v6337_v62, %v12401_v17  ;;  %v6370_v15 = vadd.f32 %v6338_v10, %v12402_v29  ;;  %6392 = vst [vmem:[%s12105_s10] sm:$0xff] %v6360_v50  ;;  %v12412_v33 = vld [vmem:[#allocation41_spill] sm:$0xff]  ;;  %v12413_v62 = vld [vmem:[#allocation42_spill] sm:$0xff] }
 0x7bb   : > { %6393 = vst [vmem:[%s12105_s10 + $0x8] sm:$0xff] %v6361_v28  ;;  %6394 = vst [vmem:[%s12105_s10 + $0x10] sm:$0xff] %v6362_v25  ;;  %v6371_v21 = vadd.f32 %v6339_v14, %v12403_v23  ;;  %v6372_v30 = vadd.f32 %v6340_v39, %v12404_v34  ;;  %v6373_v22 = vadd.f32 %v12405_v27, %v6341_v1  ;;  %v12414_v14 = vld [vmem:[#allocation43_spill] sm:$0xff]  ;;  %v12415_v1 = vld [vmem:[#allocation44_spill] sm:$0xff] }
 0x7bc   : > { %v6374_v36 = vadd.f32 %v6342_v47, %v12406_v4  ;;  %6395 = vst [vmem:[%s12105_s10 + $0x18] sm:$0xff] %v6363_v55  ;;  %6396 = vst [vmem:[%s12105_s10 + $0x20] sm:$0xff] %v6364_v26  ;;  %v6375_v18 = vadd.f32 %v6343_v24, %v12407_v42  ;;  %v6376_v8 = vadd.f32 %v12408_v49, %v6344_v44  ;;  %v12416_v24 = vld [vmem:[#allocation45_spill] sm:$0xff] }
 0x7bd   : > { %6397 = vst [vmem:[%s12105_s10 + $0x28] sm:$0xff] %v6365_v5  ;;  %6398 = vst [vmem:[%s12105_s10 + $0x30] sm:$0xff] %v6366_v54  ;;  %v6377_v11 = vadd.f32 %v12409_v61, %v6345_v9  ;;  %v6378_v6 = vadd.f32 %v12410_v41, %v6346_v31  ;;  %v6379_v12 = vadd.f32 %v12411_v59, %v6347_v3  ;;  %v12417_v9 = vld [vmem:[#allocation46_spill] sm:$0xff]  ;;  %v12418_v3 = vld [vmem:[#allocation47_spill] sm:$0xff] }
 0x7be   : > { %6399 = vst [vmem:[%s12105_s10 + $0x38] sm:$0xff] %v6367_v13  ;;  %6400 = vst [vmem:[%s12105_s10 + $0x40] sm:$0xff] %v6368_v57  ;;  %v6380_v32 = vadd.f32 %v12412_v33, %v6348_v48  ;;  %v6381_v10 = vadd.f32 %v12413_v62, %v6349_v58  ;;  %v6382_v39 = vadd.f32 %v12414_v14, %v6350_v52  ;;  %v12419_v58 = vld [vmem:[#allocation48_spill] sm:$0xff] }
 0x7bf   : > { %6401 = vst [vmem:[%s12105_s10 + $0x48] sm:$0xff] %v6369_v7  ;;  %6402 = vst [vmem:[%s12105_s10 + $0x50] sm:$0xff] %v6370_v15  ;;  %v6383_v47 = vadd.f32 %v12415_v1, %v6351_v16  ;;  %v6384_v44 = vadd.f32 %v12416_v24, %v6352_v37  ;;  %v6385_v31 = vadd.f32 %v12417_v9, %v6353_v35  ;;  %v12420_v16 = vld [vmem:[#allocation49_spill] sm:$0xff]  ;;  %v12421_v35 = vld [vmem:[#allocation50_spill] sm:$0xff] }
 0x7c0   : > { %6403 = vst [vmem:[%s12105_s10 + $0x58] sm:$0xff] %v6371_v21  ;;  %6404 = vst [vmem:[%s12105_s10 + $0x60] sm:$0xff] %v6372_v30  ;;  %v6386_v48 = vadd.f32 %v12418_v3, %v6354_v53  ;;  %v6387_v52 = vadd.f32 %v12419_v58, %v6355_v63  ;;  %v6388_v37 = vadd.f32 %v12420_v16, %v6356_v60 }
 0x7c1   : > { %6405 = vst [vmem:[%s12105_s10 + $0x68] sm:$0xff] %v6373_v22  ;;  %6406 = vst [vmem:[%s12105_s10 + $0x70] sm:$0xff] %v6374_v36  ;;  %v6389_v53 = vadd.f32 %v12421_v35, %v6357_v0  ;;  %v6391_v50 = vadd.f32 %v12422_v40, %v6359_v46 }
 0x7c2   : > { %6407 = vst [vmem:[%s12105_s10 + $0x78] sm:$0xff] %v6375_v18  ;;  %6408 = vst [vmem:[%s12105_s10 + $0x80] sm:$0xff] %v6376_v8 }
 0x7c3   : > { %6409 = vst [vmem:[%s12105_s10 + $0x88] sm:$0xff] %v6377_v11  ;;  %6410 = vst [vmem:[%s12105_s10 + $0x90] sm:$0xff] %v6378_v6 }
 0x7c4   : > { %6411 = vst [vmem:[%s12105_s10 + $0x98] sm:$0xff] %v6379_v12  ;;  %6412 = vst [vmem:[%s12105_s10 + $0xa0] sm:$0xff] %v6380_v32 }
 0x7c5   : > { %6413 = vst [vmem:[%s12105_s10 + $0xa8] sm:$0xff] %v6381_v10  ;;  %6414 = vst [vmem:[%s12105_s10 + $0xb0] sm:$0xff] %v6382_v39 }
 0x7c6   : > { %6415 = vst [vmem:[%s12105_s10 + $0xb8] sm:$0xff] %v6383_v47  ;;  %6416 = vst [vmem:[%s12105_s10 + $0xc0] sm:$0xff] %v6384_v44 }
 0x7c7   : > { %6417 = vst [vmem:[%s12105_s10 + $0xc8] sm:$0xff] %v6385_v31  ;;  %6418 = vst [vmem:[%s12105_s10 + $0xd0] sm:$0xff] %v6386_v48 }
 0x7c8   : > { %6419 = vst [vmem:[%s12105_s10 + $0xd8] sm:$0xff] %v6387_v52  ;;  %6420 = vst [vmem:[%s12105_s10 + $0xe0] sm:$0xff] %v6388_v37 }
 0x7c9   : > { %6421 = vst [vmem:[%s12105_s10 + $0xe8] sm:$0xff] %v6389_v53  ;;  %6423 = vst [vmem:[%s12105_s10 + $0xf8] sm:$0xff] %v6391_v50 }
 0x7ca   : > { %10135 = shalt.err (!%p10132_p1)
}
 0x7cb   : > { %s10136_s12 = scalar_lea.hbm %s12176_s30, 4096  ;;  %s10140_s15 = scalar_lea.hbm %s12243_s5, 8192 }
 0x7cc   : > { %p10137_p13 = scmp.ne.s32.totalorder %s12176_s30, %s10136_s12  ;;  %p10141_p4 = scmp.lt.u32.totalorder %s12176_s30, %s12243_s5 }
 0x7cd   : > { %p10142_p5 = scmp.lt.u32.totalorder %s10140_s15, %s10136_s12  ;;  %p10144_p11 = scmp.lt.u32.totalorder %s10136_s12, %s12176_s30 }
 0x7ce   : > { %p10138_p6 = pnand %p10137_p13, %p12423_p0 }
 0x7cf   : > { %p10143_p8 = por %p10142_p5, %p10141_p4 }
 0x7d0   : > { %p10139_p10 = pneg %p10138_p6 }
 0x7d1   : > { %p10145_p2 = por %p10144_p11, %p10143_p8 }
 0x7d3   : > { %p10146_p3 = pnand %p10145_p2, %p10139_p10 }
 0x7d5   : > { %10149 = shalt.err (!%p10146_p3)
}
 0x7d6   : > { %s10200_s28 = smov 128   ;;  %s10201_s22 = smov 8  }
 0x7d7   : > { %9954 = dma.vmem_to_hbm [thread:$0]  (%p12423_p0), %s12178_s13, 4096, %s12176_s30, %s6425_s11, %s10200_s28, %s10200_s28, %s10201_s22  }
 0x7d8 PF: > { %s6453_s9 = sand.u32 1, %s10180_s18   ;;  %p12424_p7 = scmp.ne.s32.totalorder %s12307_s25, 0 }
 0x7d9   : > { %p12425_p9 = scmp.ge.s32.totalorder %s10192_s21, 2  ;;  %s6454_s17 = scalar_lea.sflag [#allocation5], %s6453_s9 }
 0x7db   : > { %p9968_p12 = pnand %p12425_p9, %p12424_p7 }
 0x7dd   : > { %10175 = dma.done.wait (!%p9968_p12), %s6454_s17, 4096  }
 0x7de   : > { %10177 = vsyncadd (!%p9968_p12), %s6454_s17, 4294963200  ;;  %p19_p1 = scmp.ge.s32.totalorder %s10348_s29, 4   ;;  %s12426_s18 = smov %s10184_s19 }
 0x7df   : > { %s12427_s19 = smov %s10188_s20  ;;  %s12428_s20 = smov %s10364_s27 }
 0x7e0   : > { %s12429_s21 = smov %s10348_s29  ;;  %21 = sbr.rel (!%p19_p1) target bundleno = 6 (0x6), region = 112 }
 0x7e7   :  { %6459 = vsyncpa [#allocation4], 1 }
 0x7e8   :  { %6461 = vsyncpa [#allocation4 + $0x1], 1 }
 0x7e9   :  { %6462 = vsyncpa [#allocation7], 1 }
 0x7ea   :  { %6463 = vsyncpa [#allocation5], 1 }
 0x7eb   :  { %6465 = vsyncpa [#allocation5 + $0x1], 1 }

</bundles_post_ra>
